<compile_context>
chip_gen: v6e
topology: v6e:2x2x1
jax: 0.10.0
libtpu: 0.0.40
codegen_flags: <defaults>
</compile_context>

<pallas_src>
import functools

import jax
import jax.numpy as jnp
from jax.experimental import pallas as pl
from jax.experimental.pallas import tpu as pltpu


# ----------------------------------------------------------------------------
# helpers
# ----------------------------------------------------------------------------
def _round_up(x, m):
    return (x + m - 1) // m * m


# ----------------------------------------------------------------------------
# Pallas kernels
# ----------------------------------------------------------------------------
def _matmul_bias_act_kernel(a_ref, b_ref, bias_ref, o_ref, acc_ref, *,
                            activation):
    """Tiled matmul with K-axis accumulation, fused bias + activation."""
    @pl.when(pl.program_id(2) == 0)
    def _():
        acc_ref[...] = jnp.zeros_like(acc_ref)

    acc_ref[...] += jnp.dot(a_ref[...], b_ref[...],
                            preferred_element_type=jnp.float32)

    @pl.when(pl.program_id(2) == pl.num_programs(2) - 1)
    def _():
        y = acc_ref[...] + bias_ref[...]          # (tm, 1) broadcast over lanes
        if activation == "relu":
            y = jnp.maximum(y, 0.0)
        elif activation == "tanh":
            y = jnp.tanh(y)
        o_ref[...] = y.astype(o_ref.dtype)


def pallas_matmul(a, b, bias, activation="none", out_dtype=jnp.float32):
    """a: (M, K), b: (K, N), bias: (M,) -> (M, N), bias + activation fused.

    M is the (small) channel axis, N the large spatial axis (lane-dense out).
    """
    M, K = a.shape
    K2, N = b.shape
    assert K == K2

    tm = 128 if M >= 128 else _round_up(M, 8)
    tn = 512 if N >= 512 else _round_up(N, 128)
    tk = 256 if K >= 256 else _round_up(K, 128)
    Mp, Np, Kp = _round_up(M, tm), _round_up(N, tn), _round_up(K, tk)

    a_p = a if (Mp, Kp) == (M, K) else jnp.pad(a, ((0, Mp - M), (0, Kp - K)))
    b_p = b if (Kp, Np) == (K, N) else jnp.pad(b, ((0, Kp - K), (0, Np - N)))
    bias_p = jnp.pad(bias, (0, Mp - M)).reshape(Mp, 1)

    grid = (Mp // tm, Np // tn, Kp // tk)
    out = pl.pallas_call(
        functools.partial(_matmul_bias_act_kernel, activation=activation),
        out_shape=jax.ShapeDtypeStruct((Mp, Np), out_dtype),
        grid_spec=pltpu.PrefetchScalarGridSpec(
            num_scalar_prefetch=0,
            grid=grid,
            in_specs=[
                pl.BlockSpec((tm, tk), lambda i, j, kk: (i, kk)),
                pl.BlockSpec((tk, tn), lambda i, j, kk: (kk, j)),
                pl.BlockSpec((tm, 1), lambda i, j, kk: (i, 0)),
            ],
            out_specs=pl.BlockSpec((tm, tn), lambda i, j, kk: (i, j)),
            scratch_shapes=[pltpu.VMEM((tm, tn), jnp.float32)],
        ),
        compiler_params=pltpu.CompilerParams(
            dimension_semantics=("parallel", "parallel", "arbitrary")),
    )(a_p, b_p, bias_p)

    if (Mp, Np) != (M, N):
        out = out[:M, :N]
    return out


def _inorm_kernel(x_ref, o_ref, *, eps, activation, inv_n):
    """Per-row InstanceNorm (affine=False) + fused activation.

    Rows correspond to (channel, batch) pairs; columns are the H*W pixels.
    One-pass statistics: var = E[x^2] - mean^2 (f32, clamped at 0).
    """
    x = x_ref[...].astype(jnp.float32)
    s1 = jnp.sum(x, axis=1, keepdims=True)
    s2 = jnp.sum(x * x, axis=1, keepdims=True)
    mean = s1 * inv_n
    var = jnp.maximum(s2 * inv_n - mean * mean, 0.0)
    y = (x - mean) * jax.lax.rsqrt(var + eps)
    if activation == "relu":
        y = jnp.maximum(y, 0.0)
    o_ref[...] = y.astype(o_ref.dtype)


def pallas_instance_norm(x_cbhw, activation="none", eps=1e-5):
    """x: (C, B, H, W) channel-major; per-(c,b) normalization over H*W."""
    C, B, H, W = x_cbhw.shape
    rows, cols = C * B, H * W
    tr = 256 if rows >= 256 else _round_up(rows, 8)
    rows_p = _round_up(rows, tr)

    x2 = x_cbhw.reshape(rows, cols)
    if rows_p != rows:
        x2 = jnp.pad(x2, ((0, rows_p - rows), (0, 0)))

    out = pl.pallas_call(
        functools.partial(_inorm_kernel, eps=eps, activation=activation,
                          inv_n=1.0 / cols),
        out_shape=jax.ShapeDtypeStruct((rows_p, cols), x_cbhw.dtype),
        grid_spec=pltpu.PrefetchScalarGridSpec(
            num_scalar_prefetch=0,
            grid=(rows_p // tr,),
            in_specs=[pl.BlockSpec((tr, cols), lambda i: (i, 0))],
            out_specs=pl.BlockSpec((tr, cols), lambda i: (i, 0)),
        ),
        compiler_params=pltpu.CompilerParams(
            dimension_semantics=("parallel",)),
    )(x2)

    if rows_p != rows:
        out = out[:rows]
    return out.reshape(C, B, H, W)


# ----------------------------------------------------------------------------
# Conv glue (channel-major patches; matmul output lands channel-major)
# ----------------------------------------------------------------------------
def conv2d_cm(x, w, b, stride, pad, pad_type="reflect", activation="none"):
    """x: (Cin, B, H, W); w: PyTorch layout (Cout, Cin, k, k); b: (Cout,)|None."""
    Cin, B, H, W = x.shape
    Cout, _, k, _ = w.shape

    if pad > 0:
        mode = "reflect" if pad_type == "reflect" else "constant"
        xp = jnp.pad(x, ((0, 0), (0, 0), (pad, pad), (pad, pad)), mode=mode)
    else:
        xp = x
    Ho = (H + 2 * pad - k) // stride + 1
    Wo = (W + 2 * pad - k) // stride + 1

    if k == 1 and stride == 1:
        patches = x.reshape(Cin, B * H * W)
    else:
        cols = [xp[:, :, i:i + stride * Ho:stride, j:j + stride * Wo:stride]
                for i in range(k) for j in range(k)]
        # (Cin, k*k, B, Ho, Wo) -> (Cin*k*k, B*Ho*Wo); row = ci*k*k + ki*k + kj
        patches = jnp.stack(cols, axis=1).reshape(Cin * k * k, B * Ho * Wo)

    wmat = w.reshape(Cout, Cin * k * k)
    bias = b if b is not None else jnp.zeros((Cout,), x.dtype)
    out = pallas_matmul(wmat, patches, bias, activation)       # (Cout, B*Ho*Wo)
    return out.reshape(Cout, B, Ho, Wo)


def conv_block(x, w, b, stride, pad, pad_type, norm, activ):
    """Conv2dBlock: conv -> norm -> activation (default ordering)."""
    if norm == "in":
        y = conv2d_cm(x, w, b, stride, pad, pad_type, activation="none")
        y = pallas_instance_norm(y, activation=activ)          # norm + act fused
    else:  # norm == 'none'
        y = conv2d_cm(x, w, b, stride, pad, pad_type, activation=activ)
    return y


# ----------------------------------------------------------------------------
# Parameters (deterministic synthetic init, PyTorch weight layouts)
# ----------------------------------------------------------------------------
def init_params(key, input_dim, dim, style_dim):
    def conv_p(k, cout, cin, ksz, bias=True):
        k1, k2 = jax.random.split(k)
        p = {"w": 0.05 * jax.random.normal(k1, (cout, cin, ksz, ksz),
                                           jnp.float32)}
        p["b"] = (0.05 * jax.random.normal(k2, (cout,), jnp.float32)
                  if bias else None)
        return p

    keys = iter(jax.random.split(key, 16))
    p = {}
    d = dim
    stage1 = [conv_p(next(keys), d, input_dim, 7)]
    for _ in range(3):
        stage1.append(conv_p(next(keys), 2 * d, d, 4))
        d *= 2
    p["stage1"] = stage1                                  # d == 8*dim here
    p["stage2_conv"] = conv_p(next(keys), 2 * d, d, 4)    # 8*dim -> 16*dim
    p["stage2_fc"] = conv_p(next(keys), style_dim, 2 * d, 1)      # 1x1, bias
    p["emb"] = conv_p(next(keys), style_dim, d, 1, bias=False)    # conv1x1
    return p


# ----------------------------------------------------------------------------
# Forward pass (== Image_Encoder.forward)
# ----------------------------------------------------------------------------
@functools.partial(jax.jit, static_argnames=("pad_type", "norm", "activ"))
def forward(params, images, *, pad_type="reflect", norm="in", activ="relu"):
    B = images.shape[0]
    x = jnp.transpose(images, (1, 0, 2, 3))        # NCHW -> channel-major CBHW

    # ----- model_stage1: 7x7/s1/p3 + three 4x4/s2/p1 Conv2dBlocks -----
    specs = [(7, 1, 3), (4, 2, 1), (4, 2, 1), (4, 2, 1)]
    for pconv, (k, s, pd) in zip(params["stage1"], specs):
        x = conv_block(x, pconv["w"], pconv["b"], s, pd, pad_type, norm, activ)
    feature = x                                    # (8*dim, B, H/8, W/8)

    # ----- model_stage2: Conv2dBlock 4x4/s2/p1 -> AdaptiveAvgPool2d(1) -> 1x1
    y = conv_block(feature, params["stage2_conv"]["w"],
                   params["stage2_conv"]["b"], 2, 1, pad_type, norm, activ)
    C2, _, H2, W2 = y.shape
    # TODO(synk): AdaptiveAvgPool2d(1) is a tiny per-row mean; done in plain JAX
    pooled = jnp.mean(y.reshape(C2, B, H2 * W2), axis=2)          # (C2, B)
    w_fc = params["stage2_fc"]["w"].reshape(-1, C2)               # (style, C2)
    ff = pallas_matmul(w_fc, pooled, params["stage2_fc"]["b"], "none")
    feature_final = ff.T                                          # (B, style)

    # ----- emb_features: conv1x1(8*dim -> style_dim), bias=False, no norm/act
    Cf, _, Hf, Wf = feature.shape
    w_emb = params["emb"]["w"].reshape(-1, Cf)                    # (style, Cf)
    zero_bias = jnp.zeros((w_emb.shape[0],), feature.dtype)
    gf = pallas_matmul(w_emb, feature.reshape(Cf, B * Hf * Wf), zero_bias,
                       "none")                                    # (style, B*Hf*Wf)
    global_feature = gf.reshape(-1, B, Hf, Wf).transpose(1, 0, 2, 3)

    return global_feature, feature_final


# ----------------------------------------------------------------------------
if __name__ == "__main__":
    key = jax.random.PRNGKey(0)
    k_param, k_img = jax.random.split(key)

    input_dim, dim, style_dim = 3, 8, 8
    H = W = 32
    B = 2

    params = init_params(k_param, input_dim, dim, style_dim)
    images = jax.random.normal(k_img, (B, input_dim, H, W), jnp.float32)

    global_feature, feature_final = forward(params, images)
    global_feature = jax.block_until_ready(global_feature)
    feature_final = jax.block_until_ready(feature_final)

    assert global_feature.shape == (B, style_dim, H // 8, W // 8), \
        global_feature.shape
    assert feature_final.shape == (B, style_dim), feature_final.shape
    assert bool(jnp.all(jnp.isfinite(global_feature)))
    assert bool(jnp.all(jnp.isfinite(feature_final)))
    print("KERNEL_OK")
</pallas_src>

<mosaic_0001>
module attributes {stable_mosaic.version = 11 : i64} {
  func.func @_matmul_bias_act_kernel(%arg0: i32, %arg1: i32, %arg2: i32, %arg3: memref<8x256xf32, #tpu.memory_space<vmem>>, %arg4: memref<256x512xf32, #tpu.memory_space<vmem>>, %arg5: memref<8x1xf32, #tpu.memory_space<vmem>>, %arg6: memref<8x512xf32, #tpu.memory_space<vmem>>, %arg7: memref<8x512xf32, #tpu.memory_space<vmem>>) attributes {dimension_semantics = [#tpu.dimension_semantics<parallel>, #tpu.dimension_semantics<parallel>, #tpu.dimension_semantics<arbitrary>], iteration_bounds = array<i64: 1, 4, 1>, scalar_prefetch = 0 : i64, scratch_operands = 1 : i64, tpu.core_type = #tpu.core_type<tc>, window_params = [{transform_indices = @transform_0, window_bounds = array<i64: 8, 256>}, {transform_indices = @transform_1, window_bounds = array<i64: 256, 512>}, {transform_indices = @transform_2, window_bounds = array<i64: 8, 1>}, {transform_indices = @transform_3, window_bounds = array<i64: 8, 512>}]} {
    %c0_i32 = arith.constant 0 : i32
    %0 = arith.cmpi eq, %arg2, %c0_i32 : i32
    %1 = arith.extui %0 : i1 to i32
    %c0_i32_0 = arith.constant 0 : i32
    %2 = arith.cmpi ne, %1, %c0_i32_0 : i32
    scf.if %2 {
      %cst_10 = arith.constant 0.000000e+00 : f32
      %12 = vector.broadcast %cst_10 : f32 to vector<8x512xf32>
      %c0_11 = arith.constant 0 : index
      %c0_12 = arith.constant 0 : index
      %13 = vector.load %arg7[%c0_11, %c0_12] : memref<8x512xf32, #tpu.memory_space<vmem>>, vector<8x512xf32>
      tpu.vector_store %arg7[%c0_11, %c0_12], %12 {strides = array<i32>} : memref<8x512xf32, #tpu.memory_space<vmem>>, vector<8x512xf32>,
    } else {
    }
    %c0 = arith.constant 0 : index
    %c0_1 = arith.constant 0 : index
    %3 = vector.load %arg7[%c0, %c0_1] : memref<8x512xf32, #tpu.memory_space<vmem>>, vector<8x512xf32>
    %c0_2 = arith.constant 0 : index
    %c0_3 = arith.constant 0 : index
    %4 = vector.load %arg3[%c0_2, %c0_3] : memref<8x256xf32, #tpu.memory_space<vmem>>, vector<8x256xf32>
    %c0_4 = arith.constant 0 : index
    %c0_5 = arith.constant 0 : index
    %5 = vector.load %arg4[%c0_4, %c0_5] : memref<256x512xf32, #tpu.memory_space<vmem>>, vector<256x512xf32>
    %cst = arith.constant dense<0.000000e+00> : vector<8x512xf32>
    %6 = tpu.matmul %4, %5, %cst {dimension_numbers = #tpu.dot_dimension_numbers<[1], [0], [0], [1], [0, 0, 1, 1], [], []>} : vector<8x256xf32>, vector<256x512xf32>, vector<8x512xf32> -> vector<8x512xf32>
    %7 = arith.addf %3, %6 : vector<8x512xf32>
    %c0_6 = arith.constant 0 : index
    %c0_7 = arith.constant 0 : index
    %8 = vector.load %arg7[%c0_6, %c0_7] : memref<8x512xf32, #tpu.memory_space<vmem>>, vector<8x512xf32>
    tpu.vector_store %arg7[%c0_6, %c0_7], %7 {strides = array<i32>} : memref<8x512xf32, #tpu.memory_space<vmem>>, vector<8x512xf32>,
    %c0_i32_8 = arith.constant 0 : i32
    %9 = arith.cmpi eq, %arg2, %c0_i32_8 : i32
    %10 = arith.extui %9 : i1 to i32
    %c0_i32_9 = arith.constant 0 : i32
    %11 = arith.cmpi ne, %10, %c0_i32_9 : i32
    scf.if %11 {
      %c0_10 = arith.constant 0 : index
      %c0_11 = arith.constant 0 : index
      %12 = vector.load %arg7[%c0_10, %c0_11] : memref<8x512xf32, #tpu.memory_space<vmem>>, vector<8x512xf32>
      %c0_12 = arith.constant 0 : index
      %c0_13 = arith.constant 0 : index
      %13 = vector.load %arg5[%c0_12, %c0_13] : memref<8x1xf32, #tpu.memory_space<vmem>>, vector<8x1xf32>
      %14 = vector.broadcast %13 : vector<8x1xf32> to vector<8x512xf32>
      %15 = arith.addf %12, %14 : vector<8x512xf32>
      %c0_14 = arith.constant 0 : index
      %c0_15 = arith.constant 0 : index
      %16 = vector.load %arg6[%c0_14, %c0_15] : memref<8x512xf32, #tpu.memory_space<vmem>>, vector<8x512xf32>
      tpu.vector_store %arg6[%c0_14, %c0_15], %15 {strides = array<i32>} : memref<8x512xf32, #tpu.memory_space<vmem>>, vector<8x512xf32>,
    } else {
    }
    return
  }
  func.func @transform_0(%arg0: i32, %arg1: i32, %arg2: i32) -> (i32, i32) {
    %c0_i32 = arith.constant 0 : i32
    return %arg0, %arg2 : i32, i32
  }
  func.func @transform_1(%arg0: i32, %arg1: i32, %arg2: i32) -> (i32, i32) {
    %c0_i32 = arith.constant 0 : i32
    return %arg2, %arg1 : i32, i32
  }
  func.func @transform_2(%arg0: i32, %arg1: i32, %arg2: i32) -> (i32, i32) {
    %c0_i32 = arith.constant 0 : i32
    %c0_i32_0 = arith.constant 0 : i32
    return %arg0, %c0_i32 : i32, i32
  }
  func.func @transform_3(%arg0: i32, %arg1: i32, %arg2: i32) -> (i32, i32) {
    %c0_i32 = arith.constant 0 : i32
    return %arg0, %arg1 : i32, i32
  }
}

module attributes {stable_mosaic.version = 11 : i64} {
  func.func @_inorm_kernel(%arg0: i32, %arg1: memref<16x1024xf32, #tpu.memory_space<vmem>>, %arg2: memref<16x1024xf32, #tpu.memory_space<vmem>>) attributes {dimension_semantics = [#tpu.dimension_semantics<parallel>], iteration_bounds = array<i64: 1>, scalar_prefetch = 0 : i64, scratch_operands = 0 : i64, tpu.core_type = #tpu.core_type<tc>, window_params = [{transform_indices = @transform_0, window_bounds = array<i64: 16, 1024>}, {transform_indices = @transform_1, window_bounds = array<i64: 16, 1024>}]} {
    %c0 = arith.constant 0 : index
    %c0_0 = arith.constant 0 : index
    %0 = vector.load %arg1[%c0, %c0_0] : memref<16x1024xf32, #tpu.memory_space<vmem>>, vector<16x1024xf32>
    %cst = arith.constant dense<0.000000e+00> : vector<16xf32>
    %1 = vector.multi_reduction <add>, %0, %cst [1] : vector<16x1024xf32> to vector<16xf32>
    %2 = vector.shape_cast %1 : vector<16xf32> to vector<16x1xf32>
    %3 = arith.mulf %0, %0 : vector<16x1024xf32>
    %cst_1 = arith.constant dense<0.000000e+00> : vector<16xf32>
    %4 = vector.multi_reduction <add>, %3, %cst_1 [1] : vector<16x1024xf32> to vector<16xf32>
    %5 = vector.shape_cast %4 : vector<16xf32> to vector<16x1xf32>
    %cst_2 = arith.constant 9.765625E-4 : f32
    %6 = vector.broadcast %cst_2 : f32 to vector<16x1xf32>
    %7 = arith.mulf %2, %6 : vector<16x1xf32>
    %cst_3 = arith.constant 9.765625E-4 : f32
    %8 = vector.broadcast %cst_3 : f32 to vector<16x1xf32>
    %9 = arith.mulf %5, %8 : vector<16x1xf32>
    %10 = arith.mulf %7, %7 : vector<16x1xf32>
    %11 = arith.subf %9, %10 : vector<16x1xf32>
    %cst_4 = arith.constant 0.000000e+00 : f32
    %12 = vector.broadcast %cst_4 : f32 to vector<16x1xf32>
    %13 = arith.maximumf %11, %12 : vector<16x1xf32>
    %14 = vector.broadcast %7 : vector<16x1xf32> to vector<16x1024xf32>
    %15 = arith.subf %0, %14 : vector<16x1024xf32>
    %cst_5 = arith.constant 9.99999974E-6 : f32
    %16 = vector.broadcast %cst_5 : f32 to vector<16x1xf32>
    %17 = arith.addf %13, %16 : vector<16x1xf32>
    %18 = math.rsqrt %17 : vector<16x1xf32>
    %19 = vector.broadcast %18 : vector<16x1xf32> to vector<16x1024xf32>
    %20 = arith.mulf %15, %19 : vector<16x1024xf32>
    %cst_6 = arith.constant 0.000000e+00 : f32
    %21 = vector.broadcast %cst_6 : f32 to vector<16x1024xf32>
    %22 = arith.maximumf %20, %21 : vector<16x1024xf32>
    %c0_7 = arith.constant 0 : index
    %c0_8 = arith.constant 0 : index
    %23 = vector.load %arg2[%c0_7, %c0_8] : memref<16x1024xf32, #tpu.memory_space<vmem>>, vector<16x1024xf32>
    tpu.vector_store %arg2[%c0_7, %c0_8], %22 {strides = array<i32>} : memref<16x1024xf32, #tpu.memory_space<vmem>>, vector<16x1024xf32>,
    return
  }
  func.func @transform_0(%arg0: i32) -> (i32, i32) {
    %c0_i32 = arith.constant 0 : i32
    %c0_i32_0 = arith.constant 0 : i32
    return %arg0, %c0_i32 : i32, i32
  }
  func.func @transform_1(%arg0: i32) -> (i32, i32) {
    %c0_i32 = arith.constant 0 : i32
    %c0_i32_0 = arith.constant 0 : i32
    return %arg0, %c0_i32 : i32, i32
  }
}

module attributes {stable_mosaic.version = 11 : i64} {
  func.func @_matmul_bias_act_kernel(%arg0: i32, %arg1: i32, %arg2: i32, %arg3: memref<16x128xf32, #tpu.memory_space<vmem>>, %arg4: memref<128x512xf32, #tpu.memory_space<vmem>>, %arg5: memref<16x1xf32, #tpu.memory_space<vmem>>, %arg6: memref<16x512xf32, #tpu.memory_space<vmem>>, %arg7: memref<16x512xf32, #tpu.memory_space<vmem>>) attributes {dimension_semantics = [#tpu.dimension_semantics<parallel>, #tpu.dimension_semantics<parallel>, #tpu.dimension_semantics<arbitrary>], iteration_bounds = array<i64: 1, 1, 1>, scalar_prefetch = 0 : i64, scratch_operands = 1 : i64, tpu.core_type = #tpu.core_type<tc>, window_params = [{transform_indices = @transform_0, window_bounds = array<i64: 16, 128>}, {transform_indices = @transform_1, window_bounds = array<i64: 128, 512>}, {transform_indices = @transform_2, window_bounds = array<i64: 16, 1>}, {transform_indices = @transform_3, window_bounds = array<i64: 16, 512>}]} {
    %c0_i32 = arith.constant 0 : i32
    %0 = arith.cmpi eq, %arg2, %c0_i32 : i32
    %1 = arith.extui %0 : i1 to i32
    %c0_i32_0 = arith.constant 0 : i32
    %2 = arith.cmpi ne, %1, %c0_i32_0 : i32
    scf.if %2 {
      %cst_10 = arith.constant 0.000000e+00 : f32
      %12 = vector.broadcast %cst_10 : f32 to vector<16x512xf32>
      %c0_11 = arith.constant 0 : index
      %c0_12 = arith.constant 0 : index
      %13 = vector.load %arg7[%c0_11, %c0_12] : memref<16x512xf32, #tpu.memory_space<vmem>>, vector<16x512xf32>
      tpu.vector_store %arg7[%c0_11, %c0_12], %12 {strides = array<i32>} : memref<16x512xf32, #tpu.memory_space<vmem>>, vector<16x512xf32>,
    } else {
    }
    %c0 = arith.constant 0 : index
    %c0_1 = arith.constant 0 : index
    %3 = vector.load %arg7[%c0, %c0_1] : memref<16x512xf32, #tpu.memory_space<vmem>>, vector<16x512xf32>
    %c0_2 = arith.constant 0 : index
    %c0_3 = arith.constant 0 : index
    %4 = vector.load %arg3[%c0_2, %c0_3] : memref<16x128xf32, #tpu.memory_space<vmem>>, vector<16x128xf32>
    %c0_4 = arith.constant 0 : index
    %c0_5 = arith.constant 0 : index
    %5 = vector.load %arg4[%c0_4, %c0_5] : memref<128x512xf32, #tpu.memory_space<vmem>>, vector<128x512xf32>
    %cst = arith.constant dense<0.000000e+00> : vector<16x512xf32>
    %6 = tpu.matmul %4, %5, %cst {dimension_numbers = #tpu.dot_dimension_numbers<[1], [0], [0], [1], [0, 0, 1, 1], [], []>} : vector<16x128xf32>, vector<128x512xf32>, vector<16x512xf32> -> vector<16x512xf32>
    %7 = arith.addf %3, %6 : vector<16x512xf32>
    %c0_6 = arith.constant 0 : index
    %c0_7 = arith.constant 0 : index
    %8 = vector.load %arg7[%c0_6, %c0_7] : memref<16x512xf32, #tpu.memory_space<vmem>>, vector<16x512xf32>
    tpu.vector_store %arg7[%c0_6, %c0_7], %7 {strides = array<i32>} : memref<16x512xf32, #tpu.memory_space<vmem>>, vector<16x512xf32>,
    %c0_i32_8 = arith.constant 0 : i32
    %9 = arith.cmpi eq, %arg2, %c0_i32_8 : i32
    %10 = arith.extui %9 : i1 to i32
    %c0_i32_9 = arith.constant 0 : i32
    %11 = arith.cmpi ne, %10, %c0_i32_9 : i32
    scf.if %11 {
      %c0_10 = arith.constant 0 : index
      %c0_11 = arith.constant 0 : index
      %12 = vector.load %arg7[%c0_10, %c0_11] : memref<16x512xf32, #tpu.memory_space<vmem>>, vector<16x512xf32>
      %c0_12 = arith.constant 0 : index
      %c0_13 = arith.constant 0 : index
      %13 = vector.load %arg5[%c0_12, %c0_13] : memref<16x1xf32, #tpu.memory_space<vmem>>, vector<16x1xf32>
      %14 = vector.broadcast %13 : vector<16x1xf32> to vector<16x512xf32>
      %15 = arith.addf %12, %14 : vector<16x512xf32>
      %c0_14 = arith.constant 0 : index
      %c0_15 = arith.constant 0 : index
      %16 = vector.load %arg6[%c0_14, %c0_15] : memref<16x512xf32, #tpu.memory_space<vmem>>, vector<16x512xf32>
      tpu.vector_store %arg6[%c0_14, %c0_15], %15 {strides = array<i32>} : memref<16x512xf32, #tpu.memory_space<vmem>>, vector<16x512xf32>,
    } else {
    }
    return
  }
  func.func @transform_0(%arg0: i32, %arg1: i32, %arg2: i32) -> (i32, i32) {
    %c0_i32 = arith.constant 0 : i32
    return %arg0, %arg2 : i32, i32
  }
  func.func @transform_1(%arg0: i32, %arg1: i32, %arg2: i32) -> (i32, i32) {
    %c0_i32 = arith.constant 0 : i32
    return %arg2, %arg1 : i32, i32
  }
  func.func @transform_2(%arg0: i32, %arg1: i32, %arg2: i32) -> (i32, i32) {
    %c0_i32 = arith.constant 0 : i32
    %c0_i32_0 = arith.constant 0 : i32
    return %arg0, %c0_i32 : i32, i32
  }
  func.func @transform_3(%arg0: i32, %arg1: i32, %arg2: i32) -> (i32, i32) {
    %c0_i32 = arith.constant 0 : i32
    return %arg0, %arg1 : i32, i32
  }
}

module attributes {stable_mosaic.version = 11 : i64} {
  func.func @_inorm_kernel(%arg0: i32, %arg1: memref<32x256xf32, #tpu.memory_space<vmem>>, %arg2: memref<32x256xf32, #tpu.memory_space<vmem>>) attributes {dimension_semantics = [#tpu.dimension_semantics<parallel>], iteration_bounds = array<i64: 1>, scalar_prefetch = 0 : i64, scratch_operands = 0 : i64, tpu.core_type = #tpu.core_type<tc>, window_params = [{transform_indices = @transform_0, window_bounds = array<i64: 32, 256>}, {transform_indices = @transform_1, window_bounds = array<i64: 32, 256>}]} {
    %c0 = arith.constant 0 : index
    %c0_0 = arith.constant 0 : index
    %0 = vector.load %arg1[%c0, %c0_0] : memref<32x256xf32, #tpu.memory_space<vmem>>, vector<32x256xf32>
    %cst = arith.constant dense<0.000000e+00> : vector<32xf32>
    %1 = vector.multi_reduction <add>, %0, %cst [1] : vector<32x256xf32> to vector<32xf32>
    %2 = vector.shape_cast %1 : vector<32xf32> to vector<32x1xf32>
    %3 = arith.mulf %0, %0 : vector<32x256xf32>
    %cst_1 = arith.constant dense<0.000000e+00> : vector<32xf32>
    %4 = vector.multi_reduction <add>, %3, %cst_1 [1] : vector<32x256xf32> to vector<32xf32>
    %5 = vector.shape_cast %4 : vector<32xf32> to vector<32x1xf32>
    %cst_2 = arith.constant 3.906250e-03 : f32
    %6 = vector.broadcast %cst_2 : f32 to vector<32x1xf32>
    %7 = arith.mulf %2, %6 : vector<32x1xf32>
    %cst_3 = arith.constant 3.906250e-03 : f32
    %8 = vector.broadcast %cst_3 : f32 to vector<32x1xf32>
    %9 = arith.mulf %5, %8 : vector<32x1xf32>
    %10 = arith.mulf %7, %7 : vector<32x1xf32>
    %11 = arith.subf %9, %10 : vector<32x1xf32>
    %cst_4 = arith.constant 0.000000e+00 : f32
    %12 = vector.broadcast %cst_4 : f32 to vector<32x1xf32>
    %13 = arith.maximumf %11, %12 : vector<32x1xf32>
    %14 = vector.broadcast %7 : vector<32x1xf32> to vector<32x256xf32>
    %15 = arith.subf %0, %14 : vector<32x256xf32>
    %cst_5 = arith.constant 9.99999974E-6 : f32
    %16 = vector.broadcast %cst_5 : f32 to vector<32x1xf32>
    %17 = arith.addf %13, %16 : vector<32x1xf32>
    %18 = math.rsqrt %17 : vector<32x1xf32>
    %19 = vector.broadcast %18 : vector<32x1xf32> to vector<32x256xf32>
    %20 = arith.mulf %15, %19 : vector<32x256xf32>
    %cst_6 = arith.constant 0.000000e+00 : f32
    %21 = vector.broadcast %cst_6 : f32 to vector<32x256xf32>
    %22 = arith.maximumf %20, %21 : vector<32x256xf32>
    %c0_7 = arith.constant 0 : index
    %c0_8 = arith.constant 0 : index
    %23 = vector.load %arg2[%c0_7, %c0_8] : memref<32x256xf32, #tpu.memory_space<vmem>>, vector<32x256xf32>
    tpu.vector_store %arg2[%c0_7, %c0_8], %22 {strides = array<i32>} : memref<32x256xf32, #tpu.memory_space<vmem>>, vector<32x256xf32>,
    return
  }
  func.func @transform_0(%arg0: i32) -> (i32, i32) {
    %c0_i32 = arith.constant 0 : i32
    %c0_i32_0 = arith.constant 0 : i32
    return %arg0, %c0_i32 : i32, i32
  }
  func.func @transform_1(%arg0: i32) -> (i32, i32) {
    %c0_i32 = arith.constant 0 : i32
    %c0_i32_0 = arith.constant 0 : i32
    return %arg0, %c0_i32 : i32, i32
  }
}

module attributes {stable_mosaic.version = 11 : i64} {
  func.func @_matmul_bias_act_kernel(%arg0: i32, %arg1: i32, %arg2: i32, %arg3: memref<32x256xf32, #tpu.memory_space<vmem>>, %arg4: memref<256x128xf32, #tpu.memory_space<vmem>>, %arg5: memref<32x1xf32, #tpu.memory_space<vmem>>, %arg6: memref<32x128xf32, #tpu.memory_space<vmem>>, %arg7: memref<32x128xf32, #tpu.memory_space<vmem>>) attributes {dimension_semantics = [#tpu.dimension_semantics<parallel>, #tpu.dimension_semantics<parallel>, #tpu.dimension_semantics<arbitrary>], iteration_bounds = array<i64: 1, 1, 1>, scalar_prefetch = 0 : i64, scratch_operands = 1 : i64, tpu.core_type = #tpu.core_type<tc>, window_params = [{transform_indices = @transform_0, window_bounds = array<i64: 32, 256>}, {transform_indices = @transform_1, window_bounds = array<i64: 256, 128>}, {transform_indices = @transform_2, window_bounds = array<i64: 32, 1>}, {transform_indices = @transform_3, window_bounds = array<i64: 32, 128>}]} {
    %c0_i32 = arith.constant 0 : i32
    %0 = arith.cmpi eq, %arg2, %c0_i32 : i32
    %1 = arith.extui %0 : i1 to i32
    %c0_i32_0 = arith.constant 0 : i32
    %2 = arith.cmpi ne, %1, %c0_i32_0 : i32
    scf.if %2 {
      %cst_10 = arith.constant 0.000000e+00 : f32
      %12 = vector.broadcast %cst_10 : f32 to vector<32x128xf32>
      %c0_11 = arith.constant 0 : index
      %c0_12 = arith.constant 0 : index
      %13 = vector.load %arg7[%c0_11, %c0_12] : memref<32x128xf32, #tpu.memory_space<vmem>>, vector<32x128xf32>
      tpu.vector_store %arg7[%c0_11, %c0_12], %12 {strides = array<i32>} : memref<32x128xf32, #tpu.memory_space<vmem>>, vector<32x128xf32>,
    } else {
    }
    %c0 = arith.constant 0 : index
    %c0_1 = arith.constant 0 : index
    %3 = vector.load %arg7[%c0, %c0_1] : memref<32x128xf32, #tpu.memory_space<vmem>>, vector<32x128xf32>
    %c0_2 = arith.constant 0 : index
    %c0_3 = arith.constant 0 : index
    %4 = vector.load %arg3[%c0_2, %c0_3] : memref<32x256xf32, #tpu.memory_space<vmem>>, vector<32x256xf32>
    %c0_4 = arith.constant 0 : index
    %c0_5 = arith.constant 0 : index
    %5 = vector.load %arg4[%c0_4, %c0_5] : memref<256x128xf32, #tpu.memory_space<vmem>>, vector<256x128xf32>
    %cst = arith.constant dense<0.000000e+00> : vector<32x128xf32>
    %6 = tpu.matmul %4, %5, %cst {dimension_numbers = #tpu.dot_dimension_numbers<[1], [0], [0], [1], [0, 0, 1, 1], [], []>} : vector<32x256xf32>, vector<256x128xf32>, vector<32x128xf32> -> vector<32x128xf32>
    %7 = arith.addf %3, %6 : vector<32x128xf32>
    %c0_6 = arith.constant 0 : index
    %c0_7 = arith.constant 0 : index
    %8 = vector.load %arg7[%c0_6, %c0_7] : memref<32x128xf32, #tpu.memory_space<vmem>>, vector<32x128xf32>
    tpu.vector_store %arg7[%c0_6, %c0_7], %7 {strides = array<i32>} : memref<32x128xf32, #tpu.memory_space<vmem>>, vector<32x128xf32>,
    %c0_i32_8 = arith.constant 0 : i32
    %9 = arith.cmpi eq, %arg2, %c0_i32_8 : i32
    %10 = arith.extui %9 : i1 to i32
    %c0_i32_9 = arith.constant 0 : i32
    %11 = arith.cmpi ne, %10, %c0_i32_9 : i32
    scf.if %11 {
      %c0_10 = arith.constant 0 : index
      %c0_11 = arith.constant 0 : index
      %12 = vector.load %arg7[%c0_10, %c0_11] : memref<32x128xf32, #tpu.memory_space<vmem>>, vector<32x128xf32>
      %c0_12 = arith.constant 0 : index
      %c0_13 = arith.constant 0 : index
      %13 = vector.load %arg5[%c0_12, %c0_13] : memref<32x1xf32, #tpu.memory_space<vmem>>, vector<32x1xf32>
      %14 = vector.broadcast %13 : vector<32x1xf32> to vector<32x128xf32>
      %15 = arith.addf %12, %14 : vector<32x128xf32>
      %c0_14 = arith.constant 0 : index
      %c0_15 = arith.constant 0 : index
      %16 = vector.load %arg6[%c0_14, %c0_15] : memref<32x128xf32, #tpu.memory_space<vmem>>, vector<32x128xf32>
      tpu.vector_store %arg6[%c0_14, %c0_15], %15 {strides = array<i32>} : memref<32x128xf32, #tpu.memory_space<vmem>>, vector<32x128xf32>,
    } else {
    }
    return
  }
  func.func @transform_0(%arg0: i32, %arg1: i32, %arg2: i32) -> (i32, i32) {
    %c0_i32 = arith.constant 0 : i32
    return %arg0, %arg2 : i32, i32
  }
  func.func @transform_1(%arg0: i32, %arg1: i32, %arg2: i32) -> (i32, i32) {
    %c0_i32 = arith.constant 0 : i32
    return %arg2, %arg1 : i32, i32
  }
  func.func @transform_2(%arg0: i32, %arg1: i32, %arg2: i32) -> (i32, i32) {
    %c0_i32 = arith.constant 0 : i32
    %c0_i32_0 = arith.constant 0 : i32
    return %arg0, %c0_i32 : i32, i32
  }
  func.func @transform_3(%arg0: i32, %arg1: i32, %arg2: i32) -> (i32, i32) {
    %c0_i32 = arith.constant 0 : i32
    return %arg0, %arg1 : i32, i32
  }
}

module attributes {stable_mosaic.version = 11 : i64} {
  func.func @_inorm_kernel(%arg0: i32, %arg1: memref<64x64xf32, #tpu.memory_space<vmem>>, %arg2: memref<64x64xf32, #tpu.memory_space<vmem>>) attributes {dimension_semantics = [#tpu.dimension_semantics<parallel>], iteration_bounds = array<i64: 1>, scalar_prefetch = 0 : i64, scratch_operands = 0 : i64, tpu.core_type = #tpu.core_type<tc>, window_params = [{transform_indices = @transform_0, window_bounds = array<i64: 64, 64>}, {transform_indices = @transform_1, window_bounds = array<i64: 64, 64>}]} {
    %c0 = arith.constant 0 : index
    %c0_0 = arith.constant 0 : index
    %0 = vector.load %arg1[%c0, %c0_0] : memref<64x64xf32, #tpu.memory_space<vmem>>, vector<64x64xf32>
    %cst = arith.constant dense<0.000000e+00> : vector<64xf32>
    %1 = vector.multi_reduction <add>, %0, %cst [1] : vector<64x64xf32> to vector<64xf32>
    %2 = vector.shape_cast %1 : vector<64xf32> to vector<64x1xf32>
    %3 = arith.mulf %0, %0 : vector<64x64xf32>
    %cst_1 = arith.constant dense<0.000000e+00> : vector<64xf32>
    %4 = vector.multi_reduction <add>, %3, %cst_1 [1] : vector<64x64xf32> to vector<64xf32>
    %5 = vector.shape_cast %4 : vector<64xf32> to vector<64x1xf32>
    %cst_2 = arith.constant 1.562500e-02 : f32
    %6 = vector.broadcast %cst_2 : f32 to vector<64x1xf32>
    %7 = arith.mulf %2, %6 : vector<64x1xf32>
    %cst_3 = arith.constant 1.562500e-02 : f32
    %8 = vector.broadcast %cst_3 : f32 to vector<64x1xf32>
    %9 = arith.mulf %5, %8 : vector<64x1xf32>
    %10 = arith.mulf %7, %7 : vector<64x1xf32>
    %11 = arith.subf %9, %10 : vector<64x1xf32>
    %cst_4 = arith.constant 0.000000e+00 : f32
    %12 = vector.broadcast %cst_4 : f32 to vector<64x1xf32>
    %13 = arith.maximumf %11, %12 : vector<64x1xf32>
    %14 = vector.broadcast %7 : vector<64x1xf32> to vector<64x64xf32>
    %15 = arith.subf %0, %14 : vector<64x64xf32>
    %cst_5 = arith.constant 9.99999974E-6 : f32
    %16 = vector.broadcast %cst_5 : f32 to vector<64x1xf32>
    %17 = arith.addf %13, %16 : vector<64x1xf32>
    %18 = math.rsqrt %17 : vector<64x1xf32>
    %19 = vector.broadcast %18 : vector<64x1xf32> to vector<64x64xf32>
    %20 = arith.mulf %15, %19 : vector<64x64xf32>
    %cst_6 = arith.constant 0.000000e+00 : f32
    %21 = vector.broadcast %cst_6 : f32 to vector<64x64xf32>
    %22 = arith.maximumf %20, %21 : vector<64x64xf32>
    %c0_7 = arith.constant 0 : index
    %c0_8 = arith.constant 0 : index
    %23 = vector.load %arg2[%c0_7, %c0_8] : memref<64x64xf32, #tpu.memory_space<vmem>>, vector<64x64xf32>
    tpu.vector_store %arg2[%c0_7, %c0_8], %22 {strides = array<i32>} : memref<64x64xf32, #tpu.memory_space<vmem>>, vector<64x64xf32>,
    return
  }
  func.func @transform_0(%arg0: i32) -> (i32, i32) {
    %c0_i32 = arith.constant 0 : i32
    %c0_i32_0 = arith.constant 0 : i32
    return %arg0, %c0_i32 : i32, i32
  }
  func.func @transform_1(%arg0: i32) -> (i32, i32) {
    %c0_i32 = arith.constant 0 : i32
    %c0_i32_0 = arith.constant 0 : i32
    return %arg0, %c0_i32 : i32, i32
  }
}

module attributes {stable_mosaic.version = 11 : i64} {
  func.func @_matmul_bias_act_kernel(%arg0: i32, %arg1: i32, %arg2: i32, %arg3: memref<64x256xf32, #tpu.memory_space<vmem>>, %arg4: memref<256x128xf32, #tpu.memory_space<vmem>>, %arg5: memref<64x1xf32, #tpu.memory_space<vmem>>, %arg6: memref<64x128xf32, #tpu.memory_space<vmem>>, %arg7: memref<64x128xf32, #tpu.memory_space<vmem>>) attributes {dimension_semantics = [#tpu.dimension_semantics<parallel>, #tpu.dimension_semantics<parallel>, #tpu.dimension_semantics<arbitrary>], iteration_bounds = array<i64: 1, 1, 2>, scalar_prefetch = 0 : i64, scratch_operands = 1 : i64, tpu.core_type = #tpu.core_type<tc>, window_params = [{transform_indices = @transform_0, window_bounds = array<i64: 64, 256>}, {transform_indices = @transform_1, window_bounds = array<i64: 256, 128>}, {transform_indices = @transform_2, window_bounds = array<i64: 64, 1>}, {transform_indices = @transform_3, window_bounds = array<i64: 64, 128>}]} {
    %c0_i32 = arith.constant 0 : i32
    %0 = arith.cmpi eq, %arg2, %c0_i32 : i32
    %1 = arith.extui %0 : i1 to i32
    %c0_i32_0 = arith.constant 0 : i32
    %2 = arith.cmpi ne, %1, %c0_i32_0 : i32
    scf.if %2 {
      %cst_9 = arith.constant 0.000000e+00 : f32
      %12 = vector.broadcast %cst_9 : f32 to vector<64x128xf32>
      %c0_10 = arith.constant 0 : index
      %c0_11 = arith.constant 0 : index
      %13 = vector.load %arg7[%c0_10, %c0_11] : memref<64x128xf32, #tpu.memory_space<vmem>>, vector<64x128xf32>
      tpu.vector_store %arg7[%c0_10, %c0_11], %12 {strides = array<i32>} : memref<64x128xf32, #tpu.memory_space<vmem>>, vector<64x128xf32>,
    } else {
    }
    %c0 = arith.constant 0 : index
    %c0_1 = arith.constant 0 : index
    %3 = vector.load %arg7[%c0, %c0_1] : memref<64x128xf32, #tpu.memory_space<vmem>>, vector<64x128xf32>
    %c0_2 = arith.constant 0 : index
    %c0_3 = arith.constant 0 : index
    %4 = vector.load %arg3[%c0_2, %c0_3] : memref<64x256xf32, #tpu.memory_space<vmem>>, vector<64x256xf32>
    %c0_4 = arith.constant 0 : index
    %c0_5 = arith.constant 0 : index
    %5 = vector.load %arg4[%c0_4, %c0_5] : memref<256x128xf32, #tpu.memory_space<vmem>>, vector<256x128xf32>
    %cst = arith.constant dense<0.000000e+00> : vector<64x128xf32>
    %6 = tpu.matmul %4, %5, %cst {dimension_numbers = #tpu.dot_dimension_numbers<[1], [0], [0], [1], [0, 0, 1, 1], [], []>} : vector<64x256xf32>, vector<256x128xf32>, vector<64x128xf32> -> vector<64x128xf32>
    %7 = arith.addf %3, %6 : vector<64x128xf32>
    %c0_6 = arith.constant 0 : index
    %c0_7 = arith.constant 0 : index
    %8 = vector.load %arg7[%c0_6, %c0_7] : memref<64x128xf32, #tpu.memory_space<vmem>>, vector<64x128xf32>
    tpu.vector_store %arg7[%c0_6, %c0_7], %7 {strides = array<i32>} : memref<64x128xf32, #tpu.memory_space<vmem>>, vector<64x128xf32>,
    %c1_i32 = arith.constant 1 : i32
    %9 = arith.cmpi eq, %arg2, %c1_i32 : i32
    %10 = arith.extui %9 : i1 to i32
    %c0_i32_8 = arith.constant 0 : i32
    %11 = arith.cmpi ne, %10, %c0_i32_8 : i32
    scf.if %11 {
      %c0_9 = arith.constant 0 : index
      %c0_10 = arith.constant 0 : index
      %12 = vector.load %arg7[%c0_9, %c0_10] : memref<64x128xf32, #tpu.memory_space<vmem>>, vector<64x128xf32>
      %c0_11 = arith.constant 0 : index
      %c0_12 = arith.constant 0 : index
      %13 = vector.load %arg5[%c0_11, %c0_12] : memref<64x1xf32, #tpu.memory_space<vmem>>, vector<64x1xf32>
      %14 = vector.broadcast %13 : vector<64x1xf32> to vector<64x128xf32>
      %15 = arith.addf %12, %14 : vector<64x128xf32>
      %c0_13 = arith.constant 0 : index
      %c0_14 = arith.constant 0 : index
      %16 = vector.load %arg6[%c0_13, %c0_14] : memref<64x128xf32, #tpu.memory_space<vmem>>, vector<64x128xf32>
      tpu.vector_store %arg6[%c0_13, %c0_14], %15 {strides = array<i32>} : memref<64x128xf32, #tpu.memory_space<vmem>>, vector<64x128xf32>,
    } else {
    }
    return
  }
  func.func @transform_0(%arg0: i32, %arg1: i32, %arg2: i32) -> (i32, i32) {
    %c0_i32 = arith.constant 0 : i32
    return %arg0, %arg2 : i32, i32
  }
  func.func @transform_1(%arg0: i32, %arg1: i32, %arg2: i32) -> (i32, i32) {
    %c0_i32 = arith.constant 0 : i32
    return %arg2, %arg1 : i32, i32
  }
  func.func @transform_2(%arg0: i32, %arg1: i32, %arg2: i32) -> (i32, i32) {
    %c0_i32 = arith.constant 0 : i32
    %c0_i32_0 = arith.constant 0 : i32
    return %arg0, %c0_i32 : i32, i32
  }
  func.func @transform_3(%arg0: i32, %arg1: i32, %arg2: i32) -> (i32, i32) {
    %c0_i32 = arith.constant 0 : i32
    return %arg0, %arg1 : i32, i32
  }
}

module attributes {stable_mosaic.version = 11 : i64} {
  func.func @_inorm_kernel(%arg0: i32, %arg1: memref<128x16xf32, #tpu.memory_space<vmem>>, %arg2: memref<128x16xf32, #tpu.memory_space<vmem>>) attributes {dimension_semantics = [#tpu.dimension_semantics<parallel>], iteration_bounds = array<i64: 1>, scalar_prefetch = 0 : i64, scratch_operands = 0 : i64, tpu.core_type = #tpu.core_type<tc>, window_params = [{transform_indices = @transform_0, window_bounds = array<i64: 128, 16>}, {transform_indices = @transform_1, window_bounds = array<i64: 128, 16>}]} {
    %c0 = arith.constant 0 : index
    %c0_0 = arith.constant 0 : index
    %0 = vector.load %arg1[%c0, %c0_0] : memref<128x16xf32, #tpu.memory_space<vmem>>, vector<128x16xf32>
    %cst = arith.constant dense<0.000000e+00> : vector<128xf32>
    %1 = vector.multi_reduction <add>, %0, %cst [1] : vector<128x16xf32> to vector<128xf32>
    %2 = vector.shape_cast %1 : vector<128xf32> to vector<128x1xf32>
    %3 = arith.mulf %0, %0 : vector<128x16xf32>
    %cst_1 = arith.constant dense<0.000000e+00> : vector<128xf32>
    %4 = vector.multi_reduction <add>, %3, %cst_1 [1] : vector<128x16xf32> to vector<128xf32>
    %5 = vector.shape_cast %4 : vector<128xf32> to vector<128x1xf32>
    %cst_2 = arith.constant 6.250000e-02 : f32
    %6 = vector.broadcast %cst_2 : f32 to vector<128x1xf32>
    %7 = arith.mulf %2, %6 : vector<128x1xf32>
    %cst_3 = arith.constant 6.250000e-02 : f32
    %8 = vector.broadcast %cst_3 : f32 to vector<128x1xf32>
    %9 = arith.mulf %5, %8 : vector<128x1xf32>
    %10 = arith.mulf %7, %7 : vector<128x1xf32>
    %11 = arith.subf %9, %10 : vector<128x1xf32>
    %cst_4 = arith.constant 0.000000e+00 : f32
    %12 = vector.broadcast %cst_4 : f32 to vector<128x1xf32>
    %13 = arith.maximumf %11, %12 : vector<128x1xf32>
    %14 = vector.broadcast %7 : vector<128x1xf32> to vector<128x16xf32>
    %15 = arith.subf %0, %14 : vector<128x16xf32>
    %cst_5 = arith.constant 9.99999974E-6 : f32
    %16 = vector.broadcast %cst_5 : f32 to vector<128x1xf32>
    %17 = arith.addf %13, %16 : vector<128x1xf32>
    %18 = math.rsqrt %17 : vector<128x1xf32>
    %19 = vector.broadcast %18 : vector<128x1xf32> to vector<128x16xf32>
    %20 = arith.mulf %15, %19 : vector<128x16xf32>
    %cst_6 = arith.constant 0.000000e+00 : f32
    %21 = vector.broadcast %cst_6 : f32 to vector<128x16xf32>
    %22 = arith.maximumf %20, %21 : vector<128x16xf32>
    %c0_7 = arith.constant 0 : index
    %c0_8 = arith.constant 0 : index
    %23 = vector.load %arg2[%c0_7, %c0_8] : memref<128x16xf32, #tpu.memory_space<vmem>>, vector<128x16xf32>
    tpu.vector_store %arg2[%c0_7, %c0_8], %22 {strides = array<i32>} : memref<128x16xf32, #tpu.memory_space<vmem>>, vector<128x16xf32>,
    return
  }
  func.func @transform_0(%arg0: i32) -> (i32, i32) {
    %c0_i32 = arith.constant 0 : i32
    %c0_i32_0 = arith.constant 0 : i32
    return %arg0, %c0_i32 : i32, i32
  }
  func.func @transform_1(%arg0: i32) -> (i32, i32) {
    %c0_i32 = arith.constant 0 : i32
    %c0_i32_0 = arith.constant 0 : i32
    return %arg0, %c0_i32 : i32, i32
  }
}

module attributes {stable_mosaic.version = 11 : i64} {
  func.func @_matmul_bias_act_kernel(%arg0: i32, %arg1: i32, %arg2: i32, %arg3: memref<128x256xf32, #tpu.memory_space<vmem>>, %arg4: memref<256x128xf32, #tpu.memory_space<vmem>>, %arg5: memref<128x1xf32, #tpu.memory_space<vmem>>, %arg6: memref<128x128xf32, #tpu.memory_space<vmem>>, %arg7: memref<128x128xf32, #tpu.memory_space<vmem>>) attributes {dimension_semantics = [#tpu.dimension_semantics<parallel>, #tpu.dimension_semantics<parallel>, #tpu.dimension_semantics<arbitrary>], iteration_bounds = array<i64: 1, 1, 4>, scalar_prefetch = 0 : i64, scratch_operands = 1 : i64, tpu.core_type = #tpu.core_type<tc>, window_params = [{transform_indices = @transform_0, window_bounds = array<i64: 128, 256>}, {transform_indices = @transform_1, window_bounds = array<i64: 256, 128>}, {transform_indices = @transform_2, window_bounds = array<i64: 128, 1>}, {transform_indices = @transform_3, window_bounds = array<i64: 128, 128>}]} {
    %c0_i32 = arith.constant 0 : i32
    %0 = arith.cmpi eq, %arg2, %c0_i32 : i32
    %1 = arith.extui %0 : i1 to i32
    %c0_i32_0 = arith.constant 0 : i32
    %2 = arith.cmpi ne, %1, %c0_i32_0 : i32
    scf.if %2 {
      %cst_9 = arith.constant 0.000000e+00 : f32
      %12 = vector.broadcast %cst_9 : f32 to vector<128x128xf32>
      %c0_10 = arith.constant 0 : index
      %c0_11 = arith.constant 0 : index
      %13 = vector.load %arg7[%c0_10, %c0_11] : memref<128x128xf32, #tpu.memory_space<vmem>>, vector<128x128xf32>
      tpu.vector_store %arg7[%c0_10, %c0_11], %12 {strides = array<i32>} : memref<128x128xf32, #tpu.memory_space<vmem>>, vector<128x128xf32>,
    } else {
    }
    %c0 = arith.constant 0 : index
    %c0_1 = arith.constant 0 : index
    %3 = vector.load %arg7[%c0, %c0_1] : memref<128x128xf32, #tpu.memory_space<vmem>>, vector<128x128xf32>
    %c0_2 = arith.constant 0 : index
    %c0_3 = arith.constant 0 : index
    %4 = vector.load %arg3[%c0_2, %c0_3] : memref<128x256xf32, #tpu.memory_space<vmem>>, vector<128x256xf32>
    %c0_4 = arith.constant 0 : index
    %c0_5 = arith.constant 0 : index
    %5 = vector.load %arg4[%c0_4, %c0_5] : memref<256x128xf32, #tpu.memory_space<vmem>>, vector<256x128xf32>
    %cst = arith.constant dense<0.000000e+00> : vector<128x128xf32>
    %6 = tpu.matmul %4, %5, %cst {dimension_numbers = #tpu.dot_dimension_numbers<[1], [0], [0], [1], [0, 0, 1, 1], [], []>} : vector<128x256xf32>, vector<256x128xf32>, vector<128x128xf32> -> vector<128x128xf32>
    %7 = arith.addf %3, %6 : vector<128x128xf32>
    %c0_6 = arith.constant 0 : index
    %c0_7 = arith.constant 0 : index
    %8 = vector.load %arg7[%c0_6, %c0_7] : memref<128x128xf32, #tpu.memory_space<vmem>>, vector<128x128xf32>
    tpu.vector_store %arg7[%c0_6, %c0_7], %7 {strides = array<i32>} : memref<128x128xf32, #tpu.memory_space<vmem>>, vector<128x128xf32>,
    %c3_i32 = arith.constant 3 : i32
    %9 = arith.cmpi eq, %arg2, %c3_i32 : i32
    %10 = arith.extui %9 : i1 to i32
    %c0_i32_8 = arith.constant 0 : i32
    %11 = arith.cmpi ne, %10, %c0_i32_8 : i32
    scf.if %11 {
      %c0_9 = arith.constant 0 : index
      %c0_10 = arith.constant 0 : index
      %12 = vector.load %arg7[%c0_9, %c0_10] : memref<128x128xf32, #tpu.memory_space<vmem>>, vector<128x128xf32>
      %c0_11 = arith.constant 0 : index
      %c0_12 = arith.constant 0 : index
      %13 = vector.load %arg5[%c0_11, %c0_12] : memref<128x1xf32, #tpu.memory_space<vmem>>, vector<128x1xf32>
      %14 = vector.broadcast %13 : vector<128x1xf32> to vector<128x128xf32>
      %15 = arith.addf %12, %14 : vector<128x128xf32>
      %c0_13 = arith.constant 0 : index
      %c0_14 = arith.constant 0 : index
      %16 = vector.load %arg6[%c0_13, %c0_14] : memref<128x128xf32, #tpu.memory_space<vmem>>, vector<128x128xf32>
      tpu.vector_store %arg6[%c0_13, %c0_14], %15 {strides = array<i32>} : memref<128x128xf32, #tpu.memory_space<vmem>>, vector<128x128xf32>,
    } else {
    }
    return
  }
  func.func @transform_0(%arg0: i32, %arg1: i32, %arg2: i32) -> (i32, i32) {
    %c0_i32 = arith.constant 0 : i32
    return %arg0, %arg2 : i32, i32
  }
  func.func @transform_1(%arg0: i32, %arg1: i32, %arg2: i32) -> (i32, i32) {
    %c0_i32 = arith.constant 0 : i32
    return %arg2, %arg1 : i32, i32
  }
  func.func @transform_2(%arg0: i32, %arg1: i32, %arg2: i32) -> (i32, i32) {
    %c0_i32 = arith.constant 0 : i32
    %c0_i32_0 = arith.constant 0 : i32
    return %arg0, %c0_i32 : i32, i32
  }
  func.func @transform_3(%arg0: i32, %arg1: i32, %arg2: i32) -> (i32, i32) {
    %c0_i32 = arith.constant 0 : i32
    return %arg0, %arg1 : i32, i32
  }
}

module attributes {stable_mosaic.version = 11 : i64} {
  func.func @_inorm_kernel(%arg0: i32, %arg1: memref<256x4xf32, #tpu.memory_space<vmem>>, %arg2: memref<256x4xf32, #tpu.memory_space<vmem>>) attributes {dimension_semantics = [#tpu.dimension_semantics<parallel>], iteration_bounds = array<i64: 1>, scalar_prefetch = 0 : i64, scratch_operands = 0 : i64, tpu.core_type = #tpu.core_type<tc>, window_params = [{transform_indices = @transform_0, window_bounds = array<i64: 256, 4>}, {transform_indices = @transform_1, window_bounds = array<i64: 256, 4>}]} {
    %c0 = arith.constant 0 : index
    %c0_0 = arith.constant 0 : index
    %0 = vector.load %arg1[%c0, %c0_0] : memref<256x4xf32, #tpu.memory_space<vmem>>, vector<256x4xf32>
    %cst = arith.constant dense<0.000000e+00> : vector<256xf32>
    %1 = vector.multi_reduction <add>, %0, %cst [1] : vector<256x4xf32> to vector<256xf32>
    %2 = vector.shape_cast %1 : vector<256xf32> to vector<256x1xf32>
    %3 = arith.mulf %0, %0 : vector<256x4xf32>
    %cst_1 = arith.constant dense<0.000000e+00> : vector<256xf32>
    %4 = vector.multi_reduction <add>, %3, %cst_1 [1] : vector<256x4xf32> to vector<256xf32>
    %5 = vector.shape_cast %4 : vector<256xf32> to vector<256x1xf32>
    %cst_2 = arith.constant 2.500000e-01 : f32
    %6 = vector.broadcast %cst_2 : f32 to vector<256x1xf32>
    %7 = arith.mulf %2, %6 : vector<256x1xf32>
    %cst_3 = arith.constant 2.500000e-01 : f32
    %8 = vector.broadcast %cst_3 : f32 to vector<256x1xf32>
    %9 = arith.mulf %5, %8 : vector<256x1xf32>
    %10 = arith.mulf %7, %7 : vector<256x1xf32>
    %11 = arith.subf %9, %10 : vector<256x1xf32>
    %cst_4 = arith.constant 0.000000e+00 : f32
    %12 = vector.broadcast %cst_4 : f32 to vector<256x1xf32>
    %13 = arith.maximumf %11, %12 : vector<256x1xf32>
    %14 = vector.broadcast %7 : vector<256x1xf32> to vector<256x4xf32>
    %15 = arith.subf %0, %14 : vector<256x4xf32>
    %cst_5 = arith.constant 9.99999974E-6 : f32
    %16 = vector.broadcast %cst_5 : f32 to vector<256x1xf32>
    %17 = arith.addf %13, %16 : vector<256x1xf32>
    %18 = math.rsqrt %17 : vector<256x1xf32>
    %19 = vector.broadcast %18 : vector<256x1xf32> to vector<256x4xf32>
    %20 = arith.mulf %15, %19 : vector<256x4xf32>
    %cst_6 = arith.constant 0.000000e+00 : f32
    %21 = vector.broadcast %cst_6 : f32 to vector<256x4xf32>
    %22 = arith.maximumf %20, %21 : vector<256x4xf32>
    %c0_7 = arith.constant 0 : index
    %c0_8 = arith.constant 0 : index
    %23 = vector.load %arg2[%c0_7, %c0_8] : memref<256x4xf32, #tpu.memory_space<vmem>>, vector<256x4xf32>
    tpu.vector_store %arg2[%c0_7, %c0_8], %22 {strides = array<i32>} : memref<256x4xf32, #tpu.memory_space<vmem>>, vector<256x4xf32>,
    return
  }
  func.func @transform_0(%arg0: i32) -> (i32, i32) {
    %c0_i32 = arith.constant 0 : i32
    %c0_i32_0 = arith.constant 0 : i32
    return %arg0, %c0_i32 : i32, i32
  }
  func.func @transform_1(%arg0: i32) -> (i32, i32) {
    %c0_i32 = arith.constant 0 : i32
    %c0_i32_0 = arith.constant 0 : i32
    return %arg0, %c0_i32 : i32, i32
  }
}

module attributes {stable_mosaic.version = 11 : i64} {
  func.func @_matmul_bias_act_kernel(%arg0: i32, %arg1: i32, %arg2: i32, %arg3: memref<8x128xf32, #tpu.memory_space<vmem>>, %arg4: memref<128x128xf32, #tpu.memory_space<vmem>>, %arg5: memref<8x1xf32, #tpu.memory_space<vmem>>, %arg6: memref<8x128xf32, #tpu.memory_space<vmem>>, %arg7: memref<8x128xf32, #tpu.memory_space<vmem>>) attributes {dimension_semantics = [#tpu.dimension_semantics<parallel>, #tpu.dimension_semantics<parallel>, #tpu.dimension_semantics<arbitrary>], iteration_bounds = array<i64: 1, 1, 1>, scalar_prefetch = 0 : i64, scratch_operands = 1 : i64, tpu.core_type = #tpu.core_type<tc>, window_params = [{transform_indices = @transform_0, window_bounds = array<i64: 8, 128>}, {transform_indices = @transform_1, window_bounds = array<i64: 128, 128>}, {transform_indices = @transform_2, window_bounds = array<i64: 8, 1>}, {transform_indices = @transform_3, window_bounds = array<i64: 8, 128>}]} {
    %c0_i32 = arith.constant 0 : i32
    %0 = arith.cmpi eq, %arg2, %c0_i32 : i32
    %1 = arith.extui %0 : i1 to i32
    %c0_i32_0 = arith.constant 0 : i32
    %2 = arith.cmpi ne, %1, %c0_i32_0 : i32
    scf.if %2 {
      %cst_10 = arith.constant 0.000000e+00 : f32
      %12 = vector.broadcast %cst_10 : f32 to vector<8x128xf32>
      %c0_11 = arith.constant 0 : index
      %c0_12 = arith.constant 0 : index
      %13 = vector.load %arg7[%c0_11, %c0_12] : memref<8x128xf32, #tpu.memory_space<vmem>>, vector<8x128xf32>
      tpu.vector_store %arg7[%c0_11, %c0_12], %12 {strides = array<i32>} : memref<8x128xf32, #tpu.memory_space<vmem>>, vector<8x128xf32>,
    } else {
    }
    %c0 = arith.constant 0 : index
    %c0_1 = arith.constant 0 : index
    %3 = vector.load %arg7[%c0, %c0_1] : memref<8x128xf32, #tpu.memory_space<vmem>>, vector<8x128xf32>
    %c0_2 = arith.constant 0 : index
    %c0_3 = arith.constant 0 : index
    %4 = vector.load %arg3[%c0_2, %c0_3] : memref<8x128xf32, #tpu.memory_space<vmem>>, vector<8x128xf32>
    %c0_4 = arith.constant 0 : index
    %c0_5 = arith.constant 0 : index
    %5 = vector.load %arg4[%c0_4, %c0_5] : memref<128x128xf32, #tpu.memory_space<vmem>>, vector<128x128xf32>
    %cst = arith.constant dense<0.000000e+00> : vector<8x128xf32>
    %6 = tpu.matmul %4, %5, %cst {dimension_numbers = #tpu.dot_dimension_numbers<[1], [0], [0], [1], [0, 0, 1, 1], [], []>} : vector<8x128xf32>, vector<128x128xf32>, vector<8x128xf32> -> vector<8x128xf32>
    %7 = arith.addf %3, %6 : vector<8x128xf32>
    %c0_6 = arith.constant 0 : index
    %c0_7 = arith.constant 0 : index
    %8 = vector.load %arg7[%c0_6, %c0_7] : memref<8x128xf32, #tpu.memory_space<vmem>>, vector<8x128xf32>
    tpu.vector_store %arg7[%c0_6, %c0_7], %7 {strides = array<i32>} : memref<8x128xf32, #tpu.memory_space<vmem>>, vector<8x128xf32>,
    %c0_i32_8 = arith.constant 0 : i32
    %9 = arith.cmpi eq, %arg2, %c0_i32_8 : i32
    %10 = arith.extui %9 : i1 to i32
    %c0_i32_9 = arith.constant 0 : i32
    %11 = arith.cmpi ne, %10, %c0_i32_9 : i32
    scf.if %11 {
      %c0_10 = arith.constant 0 : index
      %c0_11 = arith.constant 0 : index
      %12 = vector.load %arg7[%c0_10, %c0_11] : memref<8x128xf32, #tpu.memory_space<vmem>>, vector<8x128xf32>
      %c0_12 = arith.constant 0 : index
      %c0_13 = arith.constant 0 : index
      %13 = vector.load %arg5[%c0_12, %c0_13] : memref<8x1xf32, #tpu.memory_space<vmem>>, vector<8x1xf32>
      %14 = vector.broadcast %13 : vector<8x1xf32> to vector<8x128xf32>
      %15 = arith.addf %12, %14 : vector<8x128xf32>
      %c0_14 = arith.constant 0 : index
      %c0_15 = arith.constant 0 : index
      %16 = vector.load %arg6[%c0_14, %c0_15] : memref<8x128xf32, #tpu.memory_space<vmem>>, vector<8x128xf32>
      tpu.vector_store %arg6[%c0_14, %c0_15], %15 {strides = array<i32>} : memref<8x128xf32, #tpu.memory_space<vmem>>, vector<8x128xf32>,
    } else {
    }
    return
  }
  func.func @transform_0(%arg0: i32, %arg1: i32, %arg2: i32) -> (i32, i32) {
    %c0_i32 = arith.constant 0 : i32
    return %arg0, %arg2 : i32, i32
  }
  func.func @transform_1(%arg0: i32, %arg1: i32, %arg2: i32) -> (i32, i32) {
    %c0_i32 = arith.constant 0 : i32
    return %arg2, %arg1 : i32, i32
  }
  func.func @transform_2(%arg0: i32, %arg1: i32, %arg2: i32) -> (i32, i32) {
    %c0_i32 = arith.constant 0 : i32
    %c0_i32_0 = arith.constant 0 : i32
    return %arg0, %c0_i32 : i32, i32
  }
  func.func @transform_3(%arg0: i32, %arg1: i32, %arg2: i32) -> (i32, i32) {
    %c0_i32 = arith.constant 0 : i32
    return %arg0, %arg1 : i32, i32
  }
}

</mosaic_0001>

<bundles_post_ra>
// kernel: forward.12
= control target key start
LH: loop header
LB: loop body
LE: loop exit
PB: predicated region body
PF: predicated region fallthrough
CT: control target
= control target key end

     0   :  { %s1096_s12 = smov 0   ;;  %s1098_s13 = smov 0   ;;  %s1560_s0 = inlined_call_operand.vmem [shape: f32[8,256], index: 0, kind: input, shape index: {}]   ;;  %s1561_s1 = inlined_call_operand.vmem [shape: f32[256,2048], index: 1, kind: input, shape index: {}]   ;;  %s1562_s2 = inlined_call_operand.vmem [shape: f32[8,1], index: 2, kind: input, shape index: {}]   ;;  %s1563_s3 = inlined_call_operand.vmem [shape: f32[8,2048], index: 3, kind: output, shape index: {}]  }
   0x1   :  { %s1100_s14 = smov 0   ;;  %s1102_s15 = smov 0  }
   0x2   :  { %s1104_s16 = smov 0  }
   0x3 LB: > { %s28_s17 = sadd.s32 1, %s1069_s15  ;;  %p76_p1 = scmp.ne.s32.totalorder %s1061_s13, %s1057_s12  ;;  %s1073_s16 = sphi %s1104_s16, %s13_s16   ;;  %s1069_s15 = sphi %s1102_s15, %s1567_s15   ;;  %s1065_s14 = sphi %s1100_s14, %s1566_s14   ;;  %s1061_s13 = sphi %s1098_s13, %s1565_s13   ;;  %s1057_s12 = sphi %s1096_s12, %s1564_s12  }
   0x4   : > { %p30_p0 = scmp.ge.s32.totalorder %s28_s17, 4  ;;  %p77_p2 = scmp.eq.s32.totalorder %s1073_s16, 0 }
   0x5   : > { %s69_s19 = sadd.s32 1, %s1061_s13  ;;  %p982_p5 = scmp.ge.s32.totalorder %s1073_s16, 4 }
   0x6   : > { %s1569_s17 = smov (%p30_p0, %s28_s17), 0  ;;  %p78_p3 = por %p77_p2, %p76_p1 }
   0x7   : > { %s65_s18 = ssub.s32 %s1069_s15, %s1569_s17  ;;  %176 = sbr.rel (%p982_p5) target bundleno = 80 (0x50), region = 24 }
   0x8   : > { %p67_p4 = scmp.eq.s32.totalorder %s65_s18, 0 }
   0xa   : > { %s1131_s20 = scalar_select %p67_p4, %s1061_s13, %s69_s19  }
   0xc   : > { %179 = sbr.rel (!%p78_p3) target bundleno = 80 (0x50), region = 28  ;;  %s181_s21 = sand.u32 (%p78_p3), 1, %s1061_s13  }
   0xd   : > { %s992_s22 = sshll.u32 (%p78_p3), %s1069_s15, 5  ;;  %s983_s23 = sshll.u32 (%p78_p3), %s181_s21, 10 }
   0xe   : > { %s1139_s26 = scalar_lea.vmem (%p78_p3), %s1561_s1, %s992_s22  ;;  %s1144_s27 = scalar_lea.vmem (%p78_p3), [#allocation3], %s983_s23 }
   0xf   : > { %v202_v0 = vld [vmem:[%s1139_s26] sm:$0xff] (%p78_p3)  ;;  %v204_v1 = vld [vmem:[%s1139_s26 + $0x8] sm:$0xff] (%p78_p3)  ;;  %v206_v2 = vld [vmem:[%s1139_s26 + $0x10] sm:$0xff] (%p78_p3) }
  0x10   : > { %203 = vst [vmem:[%s1144_s27] sm:$0xff] (%p78_p3), %v202_v0  ;;  %205 = vst [vmem:[%s1144_s27 + $0x8] sm:$0xff] (%p78_p3), %v204_v1  ;;  %v208_v3 = vld [vmem:[%s1139_s26 + $0x18] sm:$0xff] (%p78_p3)  ;;  %v210_v4 = vld [vmem:[%s1139_s26 + $0x80] sm:$0xff] (%p78_p3) }
  0x11   : > { %207 = vst [vmem:[%s1144_s27 + $0x10] sm:$0xff] %v206_v2  ;;  %v212_v5 = vld [vmem:[%s1139_s26 + $0x88] sm:$0xff]  ;;  %209 = vst [vmem:[%s1144_s27 + $0x18] sm:$0xff] %v208_v3  ;;  %v214_v6 = vld [vmem:[%s1139_s26 + $0x90] sm:$0xff] }
  0x12   : > { %211 = vst [vmem:[%s1144_s27 + $0x20] sm:$0xff] %v210_v4  ;;  %213 = vst [vmem:[%s1144_s27 + $0x28] sm:$0xff] %v212_v5  ;;  %v216_v7 = vld [vmem:[%s1139_s26 + $0x98] sm:$0xff]  ;;  %v218_v8 = vld [vmem:[%s1139_s26 + $0x100] sm:$0xff] }
  0x13   : > { %215 = vst [vmem:[%s1144_s27 + $0x30] sm:$0xff] %v214_v6  ;;  %217 = vst [vmem:[%s1144_s27 + $0x38] sm:$0xff] %v216_v7  ;;  %v220_v9 = vld [vmem:[%s1139_s26 + $0x108] sm:$0xff]  ;;  %v222_v10 = vld [vmem:[%s1139_s26 + $0x110] sm:$0xff] }
  0x14   : > { %219 = vst [vmem:[%s1144_s27 + $0x40] sm:$0xff] %v218_v8  ;;  %v224_v11 = vld [vmem:[%s1139_s26 + $0x118] sm:$0xff]  ;;  %221 = vst [vmem:[%s1144_s27 + $0x48] sm:$0xff] %v220_v9  ;;  %v226_v12 = vld [vmem:[%s1139_s26 + $0x180] sm:$0xff] }
  0x15   : > { %223 = vst [vmem:[%s1144_s27 + $0x50] sm:$0xff] %v222_v10  ;;  %225 = vst [vmem:[%s1144_s27 + $0x58] sm:$0xff] %v224_v11  ;;  %v228_v13 = vld [vmem:[%s1139_s26 + $0x188] sm:$0xff]  ;;  %v230_v14 = vld [vmem:[%s1139_s26 + $0x190] sm:$0xff] }
  0x16   : > { %227 = vst [vmem:[%s1144_s27 + $0x60] sm:$0xff] %v226_v12  ;;  %229 = vst [vmem:[%s1144_s27 + $0x68] sm:$0xff] %v228_v13  ;;  %v232_v15 = vld [vmem:[%s1139_s26 + $0x198] sm:$0xff]  ;;  %v234_v16 = vld [vmem:[%s1139_s26 + $0x200] sm:$0xff] }
  0x17   : > { %231 = vst [vmem:[%s1144_s27 + $0x70] sm:$0xff] %v230_v14  ;;  %v236_v17 = vld [vmem:[%s1139_s26 + $0x208] sm:$0xff]  ;;  %233 = vst [vmem:[%s1144_s27 + $0x78] sm:$0xff] %v232_v15  ;;  %v238_v18 = vld [vmem:[%s1139_s26 + $0x210] sm:$0xff] }
  0x18   : > { %235 = vst [vmem:[%s1144_s27 + $0x80] sm:$0xff] %v234_v16  ;;  %237 = vst [vmem:[%s1144_s27 + $0x88] sm:$0xff] %v236_v17  ;;  %v240_v19 = vld [vmem:[%s1139_s26 + $0x218] sm:$0xff]  ;;  %v242_v20 = vld [vmem:[%s1139_s26 + $0x280] sm:$0xff] }
  0x19   : > { %239 = vst [vmem:[%s1144_s27 + $0x90] sm:$0xff] %v238_v18  ;;  %241 = vst [vmem:[%s1144_s27 + $0x98] sm:$0xff] %v240_v19  ;;  %v244_v21 = vld [vmem:[%s1139_s26 + $0x288] sm:$0xff]  ;;  %v246_v22 = vld [vmem:[%s1139_s26 + $0x290] sm:$0xff] }
  0x1a   : > { %243 = vst [vmem:[%s1144_s27 + $0xa0] sm:$0xff] %v242_v20  ;;  %v248_v23 = vld [vmem:[%s1139_s26 + $0x298] sm:$0xff]  ;;  %245 = vst [vmem:[%s1144_s27 + $0xa8] sm:$0xff] %v244_v21  ;;  %v250_v24 = vld [vmem:[%s1139_s26 + $0x300] sm:$0xff] }
  0x1b   : > { %247 = vst [vmem:[%s1144_s27 + $0xb0] sm:$0xff] %v246_v22  ;;  %249 = vst [vmem:[%s1144_s27 + $0xb8] sm:$0xff] %v248_v23  ;;  %v252_v25 = vld [vmem:[%s1139_s26 + $0x308] sm:$0xff]  ;;  %v254_v26 = vld [vmem:[%s1139_s26 + $0x310] sm:$0xff] }
  0x1c   : > { %251 = vst [vmem:[%s1144_s27 + $0xc0] sm:$0xff] %v250_v24  ;;  %253 = vst [vmem:[%s1144_s27 + $0xc8] sm:$0xff] %v252_v25  ;;  %v256_v27 = vld [vmem:[%s1139_s26 + $0x318] sm:$0xff]  ;;  %v258_v28 = vld [vmem:[%s1139_s26 + $0x380] sm:$0xff] }
  0x1d   : > { %255 = vst [vmem:[%s1144_s27 + $0xd0] sm:$0xff] %v254_v26  ;;  %v260_v29 = vld [vmem:[%s1139_s26 + $0x388] sm:$0xff]  ;;  %257 = vst [vmem:[%s1144_s27 + $0xd8] sm:$0xff] %v256_v27  ;;  %v262_v30 = vld [vmem:[%s1139_s26 + $0x390] sm:$0xff] }
  0x1e   : > { %259 = vst [vmem:[%s1144_s27 + $0xe0] sm:$0xff] %v258_v28  ;;  %261 = vst [vmem:[%s1144_s27 + $0xe8] sm:$0xff] %v260_v29  ;;  %v264_v31 = vld [vmem:[%s1139_s26 + $0x398] sm:$0xff]  ;;  %v266_v32 = vld [vmem:[%s1139_s26 + $0x400] sm:$0xff] }
  0x1f   : > { %263 = vst [vmem:[%s1144_s27 + $0xf0] sm:$0xff] %v262_v30  ;;  %265 = vst [vmem:[%s1144_s27 + $0xf8] sm:$0xff] %v264_v31  ;;  %v268_v33 = vld [vmem:[%s1139_s26 + $0x408] sm:$0xff]  ;;  %v270_v34 = vld [vmem:[%s1139_s26 + $0x410] sm:$0xff] }
  0x20   : > { %267 = vst [vmem:[%s1144_s27 + $0x100] sm:$0xff] %v266_v32  ;;  %v272_v35 = vld [vmem:[%s1139_s26 + $0x418] sm:$0xff]  ;;  %269 = vst [vmem:[%s1144_s27 + $0x108] sm:$0xff] %v268_v33  ;;  %v274_v36 = vld [vmem:[%s1139_s26 + $0x480] sm:$0xff] }
  0x21   : > { %271 = vst [vmem:[%s1144_s27 + $0x110] sm:$0xff] %v270_v34  ;;  %273 = vst [vmem:[%s1144_s27 + $0x118] sm:$0xff] %v272_v35  ;;  %v276_v37 = vld [vmem:[%s1139_s26 + $0x488] sm:$0xff]  ;;  %v278_v38 = vld [vmem:[%s1139_s26 + $0x490] sm:$0xff] }
  0x22   : > { %275 = vst [vmem:[%s1144_s27 + $0x120] sm:$0xff] %v274_v36  ;;  %277 = vst [vmem:[%s1144_s27 + $0x128] sm:$0xff] %v276_v37  ;;  %v280_v39 = vld [vmem:[%s1139_s26 + $0x498] sm:$0xff]  ;;  %v282_v40 = vld [vmem:[%s1139_s26 + $0x500] sm:$0xff] }
  0x23   : > { %279 = vst [vmem:[%s1144_s27 + $0x130] sm:$0xff] %v278_v38  ;;  %v284_v41 = vld [vmem:[%s1139_s26 + $0x508] sm:$0xff]  ;;  %281 = vst [vmem:[%s1144_s27 + $0x138] sm:$0xff] %v280_v39  ;;  %v286_v42 = vld [vmem:[%s1139_s26 + $0x510] sm:$0xff] }
  0x24   : > { %283 = vst [vmem:[%s1144_s27 + $0x140] sm:$0xff] %v282_v40  ;;  %285 = vst [vmem:[%s1144_s27 + $0x148] sm:$0xff] %v284_v41  ;;  %v288_v43 = vld [vmem:[%s1139_s26 + $0x518] sm:$0xff]  ;;  %v290_v44 = vld [vmem:[%s1139_s26 + $0x580] sm:$0xff] }
  0x25   : > { %287 = vst [vmem:[%s1144_s27 + $0x150] sm:$0xff] %v286_v42  ;;  %289 = vst [vmem:[%s1144_s27 + $0x158] sm:$0xff] %v288_v43  ;;  %v292_v45 = vld [vmem:[%s1139_s26 + $0x588] sm:$0xff]  ;;  %v294_v46 = vld [vmem:[%s1139_s26 + $0x590] sm:$0xff] }
  0x26   : > { %291 = vst [vmem:[%s1144_s27 + $0x160] sm:$0xff] %v290_v44  ;;  %v296_v47 = vld [vmem:[%s1139_s26 + $0x598] sm:$0xff]  ;;  %293 = vst [vmem:[%s1144_s27 + $0x168] sm:$0xff] %v292_v45  ;;  %v298_v48 = vld [vmem:[%s1139_s26 + $0x600] sm:$0xff] }
  0x27   : > { %295 = vst [vmem:[%s1144_s27 + $0x170] sm:$0xff] %v294_v46  ;;  %297 = vst [vmem:[%s1144_s27 + $0x178] sm:$0xff] %v296_v47  ;;  %v300_v49 = vld [vmem:[%s1139_s26 + $0x608] sm:$0xff]  ;;  %v302_v50 = vld [vmem:[%s1139_s26 + $0x610] sm:$0xff] }
  0x28   : > { %299 = vst [vmem:[%s1144_s27 + $0x180] sm:$0xff] %v298_v48  ;;  %301 = vst [vmem:[%s1144_s27 + $0x188] sm:$0xff] %v300_v49  ;;  %v304_v51 = vld [vmem:[%s1139_s26 + $0x618] sm:$0xff]  ;;  %v306_v52 = vld [vmem:[%s1139_s26 + $0x680] sm:$0xff] }
  0x29   : > { %303 = vst [vmem:[%s1144_s27 + $0x190] sm:$0xff] %v302_v50  ;;  %v308_v53 = vld [vmem:[%s1139_s26 + $0x688] sm:$0xff]  ;;  %305 = vst [vmem:[%s1144_s27 + $0x198] sm:$0xff] %v304_v51  ;;  %v310_v54 = vld [vmem:[%s1139_s26 + $0x690] sm:$0xff] }
  0x2a   : > { %307 = vst [vmem:[%s1144_s27 + $0x1a0] sm:$0xff] %v306_v52  ;;  %309 = vst [vmem:[%s1144_s27 + $0x1a8] sm:$0xff] %v308_v53  ;;  %v312_v55 = vld [vmem:[%s1139_s26 + $0x698] sm:$0xff]  ;;  %v314_v56 = vld [vmem:[%s1139_s26 + $0x700] sm:$0xff] }
  0x2b   : > { %311 = vst [vmem:[%s1144_s27 + $0x1b0] sm:$0xff] %v310_v54  ;;  %313 = vst [vmem:[%s1144_s27 + $0x1b8] sm:$0xff] %v312_v55  ;;  %v316_v57 = vld [vmem:[%s1139_s26 + $0x708] sm:$0xff]  ;;  %v318_v58 = vld [vmem:[%s1139_s26 + $0x710] sm:$0xff] }
  0x2c   : > { %315 = vst [vmem:[%s1144_s27 + $0x1c0] sm:$0xff] %v314_v56  ;;  %v320_v59 = vld [vmem:[%s1139_s26 + $0x718] sm:$0xff]  ;;  %317 = vst [vmem:[%s1144_s27 + $0x1c8] sm:$0xff] %v316_v57  ;;  %v322_v60 = vld [vmem:[%s1139_s26 + $0x780] sm:$0xff] }
  0x2d   : > { %319 = vst [vmem:[%s1144_s27 + $0x1d0] sm:$0xff] %v318_v58  ;;  %321 = vst [vmem:[%s1144_s27 + $0x1d8] sm:$0xff] %v320_v59  ;;  %v324_v61 = vld [vmem:[%s1139_s26 + $0x788] sm:$0xff]  ;;  %v326_v62 = vld [vmem:[%s1139_s26 + $0x790] sm:$0xff] }
  0x2e   : > { %323 = vst [vmem:[%s1144_s27 + $0x1e0] sm:$0xff] %v322_v60  ;;  %325 = vst [vmem:[%s1144_s27 + $0x1e8] sm:$0xff] %v324_v61  ;;  %v328_v63 = vld [vmem:[%s1139_s26 + $0x798] sm:$0xff]  ;;  %v330_v0 = vld [vmem:[%s1139_s26 + $0x800] sm:$0xff] }
  0x2f   : > { %327 = vst [vmem:[%s1144_s27 + $0x1f0] sm:$0xff] %v326_v62  ;;  %v332_v1 = vld [vmem:[%s1139_s26 + $0x808] sm:$0xff]  ;;  %329 = vst [vmem:[%s1144_s27 + $0x1f8] sm:$0xff] %v328_v63  ;;  %v334_v2 = vld [vmem:[%s1139_s26 + $0x810] sm:$0xff] }
  0x30   : > { %331 = vst [vmem:[%s1144_s27 + $0x200] sm:$0xff] %v330_v0  ;;  %333 = vst [vmem:[%s1144_s27 + $0x208] sm:$0xff] %v332_v1  ;;  %v336_v3 = vld [vmem:[%s1139_s26 + $0x818] sm:$0xff]  ;;  %v338_v4 = vld [vmem:[%s1139_s26 + $0x880] sm:$0xff] }
  0x31   : > { %335 = vst [vmem:[%s1144_s27 + $0x210] sm:$0xff] %v334_v2  ;;  %337 = vst [vmem:[%s1144_s27 + $0x218] sm:$0xff] %v336_v3  ;;  %v340_v5 = vld [vmem:[%s1139_s26 + $0x888] sm:$0xff]  ;;  %v342_v6 = vld [vmem:[%s1139_s26 + $0x890] sm:$0xff] }
  0x32   : > { %339 = vst [vmem:[%s1144_s27 + $0x220] sm:$0xff] %v338_v4  ;;  %v344_v7 = vld [vmem:[%s1139_s26 + $0x898] sm:$0xff]  ;;  %341 = vst [vmem:[%s1144_s27 + $0x228] sm:$0xff] %v340_v5  ;;  %v346_v8 = vld [vmem:[%s1139_s26 + $0x900] sm:$0xff] }
  0x33   : > { %343 = vst [vmem:[%s1144_s27 + $0x230] sm:$0xff] %v342_v6  ;;  %345 = vst [vmem:[%s1144_s27 + $0x238] sm:$0xff] %v344_v7  ;;  %v348_v9 = vld [vmem:[%s1139_s26 + $0x908] sm:$0xff]  ;;  %v350_v10 = vld [vmem:[%s1139_s26 + $0x910] sm:$0xff] }
  0x34   : > { %347 = vst [vmem:[%s1144_s27 + $0x240] sm:$0xff] %v346_v8  ;;  %349 = vst [vmem:[%s1144_s27 + $0x248] sm:$0xff] %v348_v9  ;;  %v352_v11 = vld [vmem:[%s1139_s26 + $0x918] sm:$0xff]  ;;  %v354_v12 = vld [vmem:[%s1139_s26 + $0x980] sm:$0xff] }
  0x35   : > { %351 = vst [vmem:[%s1144_s27 + $0x250] sm:$0xff] %v350_v10  ;;  %v356_v13 = vld [vmem:[%s1139_s26 + $0x988] sm:$0xff]  ;;  %353 = vst [vmem:[%s1144_s27 + $0x258] sm:$0xff] %v352_v11  ;;  %v358_v14 = vld [vmem:[%s1139_s26 + $0x990] sm:$0xff] }
  0x36   : > { %355 = vst [vmem:[%s1144_s27 + $0x260] sm:$0xff] %v354_v12  ;;  %357 = vst [vmem:[%s1144_s27 + $0x268] sm:$0xff] %v356_v13  ;;  %v360_v15 = vld [vmem:[%s1139_s26 + $0x998] sm:$0xff]  ;;  %v362_v16 = vld [vmem:[%s1139_s26 + $0xa00] sm:$0xff] }
  0x37   : > { %359 = vst [vmem:[%s1144_s27 + $0x270] sm:$0xff] %v358_v14  ;;  %361 = vst [vmem:[%s1144_s27 + $0x278] sm:$0xff] %v360_v15  ;;  %v364_v17 = vld [vmem:[%s1139_s26 + $0xa08] sm:$0xff]  ;;  %v366_v18 = vld [vmem:[%s1139_s26 + $0xa10] sm:$0xff] }
  0x38   : > { %363 = vst [vmem:[%s1144_s27 + $0x280] sm:$0xff] %v362_v16  ;;  %v368_v19 = vld [vmem:[%s1139_s26 + $0xa18] sm:$0xff]  ;;  %365 = vst [vmem:[%s1144_s27 + $0x288] sm:$0xff] %v364_v17  ;;  %v370_v20 = vld [vmem:[%s1139_s26 + $0xa80] sm:$0xff] }
  0x39   : > { %367 = vst [vmem:[%s1144_s27 + $0x290] sm:$0xff] %v366_v18  ;;  %369 = vst [vmem:[%s1144_s27 + $0x298] sm:$0xff] %v368_v19  ;;  %v372_v21 = vld [vmem:[%s1139_s26 + $0xa88] sm:$0xff]  ;;  %v374_v22 = vld [vmem:[%s1139_s26 + $0xa90] sm:$0xff] }
  0x3a   : > { %371 = vst [vmem:[%s1144_s27 + $0x2a0] sm:$0xff] %v370_v20  ;;  %373 = vst [vmem:[%s1144_s27 + $0x2a8] sm:$0xff] %v372_v21  ;;  %v376_v23 = vld [vmem:[%s1139_s26 + $0xa98] sm:$0xff]  ;;  %v378_v24 = vld [vmem:[%s1139_s26 + $0xb00] sm:$0xff] }
  0x3b   : > { %375 = vst [vmem:[%s1144_s27 + $0x2b0] sm:$0xff] %v374_v22  ;;  %v380_v25 = vld [vmem:[%s1139_s26 + $0xb08] sm:$0xff]  ;;  %377 = vst [vmem:[%s1144_s27 + $0x2b8] sm:$0xff] %v376_v23  ;;  %v382_v26 = vld [vmem:[%s1139_s26 + $0xb10] sm:$0xff] }
  0x3c   : > { %379 = vst [vmem:[%s1144_s27 + $0x2c0] sm:$0xff] %v378_v24  ;;  %381 = vst [vmem:[%s1144_s27 + $0x2c8] sm:$0xff] %v380_v25  ;;  %v384_v27 = vld [vmem:[%s1139_s26 + $0xb18] sm:$0xff]  ;;  %v386_v28 = vld [vmem:[%s1139_s26 + $0xb80] sm:$0xff] }
  0x3d   : > { %383 = vst [vmem:[%s1144_s27 + $0x2d0] sm:$0xff] %v382_v26  ;;  %385 = vst [vmem:[%s1144_s27 + $0x2d8] sm:$0xff] %v384_v27  ;;  %v388_v29 = vld [vmem:[%s1139_s26 + $0xb88] sm:$0xff]  ;;  %v390_v30 = vld [vmem:[%s1139_s26 + $0xb90] sm:$0xff] }
  0x3e   : > { %387 = vst [vmem:[%s1144_s27 + $0x2e0] sm:$0xff] %v386_v28  ;;  %v392_v31 = vld [vmem:[%s1139_s26 + $0xb98] sm:$0xff]  ;;  %389 = vst [vmem:[%s1144_s27 + $0x2e8] sm:$0xff] %v388_v29  ;;  %v394_v32 = vld [vmem:[%s1139_s26 + $0xc00] sm:$0xff] }
  0x3f   : > { %391 = vst [vmem:[%s1144_s27 + $0x2f0] sm:$0xff] %v390_v30  ;;  %393 = vst [vmem:[%s1144_s27 + $0x2f8] sm:$0xff] %v392_v31  ;;  %v396_v33 = vld [vmem:[%s1139_s26 + $0xc08] sm:$0xff]  ;;  %v398_v34 = vld [vmem:[%s1139_s26 + $0xc10] sm:$0xff] }
  0x40   : > { %395 = vst [vmem:[%s1144_s27 + $0x300] sm:$0xff] %v394_v32  ;;  %397 = vst [vmem:[%s1144_s27 + $0x308] sm:$0xff] %v396_v33  ;;  %v400_v35 = vld [vmem:[%s1139_s26 + $0xc18] sm:$0xff]  ;;  %v402_v36 = vld [vmem:[%s1139_s26 + $0xc80] sm:$0xff] }
  0x41   : > { %399 = vst [vmem:[%s1144_s27 + $0x310] sm:$0xff] %v398_v34  ;;  %v404_v37 = vld [vmem:[%s1139_s26 + $0xc88] sm:$0xff]  ;;  %401 = vst [vmem:[%s1144_s27 + $0x318] sm:$0xff] %v400_v35  ;;  %v406_v38 = vld [vmem:[%s1139_s26 + $0xc90] sm:$0xff] }
  0x42   : > { %403 = vst [vmem:[%s1144_s27 + $0x320] sm:$0xff] %v402_v36  ;;  %405 = vst [vmem:[%s1144_s27 + $0x328] sm:$0xff] %v404_v37  ;;  %v408_v39 = vld [vmem:[%s1139_s26 + $0xc98] sm:$0xff]  ;;  %v410_v40 = vld [vmem:[%s1139_s26 + $0xd00] sm:$0xff] }
  0x43   : > { %407 = vst [vmem:[%s1144_s27 + $0x330] sm:$0xff] %v406_v38  ;;  %409 = vst [vmem:[%s1144_s27 + $0x338] sm:$0xff] %v408_v39  ;;  %v412_v41 = vld [vmem:[%s1139_s26 + $0xd08] sm:$0xff]  ;;  %v414_v42 = vld [vmem:[%s1139_s26 + $0xd10] sm:$0xff] }
  0x44   : > { %411 = vst [vmem:[%s1144_s27 + $0x340] sm:$0xff] %v410_v40  ;;  %v416_v43 = vld [vmem:[%s1139_s26 + $0xd18] sm:$0xff]  ;;  %413 = vst [vmem:[%s1144_s27 + $0x348] sm:$0xff] %v412_v41  ;;  %v418_v44 = vld [vmem:[%s1139_s26 + $0xd80] sm:$0xff] }
  0x45   : > { %415 = vst [vmem:[%s1144_s27 + $0x350] sm:$0xff] %v414_v42  ;;  %417 = vst [vmem:[%s1144_s27 + $0x358] sm:$0xff] %v416_v43  ;;  %v420_v45 = vld [vmem:[%s1139_s26 + $0xd88] sm:$0xff]  ;;  %v422_v46 = vld [vmem:[%s1139_s26 + $0xd90] sm:$0xff] }
  0x46   : > { %419 = vst [vmem:[%s1144_s27 + $0x360] sm:$0xff] %v418_v44  ;;  %421 = vst [vmem:[%s1144_s27 + $0x368] sm:$0xff] %v420_v45  ;;  %v424_v47 = vld [vmem:[%s1139_s26 + $0xd98] sm:$0xff]  ;;  %v426_v48 = vld [vmem:[%s1139_s26 + $0xe00] sm:$0xff] }
  0x47   : > { %423 = vst [vmem:[%s1144_s27 + $0x370] sm:$0xff] %v422_v46  ;;  %v428_v49 = vld [vmem:[%s1139_s26 + $0xe08] sm:$0xff]  ;;  %425 = vst [vmem:[%s1144_s27 + $0x378] sm:$0xff] %v424_v47  ;;  %v430_v50 = vld [vmem:[%s1139_s26 + $0xe10] sm:$0xff] }
  0x48   : > { %427 = vst [vmem:[%s1144_s27 + $0x380] sm:$0xff] %v426_v48  ;;  %429 = vst [vmem:[%s1144_s27 + $0x388] sm:$0xff] %v428_v49  ;;  %v432_v51 = vld [vmem:[%s1139_s26 + $0xe18] sm:$0xff]  ;;  %v434_v52 = vld [vmem:[%s1139_s26 + $0xe80] sm:$0xff] }
  0x49   : > { %431 = vst [vmem:[%s1144_s27 + $0x390] sm:$0xff] %v430_v50  ;;  %433 = vst [vmem:[%s1144_s27 + $0x398] sm:$0xff] %v432_v51  ;;  %v436_v53 = vld [vmem:[%s1139_s26 + $0xe88] sm:$0xff]  ;;  %v438_v54 = vld [vmem:[%s1139_s26 + $0xe90] sm:$0xff] }
  0x4a   : > { %435 = vst [vmem:[%s1144_s27 + $0x3a0] sm:$0xff] %v434_v52  ;;  %v440_v55 = vld [vmem:[%s1139_s26 + $0xe98] sm:$0xff]  ;;  %437 = vst [vmem:[%s1144_s27 + $0x3a8] sm:$0xff] %v436_v53  ;;  %v442_v56 = vld [vmem:[%s1139_s26 + $0xf00] sm:$0xff] }
  0x4b   : > { %439 = vst [vmem:[%s1144_s27 + $0x3b0] sm:$0xff] %v438_v54  ;;  %441 = vst [vmem:[%s1144_s27 + $0x3b8] sm:$0xff] %v440_v55  ;;  %v444_v57 = vld [vmem:[%s1139_s26 + $0xf08] sm:$0xff]  ;;  %v446_v58 = vld [vmem:[%s1139_s26 + $0xf10] sm:$0xff] }
  0x4c   : > { %443 = vst [vmem:[%s1144_s27 + $0x3c0] sm:$0xff] %v442_v56  ;;  %445 = vst [vmem:[%s1144_s27 + $0x3c8] sm:$0xff] %v444_v57  ;;  %v448_v59 = vld [vmem:[%s1139_s26 + $0xf18] sm:$0xff]  ;;  %v450_v60 = vld [vmem:[%s1139_s26 + $0xf80] sm:$0xff] }
  0x4d   : > { %447 = vst [vmem:[%s1144_s27 + $0x3d0] sm:$0xff] %v446_v58  ;;  %v452_v61 = vld [vmem:[%s1139_s26 + $0xf88] sm:$0xff]  ;;  %449 = vst [vmem:[%s1144_s27 + $0x3d8] sm:$0xff] %v448_v59  ;;  %v454_v62 = vld [vmem:[%s1139_s26 + $0xf90] sm:$0xff] }
  0x4e   : > { %451 = vst [vmem:[%s1144_s27 + $0x3e0] sm:$0xff] %v450_v60  ;;  %453 = vst [vmem:[%s1144_s27 + $0x3e8] sm:$0xff] %v452_v61  ;;  %v456_v63 = vld [vmem:[%s1139_s26 + $0xf98] sm:$0xff] }
  0x4f   : > { %455 = vst [vmem:[%s1144_s27 + $0x3f0] sm:$0xff] %v454_v62  ;;  %457 = vst [vmem:[%s1144_s27 + $0x3f8] sm:$0xff] %v456_v63 }
  0x50 PF: > { %p986_p6 = scmp.ge.s32.totalorder %s1073_s16, 1  ;;  %p462_p7 = scmp.lt.s32.totalorder %s1073_s16, 5 }
  0x52   : > { %p463_p8 = pnand %p986_p6, %p462_p7 }
  0x53   : > { %s469_s28 = sand.u32 (!%p463_p8), 1, %s1057_s12   ;;  %s988_s10 = sshll.u32 (!%p463_p8), %s1065_s14, 2 }
  0x54   : > { %466 = sbr.rel (%p463_p8) target bundleno = 354 (0x162), region = 51  ;;  %s987_s6 = sshll.u32 (!%p463_p8), %s469_s28, 10 }
  0x55   : > { %s1408_s7 = scalar_lea.vmem (!%p463_p8), [#allocation3], %s987_s6  ;;  %p528_p9 = scmp.lt.s32.totalorder (!%p463_p8), %s988_s10, 15 }
  0x59   : > { %v548_v0 = vld [vmem:[%s1560_s0 + $0x8] sm:$0xff]  ;;  %v834_v1 = vld [vmem:[%s1562_s2] sm:$0xff]  ;;  %v1075_v2 = vmov 0   ;;  %v612_v4 = vld [vmem:[%s1408_s7 + $0x1f8] sm:$0xff]  ;;  %s1571_s10 = smov (!%p528_p9, %s988_s10), 15 }
  0x5a   : > { %741 = vmatprep.mubr.f32.mxu0 %v548_v0  ;;  %812 = vmatprep.mubr.f32.mxu1 %v548_v0  ;;  %v610_v3 = vld [vmem:[%s1408_s7 + $0x1e8] sm:$0xff]  ;;  %v609_v5 = vld [vmem:[%s1408_s7 + $0x1e0] sm:$0xff]  ;;  %v611_v6 = vld [vmem:[%s1408_s7 + $0x1f0] sm:$0xff]  ;;  %s989_s11 = sshll.u32 %s1571_s10, 3 }
  0x5b   : > { %1034 = vset.pattern.permute.xlu0 %v1075_v2  ;;  %677 = vmatprep.subr.mxu0 %v610_v3  ;;  %v606_v7 = vld [vmem:[%s1408_s7 + $0x1c8] sm:$0xff]  ;;  %v608_v8 = vld [vmem:[%s1408_s7 + $0x1d8] sm:$0xff]  ;;  %v605_v9 = vld [vmem:[%s1408_s7 + $0x1c0] sm:$0xff]  ;;  %s533_s19 = scalar_lea.vmem %s1563_s3, %s989_s11 }
  0x5c   : > { %837 = vperm.xlu0 %1034, %v834_v1   ;;  %748 = vmatprep.subr.mxu1 %v612_v4  ;;  %v607_v10 = vld [vmem:[%s1408_s7 + $0x1d0] sm:$0xff]  ;;  %v602_v11 = vld [vmem:[%s1408_s7 + $0x1a8] sm:$0xff]  ;;  %v604_v12 = vld [vmem:[%s1408_s7 + $0x1b8] sm:$0xff] }
  0x5d   : > { %678 = vmatpush1.msra.mxu0 %v609_v5  ;;  %749 = vmatpush1.msra.mxu1 %v611_v6  ;;  %v601_v13 = vld [vmem:[%s1408_s7 + $0x1a0] sm:$0xff]  ;;  %v603_v14 = vld [vmem:[%s1408_s7 + $0x1b0] sm:$0xff]  ;;  %v598_v15 = vld [vmem:[%s1408_s7 + $0x188] sm:$0xff] }
  0x5e   : > { %679 = vmatprep.subr.mxu0 %v606_v7  ;;  %750 = vmatprep.subr.mxu1 %v608_v8  ;;  %v600_v16 = vld [vmem:[%s1408_s7 + $0x198] sm:$0xff]  ;;  %v597_v17 = vld [vmem:[%s1408_s7 + $0x180] sm:$0xff]  ;;  %v599_v18 = vld [vmem:[%s1408_s7 + $0x190] sm:$0xff] }
  0x5f   : > { %680 = vmatpush1.msra.mxu0 %v605_v9  ;;  %751 = vmatpush1.msra.mxu1 %v607_v10  ;;  %v594_v19 = vld [vmem:[%s1408_s7 + $0x168] sm:$0xff]  ;;  %v596_v20 = vld [vmem:[%s1408_s7 + $0x178] sm:$0xff]  ;;  %v593_v21 = vld [vmem:[%s1408_s7 + $0x160] sm:$0xff] }
  0x60   : > { %681 = vmatprep.subr.mxu0 %v602_v11  ;;  %752 = vmatprep.subr.mxu1 %v604_v12  ;;  %v595_v22 = vld [vmem:[%s1408_s7 + $0x170] sm:$0xff]  ;;  %v590_v23 = vld [vmem:[%s1408_s7 + $0x148] sm:$0xff]  ;;  %v592_v24 = vld [vmem:[%s1408_s7 + $0x158] sm:$0xff] }
  0x61   : > { %682 = vmatpush1.msra.mxu0 %v601_v13  ;;  %753 = vmatpush1.msra.mxu1 %v603_v14  ;;  %v589_v25 = vld [vmem:[%s1408_s7 + $0x140] sm:$0xff]  ;;  %v591_v26 = vld [vmem:[%s1408_s7 + $0x150] sm:$0xff]  ;;  %v586_v27 = vld [vmem:[%s1408_s7 + $0x128] sm:$0xff] }
  0x62   : > { %683 = vmatprep.subr.mxu0 %v598_v15  ;;  %754 = vmatprep.subr.mxu1 %v600_v16  ;;  %v588_v28 = vld [vmem:[%s1408_s7 + $0x138] sm:$0xff]  ;;  %v585_v29 = vld [vmem:[%s1408_s7 + $0x120] sm:$0xff]  ;;  %v587_v30 = vld [vmem:[%s1408_s7 + $0x130] sm:$0xff] }
  0x63   : > { %684 = vmatpush1.msra.mxu0 %v597_v17  ;;  %755 = vmatpush1.msra.mxu1 %v599_v18  ;;  %v582_v31 = vld [vmem:[%s1408_s7 + $0x108] sm:$0xff]  ;;  %v584_v32 = vld [vmem:[%s1408_s7 + $0x118] sm:$0xff]  ;;  %v581_v33 = vld [vmem:[%s1408_s7 + $0x100] sm:$0xff] }
  0x64   : > { %685 = vmatprep.subr.mxu0 %v594_v19  ;;  %756 = vmatprep.subr.mxu1 %v596_v20  ;;  %v583_v34 = vld [vmem:[%s1408_s7 + $0x110] sm:$0xff]  ;;  %v578_v35 = vld [vmem:[%s1408_s7 + $0xe8] sm:$0xff]  ;;  %v580_v36 = vld [vmem:[%s1408_s7 + $0xf8] sm:$0xff] }
  0x65   : > { %686 = vmatpush1.msra.mxu0 %v593_v21  ;;  %757 = vmatpush1.msra.mxu1 %v595_v22  ;;  %v577_v37 = vld [vmem:[%s1408_s7 + $0xe0] sm:$0xff]  ;;  %v579_v38 = vld [vmem:[%s1408_s7 + $0xf0] sm:$0xff]  ;;  %v574_v39 = vld [vmem:[%s1408_s7 + $0xc8] sm:$0xff] }
  0x66   : > { %687 = vmatprep.subr.mxu0 %v590_v23  ;;  %758 = vmatprep.subr.mxu1 %v592_v24  ;;  %v576_v40 = vld [vmem:[%s1408_s7 + $0xd8] sm:$0xff]  ;;  %v573_v41 = vld [vmem:[%s1408_s7 + $0xc0] sm:$0xff]  ;;  %v575_v42 = vld [vmem:[%s1408_s7 + $0xd0] sm:$0xff] }
  0x67   : > { %688 = vmatpush1.msra.mxu0 %v589_v25  ;;  %759 = vmatpush1.msra.mxu1 %v591_v26  ;;  %v570_v43 = vld [vmem:[%s1408_s7 + $0xa8] sm:$0xff]  ;;  %v572_v44 = vld [vmem:[%s1408_s7 + $0xb8] sm:$0xff]  ;;  %v569_v45 = vld [vmem:[%s1408_s7 + $0xa0] sm:$0xff] }
  0x68   : > { %689 = vmatprep.subr.mxu0 %v586_v27  ;;  %760 = vmatprep.subr.mxu1 %v588_v28  ;;  %v571_v46 = vld [vmem:[%s1408_s7 + $0xb0] sm:$0xff]  ;;  %v566_v47 = vld [vmem:[%s1408_s7 + $0x88] sm:$0xff]  ;;  %v568_v48 = vld [vmem:[%s1408_s7 + $0x98] sm:$0xff] }
  0x69   : > { %690 = vmatpush1.msra.mxu0 %v585_v29  ;;  %761 = vmatpush1.msra.mxu1 %v587_v30  ;;  %v565_v49 = vld [vmem:[%s1408_s7 + $0x80] sm:$0xff]  ;;  %v567_v50 = vld [vmem:[%s1408_s7 + $0x90] sm:$0xff]  ;;  %v562_v51 = vld [vmem:[%s1408_s7 + $0x68] sm:$0xff] }
  0x6a   : > { %691 = vmatprep.subr.mxu0 %v582_v31  ;;  %762 = vmatprep.subr.mxu1 %v584_v32  ;;  %v564_v52 = vld [vmem:[%s1408_s7 + $0x78] sm:$0xff]  ;;  %v561_v53 = vld [vmem:[%s1408_s7 + $0x60] sm:$0xff]  ;;  %v563_v54 = vld [vmem:[%s1408_s7 + $0x70] sm:$0xff] }
  0x6b   : > { %692 = vmatpush1.msra.mxu0 %v581_v33  ;;  %763 = vmatpush1.msra.mxu1 %v583_v34  ;;  %v558_v55 = vld [vmem:[%s1408_s7 + $0x48] sm:$0xff]  ;;  %v560_v56 = vld [vmem:[%s1408_s7 + $0x58] sm:$0xff]  ;;  %v557_v57 = vld [vmem:[%s1408_s7 + $0x40] sm:$0xff] }
  0x6c   : > { %693 = vmatprep.subr.mxu0 %v578_v35  ;;  %764 = vmatprep.subr.mxu1 %v580_v36  ;;  %v559_v58 = vld [vmem:[%s1408_s7 + $0x50] sm:$0xff]  ;;  %v554_v59 = vld [vmem:[%s1408_s7 + $0x28] sm:$0xff]  ;;  %v556_v60 = vld [vmem:[%s1408_s7 + $0x38] sm:$0xff] }
  0x6d   : > { %694 = vmatpush1.msra.mxu0 %v577_v37  ;;  %765 = vmatpush1.msra.mxu1 %v579_v38  ;;  %v553_v61 = vld [vmem:[%s1408_s7 + $0x20] sm:$0xff]  ;;  %v555_v62 = vld [vmem:[%s1408_s7 + $0x30] sm:$0xff]  ;;  %v550_v63 = vld [vmem:[%s1408_s7 + $0x8] sm:$0xff] }
  0x6e   : > { %695 = vmatprep.subr.mxu0 %v574_v39  ;;  %766 = vmatprep.subr.mxu1 %v576_v40  ;;  %v552_v0 = vld [vmem:[%s1408_s7 + $0x18] sm:$0xff]  ;;  %v549_v1 = vld [vmem:[%s1408_s7] sm:$0xff]  ;;  %v551_v2 = vld [vmem:[%s1408_s7 + $0x10] sm:$0xff] }
  0x6f   : > { %696 = vmatpush1.msra.mxu0 %v573_v41  ;;  %767 = vmatpush1.msra.mxu1 %v575_v42  ;;  %v674_v3 = vld [vmem:[%s1408_s7 + $0x3e8] sm:$0xff]  ;;  %v676_v4 = vld [vmem:[%s1408_s7 + $0x3f8] sm:$0xff]  ;;  %v673_v5 = vld [vmem:[%s1408_s7 + $0x3e0] sm:$0xff] }
  0x70   : > { %697 = vmatprep.subr.mxu0 %v570_v43  ;;  %768 = vmatprep.subr.mxu1 %v572_v44  ;;  %v675_v6 = vld [vmem:[%s1408_s7 + $0x3f0] sm:$0xff]  ;;  %v670_v7 = vld [vmem:[%s1408_s7 + $0x3c8] sm:$0xff]  ;;  %v672_v8 = vld [vmem:[%s1408_s7 + $0x3d8] sm:$0xff] }
  0x71   : > { %698 = vmatpush1.msra.mxu0 %v569_v45  ;;  %769 = vmatpush1.msra.mxu1 %v571_v46  ;;  %v669_v9 = vld [vmem:[%s1408_s7 + $0x3c0] sm:$0xff]  ;;  %v671_v10 = vld [vmem:[%s1408_s7 + $0x3d0] sm:$0xff]  ;;  %v666_v11 = vld [vmem:[%s1408_s7 + $0x3a8] sm:$0xff] }
  0x72   : > { %699 = vmatprep.subr.mxu0 %v566_v47  ;;  %770 = vmatprep.subr.mxu1 %v568_v48  ;;  %v668_v12 = vld [vmem:[%s1408_s7 + $0x3b8] sm:$0xff]  ;;  %v665_v13 = vld [vmem:[%s1408_s7 + $0x3a0] sm:$0xff]  ;;  %v667_v14 = vld [vmem:[%s1408_s7 + $0x3b0] sm:$0xff] }
  0x73   : > { %700 = vmatpush1.msra.mxu0 %v565_v49  ;;  %771 = vmatpush1.msra.mxu1 %v567_v50  ;;  %v662_v15 = vld [vmem:[%s1408_s7 + $0x388] sm:$0xff]  ;;  %v664_v16 = vld [vmem:[%s1408_s7 + $0x398] sm:$0xff]  ;;  %v661_v17 = vld [vmem:[%s1408_s7 + $0x380] sm:$0xff] }
  0x74   : > { %701 = vmatprep.subr.mxu0 %v562_v51  ;;  %772 = vmatprep.subr.mxu1 %v564_v52  ;;  %v663_v18 = vld [vmem:[%s1408_s7 + $0x390] sm:$0xff]  ;;  %v658_v19 = vld [vmem:[%s1408_s7 + $0x368] sm:$0xff]  ;;  %v660_v20 = vld [vmem:[%s1408_s7 + $0x378] sm:$0xff] }
  0x75   : > { %702 = vmatpush1.msra.mxu0 %v561_v53  ;;  %773 = vmatpush1.msra.mxu1 %v563_v54  ;;  %v657_v21 = vld [vmem:[%s1408_s7 + $0x360] sm:$0xff]  ;;  %v659_v22 = vld [vmem:[%s1408_s7 + $0x370] sm:$0xff]  ;;  %v654_v23 = vld [vmem:[%s1408_s7 + $0x348] sm:$0xff] }
  0x76   : > { %703 = vmatprep.subr.mxu0 %v558_v55  ;;  %774 = vmatprep.subr.mxu1 %v560_v56  ;;  %v656_v24 = vld [vmem:[%s1408_s7 + $0x358] sm:$0xff]  ;;  %v653_v25 = vld [vmem:[%s1408_s7 + $0x340] sm:$0xff]  ;;  %v655_v26 = vld [vmem:[%s1408_s7 + $0x350] sm:$0xff] }
  0x77   : > { %704 = vmatpush1.msra.mxu0 %v557_v57  ;;  %775 = vmatpush1.msra.mxu1 %v559_v58  ;;  %v650_v27 = vld [vmem:[%s1408_s7 + $0x328] sm:$0xff]  ;;  %v652_v28 = vld [vmem:[%s1408_s7 + $0x338] sm:$0xff]  ;;  %v649_v29 = vld [vmem:[%s1408_s7 + $0x320] sm:$0xff] }
  0x78   : > { %705 = vmatprep.subr.mxu0 %v554_v59  ;;  %776 = vmatprep.subr.mxu1 %v556_v60  ;;  %v651_v30 = vld [vmem:[%s1408_s7 + $0x330] sm:$0xff]  ;;  %v646_v31 = vld [vmem:[%s1408_s7 + $0x308] sm:$0xff]  ;;  %v648_v32 = vld [vmem:[%s1408_s7 + $0x318] sm:$0xff] }
  0x79   : > { %706 = vmatpush1.msra.mxu0 %v553_v61  ;;  %777 = vmatpush1.msra.mxu1 %v555_v62  ;;  %v645_v33 = vld [vmem:[%s1408_s7 + $0x300] sm:$0xff]  ;;  %v647_v34 = vld [vmem:[%s1408_s7 + $0x310] sm:$0xff]  ;;  %v642_v35 = vld [vmem:[%s1408_s7 + $0x2e8] sm:$0xff] }
  0x7a   : > { %707 = vmatprep.subr.mxu0 %v550_v63  ;;  %778 = vmatprep.subr.mxu1 %v552_v0  ;;  %v644_v36 = vld [vmem:[%s1408_s7 + $0x2f8] sm:$0xff]  ;;  %v641_v37 = vld [vmem:[%s1408_s7 + $0x2e0] sm:$0xff]  ;;  %v643_v38 = vld [vmem:[%s1408_s7 + $0x2f0] sm:$0xff] }
  0x7b   : > { %708 = vmatpush1.msra.mxu0 %v549_v1  ;;  %779 = vmatpush1.msra.mxu1 %v551_v2  ;;  %v638_v39 = vld [vmem:[%s1408_s7 + $0x2c8] sm:$0xff]  ;;  %v640_v40 = vld [vmem:[%s1408_s7 + $0x2d8] sm:$0xff]  ;;  %v637_v41 = vld [vmem:[%s1408_s7 + $0x2c0] sm:$0xff] }
  0x7c   : > { %709 = vmatprep.subr.mxu0 %v674_v3  ;;  %780 = vmatprep.subr.mxu1 %v676_v4  ;;  %v639_v42 = vld [vmem:[%s1408_s7 + $0x2d0] sm:$0xff]  ;;  %v634_v43 = vld [vmem:[%s1408_s7 + $0x2a8] sm:$0xff]  ;;  %v636_v44 = vld [vmem:[%s1408_s7 + $0x2b8] sm:$0xff] }
  0x7d   : > { %710 = vmatpush2.msra.mxu0 %v673_v5  ;;  %781 = vmatpush2.msra.mxu1 %v675_v6  ;;  %v633_v45 = vld [vmem:[%s1408_s7 + $0x2a0] sm:$0xff]  ;;  %v635_v46 = vld [vmem:[%s1408_s7 + $0x2b0] sm:$0xff]  ;;  %v630_v47 = vld [vmem:[%s1408_s7 + $0x288] sm:$0xff] }
  0x7e   : > { %711 = vmatprep.subr.mxu0 %v670_v7  ;;  %782 = vmatprep.subr.mxu1 %v672_v8  ;;  %v632_v48 = vld [vmem:[%s1408_s7 + $0x298] sm:$0xff]  ;;  %v629_v49 = vld [vmem:[%s1408_s7 + $0x280] sm:$0xff]  ;;  %v631_v50 = vld [vmem:[%s1408_s7 + $0x290] sm:$0xff] }
  0x7f   : > { %712 = vmatpush2.msra.mxu0 %v669_v9  ;;  %783 = vmatpush2.msra.mxu1 %v671_v10  ;;  %v626_v51 = vld [vmem:[%s1408_s7 + $0x268] sm:$0xff]  ;;  %v628_v52 = vld [vmem:[%s1408_s7 + $0x278] sm:$0xff]  ;;  %v625_v53 = vld [vmem:[%s1408_s7 + $0x260] sm:$0xff] }
  0x80   : > { %713 = vmatprep.subr.mxu0 %v666_v11  ;;  %784 = vmatprep.subr.mxu1 %v668_v12  ;;  %v627_v54 = vld [vmem:[%s1408_s7 + $0x270] sm:$0xff]  ;;  %v622_v55 = vld [vmem:[%s1408_s7 + $0x248] sm:$0xff]  ;;  %v624_v56 = vld [vmem:[%s1408_s7 + $0x258] sm:$0xff] }
  0x81   : > { %714 = vmatpush2.msra.mxu0 %v665_v13  ;;  %785 = vmatpush2.msra.mxu1 %v667_v14  ;;  %v621_v57 = vld [vmem:[%s1408_s7 + $0x240] sm:$0xff]  ;;  %v623_v58 = vld [vmem:[%s1408_s7 + $0x250] sm:$0xff]  ;;  %v618_v59 = vld [vmem:[%s1408_s7 + $0x228] sm:$0xff] }
  0x82   : > { %715 = vmatprep.subr.mxu0 %v662_v15  ;;  %786 = vmatprep.subr.mxu1 %v664_v16  ;;  %v620_v60 = vld [vmem:[%s1408_s7 + $0x238] sm:$0xff]  ;;  %v617_v61 = vld [vmem:[%s1408_s7 + $0x220] sm:$0xff]  ;;  %v619_v62 = vld [vmem:[%s1408_s7 + $0x230] sm:$0xff] }
  0x83   : > { %716 = vmatpush2.msra.mxu0 %v661_v17  ;;  %787 = vmatpush2.msra.mxu1 %v663_v18  ;;  %v614_v63 = vld [vmem:[%s1408_s7 + $0x208] sm:$0xff]  ;;  %v616_v0 = vld [vmem:[%s1408_s7 + $0x218] sm:$0xff]  ;;  %v613_v1 = vld [vmem:[%s1408_s7 + $0x200] sm:$0xff] }
  0x84   : > { %717 = vmatprep.subr.mxu0 %v658_v19  ;;  %788 = vmatprep.subr.mxu1 %v660_v20  ;;  %v615_v2 = vld [vmem:[%s1408_s7 + $0x210] sm:$0xff]  ;;  %v547_v3 = vld [vmem:[%s1560_s0] sm:$0xff] }
  0x85   : > { %718 = vmatpush2.msra.mxu0 %v657_v21  ;;  %789 = vmatpush2.msra.mxu1 %v659_v22 }
  0x86   : > { %719 = vmatprep.subr.mxu0 %v654_v23  ;;  %790 = vmatprep.subr.mxu1 %v656_v24 }
  0x87   : > { %720 = vmatpush2.msra.mxu0 %v653_v25  ;;  %791 = vmatpush2.msra.mxu1 %v655_v26 }
  0x88   : > { %721 = vmatprep.subr.mxu0 %v650_v27  ;;  %792 = vmatprep.subr.mxu1 %v652_v28 }
  0x89   : > { %722 = vmatpush2.msra.mxu0 %v649_v29  ;;  %793 = vmatpush2.msra.mxu1 %v651_v30 }
  0x8a   : > { %723 = vmatprep.subr.mxu0 %v646_v31  ;;  %794 = vmatprep.subr.mxu1 %v648_v32 }
  0x8b   : > { %724 = vmatpush2.msra.mxu0 %v645_v33  ;;  %795 = vmatpush2.msra.mxu1 %v647_v34 }
  0x8c   : > { %725 = vmatprep.subr.mxu0 %v642_v35  ;;  %796 = vmatprep.subr.mxu1 %v644_v36 }
  0x8d   : > { %726 = vmatpush2.msra.mxu0 %v641_v37  ;;  %797 = vmatpush2.msra.mxu1 %v643_v38 }
  0x8e   : > { %727 = vmatprep.subr.mxu0 %v638_v39  ;;  %798 = vmatprep.subr.mxu1 %v640_v40 }
  0x8f   : > { %728 = vmatpush2.msra.mxu0 %v637_v41  ;;  %799 = vmatpush2.msra.mxu1 %v639_v42 }
  0x90   : > { %729 = vmatprep.subr.mxu0 %v634_v43  ;;  %800 = vmatprep.subr.mxu1 %v636_v44 }
  0x91   : > { %730 = vmatpush2.msra.mxu0 %v633_v45  ;;  %801 = vmatpush2.msra.mxu1 %v635_v46 }
  0x92   : > { %731 = vmatprep.subr.mxu0 %v630_v47  ;;  %802 = vmatprep.subr.mxu1 %v632_v48 }
  0x93   : > { %732 = vmatpush2.msra.mxu0 %v629_v49  ;;  %803 = vmatpush2.msra.mxu1 %v631_v50 }
  0x94   : > { %733 = vmatprep.subr.mxu0 %v626_v51  ;;  %804 = vmatprep.subr.mxu1 %v628_v52 }
  0x95   : > { %734 = vmatpush2.msra.mxu0 %v625_v53  ;;  %805 = vmatpush2.msra.mxu1 %v627_v54 }
  0x96   : > { %735 = vmatprep.subr.mxu0 %v622_v55  ;;  %806 = vmatprep.subr.mxu1 %v624_v56 }
  0x97   : > { %736 = vmatpush2.msra.mxu0 %v621_v57  ;;  %807 = vmatpush2.msra.mxu1 %v623_v58 }
  0x98   : > { %737 = vmatprep.subr.mxu0 %v618_v59  ;;  %808 = vmatprep.subr.mxu1 %v620_v60 }
  0x99   : > { %738 = vmatpush2.msra.mxu0 %v617_v61  ;;  %809 = vmatpush2.msra.mxu1 %v619_v62 }
  0x9a   : > { %739 = vmatprep.subr.mxu0 %v614_v63  ;;  %810 = vmatprep.subr.mxu1 %v616_v0 }
  0x9b   : > { %740 = vmatpush2.msra.mxu0 %v613_v1  ;;  %811 = vmatpush2.msra.mxu1 %v615_v2 }
  0x9c   : > { %742 = vmatmul.mubr.f32.vlgmr.msra.gmra.mxu0 %v547_v3  ;;  %813 = vmatmul.mubr.f32.vlgmr.msra.gmra.mxu1 %v547_v3 }
  0xd7   : > { %v838_v4 = vpop.permute.xlu0 %837 }
 0x15c   : > { %v743_v5 = vpop.f32.mrf.mxu0  ;;  %v814_v6 = vpop.f32.mrf.mxu1 }
 0x15d   : > { %v840_v7 = vadd.f32 %v838_v4, %v743_v5  ;;  %v842_v8 = vadd.f32 %v838_v4, %v814_v6 }
 0x15e   : > { %v745_v9 = vpop.f32.mrf.mxu0  ;;  %v816_v10 = vpop.f32.mrf.mxu1 }
 0x15f   : > { %844 = vst [vmem:[%s533_s19] sm:$0xff] %v840_v7  ;;  %846 = vst [vmem:[%s533_s19 + $0x10] sm:$0xff] %v842_v8  ;;  %v841_v11 = vadd.f32 %v838_v4, %v745_v9  ;;  %v843_v12 = vadd.f32 %v838_v4, %v816_v10 }
 0x161   : > { %845 = vst [vmem:[%s533_s19 + $0x8] sm:$0xff] %v841_v11  ;;  %847 = vst [vmem:[%s533_s19 + $0x18] sm:$0xff] %v843_v12 }
 0x162 PF: > { %s13_s16 = sadd.s32 1, %s1073_s16   ;;  %s1564_s12 = smov %s1061_s13 }
 0x163   : > { %p10_p10 = scmp.ge.s32.totalorder %s13_s16, 6   ;;  %s1565_s13 = smov %s1131_s20 }
 0x164   : > { %s1566_s14 = smov %s1069_s15  ;;  %s1567_s15 = smov %s1569_s17 }
 0x165   :  { %12 = sbr.rel (!%p10_p10) target bundleno = 3 (0x3), region = 104 }

// kernel: forward.13
= control target key start
LH: loop header
LB: loop body
LE: loop exit
PB: predicated region body
PF: predicated region fallthrough
CT: control target
= control target key end

     0   :  { %s376_s0 = inlined_call_operand.vmem [shape: f32[16,1024], index: 0, kind: input, shape index: {}]   ;;  %s377_s1 = inlined_call_operand.vmem [shape: f32[16,1024], index: 1, kind: output, shape index: {}]  }
   0x1   :  { %v175_v0 = vld [vmem:[%s376_s0] sm:$0xff]  ;;  %v180_v1 = vld [vmem:[%s376_s0 + $0x8] sm:$0xff]  ;;  %v185_v2 = vld [vmem:[%s376_s0 + $0x10] sm:$0xff] }
   0x2   :  { %v190_v3 = vld [vmem:[%s376_s0 + $0x18] sm:$0xff]  ;;  %v24_v4 = vadd.f32 %v180_v1, %v175_v0  ;;  %v42_v5 = vmul.f32 %v175_v0, %v175_v0  ;;  %v43_v6 = vmul.f32 %v180_v1, %v180_v1  ;;  %v44_v7 = vmul.f32 %v185_v2, %v185_v2  ;;  %v203_v8 = vld [vmem:[%s376_s0 + $0x20] sm:$0xff]  ;;  %v213_v10 = vld [vmem:[%s376_s0 + $0x28] sm:$0xff] }
   0x3   :  { %v208_v9 = vld [vmem:[%s376_s0 + $0x40] sm:$0xff]  ;;  %v45_v12 = vmul.f32 %v190_v3, %v190_v3  ;;  %v221_v14 = vld [vmem:[%s376_s0 + $0x48] sm:$0xff]  ;;  %v226_v15 = vld [vmem:[%s376_s0 + $0x50] sm:$0xff]  ;;  %v46_v22 = vmul.f32 %v203_v8, %v203_v8  ;;  %v47_v25 = vmul.f32 %v213_v10, %v213_v10 }
   0x4   :  { %v25_v11 = vadd.f32 %v24_v4, %v185_v2  ;;  %v58_v13 = vadd.f32 %v43_v6, %v42_v5  ;;  %v231_v16 = vld [vmem:[%s376_s0 + $0x58] sm:$0xff]  ;;  %v33_v17 = vadd.f32 %v221_v14, %v208_v9  ;;  %v50_v18 = vmul.f32 %v208_v9, %v208_v9  ;;  %v242_v20 = vld [vmem:[%s376_s0 + $0x30] sm:$0xff]  ;;  %v254_v26 = vld [vmem:[%s376_s0 + $0x60] sm:$0xff] }
   0x5   :  { %v51_v19 = vmul.f32 %v221_v14, %v221_v14  ;;  %v52_v24 = vmul.f32 %v226_v15, %v226_v15  ;;  %v260_v28 = vld [vmem:[%s376_s0 + $0x38] sm:$0xff]  ;;  %v53_v31 = vmul.f32 %v231_v16, %v231_v16  ;;  %v48_v33 = vmul.f32 %v242_v20, %v242_v20  ;;  %v270_v34 = vld [vmem:[%s376_s0 + $0x68] sm:$0xff]  ;;  %v281_v41 = vld [vmem:[%s376_s0 + $0x70] sm:$0xff] }
   0x6   :  { %v26_v21 = vadd.f32 %v25_v11, %v190_v3  ;;  %v59_v23 = vadd.f32 %v58_v13, %v44_v7  ;;  %v34_v27 = vadd.f32 %v33_v17, %v226_v15  ;;  %v54_v38 = vmul.f32 %v254_v26, %v254_v26  ;;  %v290_v47 = vld [vmem:[%s376_s0 + $0x78] sm:$0xff] }
   0x7   :  { %v67_v32 = vadd.f32 %v51_v19, %v50_v18  ;;  %v49_v40 = vmul.f32 %v260_v28, %v260_v28  ;;  %v55_v45 = vmul.f32 %v270_v34, %v270_v34  ;;  %v56_v51 = vmul.f32 %v281_v41, %v281_v41 }
   0x8   :  { %v27_v29 = vadd.f32 %v26_v21, %v203_v8  ;;  %v60_v30 = vadd.f32 %v59_v23, %v45_v12  ;;  %v35_v35 = vadd.f32 %v34_v27, %v231_v16  ;;  %v57_v55 = vmul.f32 %v290_v47, %v290_v47 }
   0x9   :  { %v68_v39 = vadd.f32 %v67_v32, %v52_v24 }
   0xa   :  { %v28_v36 = vadd.f32 %v27_v29, %v213_v10  ;;  %v61_v37 = vadd.f32 %v60_v30, %v46_v22  ;;  %v36_v42 = vadd.f32 %v35_v35, %v254_v26 }
   0xb   :  { %v69_v46 = vadd.f32 %v68_v39, %v53_v31 }
   0xc   :  { %v29_v43 = vadd.f32 %v28_v36, %v242_v20  ;;  %v62_v44 = vadd.f32 %v61_v37, %v47_v25  ;;  %v37_v48 = vadd.f32 %v36_v42, %v270_v34 }
   0xd   :  { %v70_v52 = vadd.f32 %v69_v46, %v54_v38 }
   0xe   :  { %v30_v49 = vadd.f32 %v29_v43, %v260_v28  ;;  %v63_v50 = vadd.f32 %v62_v44, %v48_v33  ;;  %v38_v53 = vadd.f32 %v37_v48, %v281_v41 }
   0xf   :  { %v71_v56 = vadd.f32 %v70_v52, %v55_v45 }
  0x10   :  { %31 = vadd.xlane.f32.xlu0 %v30_v49  ;;  %v64_v54 = vadd.f32 %v63_v50, %v49_v40  ;;  %v39_v57 = vadd.f32 %v38_v53, %v290_v47 }
  0x11   :  { %v72_v58 = vadd.f32 %v71_v56, %v56_v51 }
  0x12   :  { %65 = vadd.xlane.f32.xlu1 %v64_v54 }
  0x13   :  { %v73_v59 = vadd.f32 %v72_v58, %v57_v55 }
  0x14   :  { %40 = vadd.xlane.f32.xlu0 %v39_v57 }
  0x16   :  { %74 = vadd.xlane.f32.xlu1 %v73_v59 }
  0x99   :  { %v32_v60 = vpop.xlane.xlu0 %31 }
  0x9a   :  { %v76_v61 = vmul.f32 0.0009765625, %v32_v60 }
  0x9b   :  { %v66_v62 = vpop.xlane.xlu1 %65 }
  0x9c   :  { %v78_v4 = vmul.f32 0.0009765625, %v66_v62  ;;  %v80_v5 = vmul.f32 %v76_v61, %v76_v61  ;;  %v86_v23 = vsub.f32 %v175_v0, %v76_v61  ;;  %v87_v24 = vsub.f32 %v180_v1, %v76_v61 }
  0x9d   :  { %v41_v63 = vpop.xlane.xlu0 %40  ;;  %v88_v25 = vsub.f32 %v185_v2, %v76_v61  ;;  %v89_v27 = vsub.f32 %v190_v3, %v76_v61  ;;  %v90_v29 = vsub.f32 %v203_v8, %v76_v61  ;;  %v91_v30 = vsub.f32 %v213_v10, %v76_v61 }
  0x9e   :  { %v300_v6 = vmul.f32 0.0009765625, %v41_v63  ;;  %v82_v11 = vsub.f32 %v78_v4, %v80_v5  ;;  %v92_v31 = vsub.f32 %v242_v20, %v76_v61  ;;  %v93_v32 = vsub.f32 %v260_v28, %v76_v61 }
  0x9f   :  { %v75_v7 = vpop.xlane.xlu1 %74 }
  0xa0   :  { %v84_v12 = vmax.f32 %v82_v11, 0.0  ;;  %v79_v13 = vmul.f32 0.0009765625, %v75_v7  ;;  %v81_v17 = vmul.f32 %v300_v6, %v300_v6  ;;  %v94_v33 = vsub.f32 %v208_v9, %v300_v6 }
  0xa1   :  { %v95_v0 = vsub.f32 %v221_v14, %v300_v6  ;;  %v96_v1 = vsub.f32 %v226_v15, %v300_v6  ;;  %v97_v2 = vsub.f32 %v231_v16, %v300_v6  ;;  %v98_v8 = vsub.f32 %v254_v26, %v300_v6 }
  0xa2   :  { %v102_v18 = vadd.f32 1e-05, %v84_v12  ;;  %v83_v19 = vsub.f32 %v79_v13, %v81_v17  ;;  %v99_v10 = vsub.f32 %v270_v34, %v300_v6  ;;  %v100_v20 = vsub.f32 %v281_v41, %v300_v6 }
  0xa3   :  { %v101_v9 = vsub.f32 %v290_v47, %v300_v6 }
  0xa4   :  { %158 = vrsqrt.f32 %v102_v18  ;;  %v85_v21 = vmax.f32 %v83_v19, 0.0 }
  0xa6   :  { %v103_v22 = vadd.f32 1e-05, %v85_v21 }
  0xa8   :  { %160 = vrsqrt.f32 %v103_v22 }
  0xb1   :  { %v159_v3 = vpop.eup %158 }
  0xb2   :  { %v106_v14 = vmul.f32 %v159_v3, %v86_v23  ;;  %v107_v28 = vmul.f32 %v159_v3, %v87_v24  ;;  %v108_v35 = vmul.f32 %v159_v3, %v88_v25  ;;  %v109_v15 = vmul.f32 %v159_v3, %v89_v27 }
  0xb3   :  { %v110_v36 = vmul.f32 %v159_v3, %v90_v29  ;;  %v111_v37 = vmul.f32 %v159_v3, %v91_v30  ;;  %v112_v16 = vmul.f32 %v159_v3, %v92_v31  ;;  %v113_v38 = vmul.f32 %v159_v3, %v93_v32 }
  0xb4   :  { %v122_v39 = vmax.f32 %v106_v14, 0.0  ;;  %v123_v40 = vmax.f32 %v107_v28, 0.0  ;;  %v124_v26 = vmax.f32 %v108_v35, 0.0  ;;  %v125_v42 = vmax.f32 %v109_v15, 0.0 }
  0xb5   :  { %v161_v43 = vpop.eup %160  ;;  %v126_v34 = vmax.f32 %v110_v36, 0.0  ;;  %v127_v44 = vmax.f32 %v111_v37, 0.0  ;;  %v128_v45 = vmax.f32 %v112_v16, 0.0  ;;  %v129_v41 = vmax.f32 %v113_v38, 0.0 }
  0xb6   :  { %138 = vst [vmem:[%s377_s1] sm:$0xff] %v122_v39  ;;  %139 = vst [vmem:[%s377_s1 + $0x8] sm:$0xff] %v123_v40  ;;  %v114_v46 = vmul.f32 %v161_v43, %v94_v33  ;;  %v115_v47 = vmul.f32 %v161_v43, %v95_v0  ;;  %v116_v48 = vmul.f32 %v161_v43, %v96_v1 }
  0xb7   :  { %140 = vst [vmem:[%s377_s1 + $0x10] sm:$0xff] %v124_v26  ;;  %141 = vst [vmem:[%s377_s1 + $0x18] sm:$0xff] %v125_v42  ;;  %v117_v49 = vmul.f32 %v161_v43, %v97_v2  ;;  %v118_v50 = vmul.f32 %v161_v43, %v98_v8  ;;  %v119_v51 = vmul.f32 %v161_v43, %v99_v10 }
  0xb8   :  { %142 = vst [vmem:[%s377_s1 + $0x20] sm:$0xff] %v126_v34  ;;  %143 = vst [vmem:[%s377_s1 + $0x28] sm:$0xff] %v127_v44  ;;  %v120_v52 = vmul.f32 %v161_v43, %v100_v20  ;;  %v121_v53 = vmul.f32 %v161_v43, %v101_v9  ;;  %v130_v54 = vmax.f32 %v114_v46, 0.0  ;;  %v131_v55 = vmax.f32 %v115_v47, 0.0 }
  0xb9   :  { %144 = vst [vmem:[%s377_s1 + $0x30] sm:$0xff] %v128_v45  ;;  %145 = vst [vmem:[%s377_s1 + $0x38] sm:$0xff] %v129_v41  ;;  %v132_v56 = vmax.f32 %v116_v48, 0.0  ;;  %v133_v57 = vmax.f32 %v117_v49, 0.0  ;;  %v134_v58 = vmax.f32 %v118_v50, 0.0  ;;  %v135_v59 = vmax.f32 %v119_v51, 0.0 }
  0xba   :  { %v136_v60 = vmax.f32 %v120_v52, 0.0  ;;  %v137_v61 = vmax.f32 %v121_v53, 0.0  ;;  %146 = vst [vmem:[%s377_s1 + $0x40] sm:$0xff] %v130_v54  ;;  %147 = vst [vmem:[%s377_s1 + $0x48] sm:$0xff] %v131_v55 }
  0xbb   :  { %148 = vst [vmem:[%s377_s1 + $0x50] sm:$0xff] %v132_v56  ;;  %149 = vst [vmem:[%s377_s1 + $0x58] sm:$0xff] %v133_v57 }
  0xbc   :  { %150 = vst [vmem:[%s377_s1 + $0x60] sm:$0xff] %v134_v58  ;;  %151 = vst [vmem:[%s377_s1 + $0x68] sm:$0xff] %v135_v59 }
  0xbd   :  { %152 = vst [vmem:[%s377_s1 + $0x70] sm:$0xff] %v136_v60  ;;  %153 = vst [vmem:[%s377_s1 + $0x78] sm:$0xff] %v137_v61 }

// kernel: forward.14
= control target key start
LH: loop header
LB: loop body
LE: loop exit
PB: predicated region body
PF: predicated region fallthrough
CT: control target
= control target key end

     0   :  { %v316_v3 = vmov 0.0   ;;  %s570_s1 = inlined_call_operand.vmem [shape: f32[128,512], index: 1, kind: input, shape index: {}]   ;;  %s571_s0 = inlined_call_operand.vmem [shape: f32[16,128], index: 0, kind: input, shape index: {}]   ;;  %s572_s2 = inlined_call_operand.vmem [shape: f32[16,1], index: 2, kind: input, shape index: {}]   ;;  %s573_s3 = inlined_call_operand.vmem [shape: f32[16,512], index: 3, kind: output, shape index: {}]  }
   0x1   :  { %v97_v0 = vld [vmem:[%s570_s1 + $0x1e8] sm:$0xff]  ;;  %v99_v1 = vld [vmem:[%s570_s1 + $0x1f8] sm:$0xff]  ;;  %v96_v2 = vld [vmem:[%s570_s1 + $0x1e0] sm:$0xff]  ;;  %164 = vmatprep.mubr.f32.mxu0 %v316_v3  ;;  %241 = vmatprep.mubr.f32.mxu1 %v316_v3 }
   0x2   :  { %100 = vmatprep.subr.mxu0 %v97_v0  ;;  %177 = vmatprep.subr.mxu1 %v99_v1  ;;  %v98_v4 = vld [vmem:[%s570_s1 + $0x1f0] sm:$0xff]  ;;  %v93_v5 = vld [vmem:[%s570_s1 + $0x1c8] sm:$0xff]  ;;  %v95_v6 = vld [vmem:[%s570_s1 + $0x1d8] sm:$0xff] }
   0x3   :  { %101 = vmatpush1.msra.mxu0 %v96_v2  ;;  %178 = vmatpush1.msra.mxu1 %v98_v4  ;;  %v92_v7 = vld [vmem:[%s570_s1 + $0x1c0] sm:$0xff]  ;;  %v94_v8 = vld [vmem:[%s570_s1 + $0x1d0] sm:$0xff]  ;;  %v89_v9 = vld [vmem:[%s570_s1 + $0x1a8] sm:$0xff] }
   0x4   :  { %102 = vmatprep.subr.mxu0 %v93_v5  ;;  %179 = vmatprep.subr.mxu1 %v95_v6  ;;  %v91_v10 = vld [vmem:[%s570_s1 + $0x1b8] sm:$0xff]  ;;  %v88_v11 = vld [vmem:[%s570_s1 + $0x1a0] sm:$0xff]  ;;  %v90_v12 = vld [vmem:[%s570_s1 + $0x1b0] sm:$0xff]  ;;  %v317_v5 = vmov 0  }
   0x5   :  { %103 = vmatpush1.msra.mxu0 %v92_v7  ;;  %180 = vmatpush1.msra.mxu1 %v94_v8  ;;  %v85_v13 = vld [vmem:[%s570_s1 + $0x188] sm:$0xff]  ;;  %v87_v14 = vld [vmem:[%s570_s1 + $0x198] sm:$0xff]  ;;  %v84_v15 = vld [vmem:[%s570_s1 + $0x180] sm:$0xff] }
   0x6   :  { %104 = vmatprep.subr.mxu0 %v89_v9  ;;  %181 = vmatprep.subr.mxu1 %v91_v10  ;;  %v86_v16 = vld [vmem:[%s570_s1 + $0x190] sm:$0xff]  ;;  %v81_v17 = vld [vmem:[%s570_s1 + $0x168] sm:$0xff]  ;;  %v83_v18 = vld [vmem:[%s570_s1 + $0x178] sm:$0xff] }
   0x7   :  { %105 = vmatpush1.msra.mxu0 %v88_v11  ;;  %182 = vmatpush1.msra.mxu1 %v90_v12  ;;  %v80_v19 = vld [vmem:[%s570_s1 + $0x160] sm:$0xff]  ;;  %v82_v20 = vld [vmem:[%s570_s1 + $0x170] sm:$0xff]  ;;  %v77_v21 = vld [vmem:[%s570_s1 + $0x148] sm:$0xff] }
   0x8   :  { %106 = vmatprep.subr.mxu0 %v85_v13  ;;  %183 = vmatprep.subr.mxu1 %v87_v14  ;;  %v79_v22 = vld [vmem:[%s570_s1 + $0x158] sm:$0xff]  ;;  %v76_v23 = vld [vmem:[%s570_s1 + $0x140] sm:$0xff]  ;;  %v78_v24 = vld [vmem:[%s570_s1 + $0x150] sm:$0xff] }
   0x9   :  { %107 = vmatpush1.msra.mxu0 %v84_v15  ;;  %184 = vmatpush1.msra.mxu1 %v86_v16  ;;  %v73_v25 = vld [vmem:[%s570_s1 + $0x128] sm:$0xff]  ;;  %v75_v26 = vld [vmem:[%s570_s1 + $0x138] sm:$0xff]  ;;  %v72_v27 = vld [vmem:[%s570_s1 + $0x120] sm:$0xff] }
   0xa   :  { %108 = vmatprep.subr.mxu0 %v81_v17  ;;  %185 = vmatprep.subr.mxu1 %v83_v18  ;;  %v74_v28 = vld [vmem:[%s570_s1 + $0x130] sm:$0xff]  ;;  %v69_v29 = vld [vmem:[%s570_s1 + $0x108] sm:$0xff]  ;;  %v71_v30 = vld [vmem:[%s570_s1 + $0x118] sm:$0xff] }
   0xb   :  { %109 = vmatpush1.msra.mxu0 %v80_v19  ;;  %186 = vmatpush1.msra.mxu1 %v82_v20  ;;  %v68_v31 = vld [vmem:[%s570_s1 + $0x100] sm:$0xff]  ;;  %v70_v32 = vld [vmem:[%s570_s1 + $0x110] sm:$0xff]  ;;  %v65_v33 = vld [vmem:[%s570_s1 + $0xe8] sm:$0xff] }
   0xc   :  { %110 = vmatprep.subr.mxu0 %v77_v21  ;;  %187 = vmatprep.subr.mxu1 %v79_v22  ;;  %v67_v34 = vld [vmem:[%s570_s1 + $0xf8] sm:$0xff]  ;;  %v64_v35 = vld [vmem:[%s570_s1 + $0xe0] sm:$0xff]  ;;  %v66_v36 = vld [vmem:[%s570_s1 + $0xf0] sm:$0xff] }
   0xd   :  { %111 = vmatpush1.msra.mxu0 %v76_v23  ;;  %188 = vmatpush1.msra.mxu1 %v78_v24  ;;  %v61_v37 = vld [vmem:[%s570_s1 + $0xc8] sm:$0xff]  ;;  %v63_v38 = vld [vmem:[%s570_s1 + $0xd8] sm:$0xff]  ;;  %v60_v39 = vld [vmem:[%s570_s1 + $0xc0] sm:$0xff] }
   0xe   :  { %112 = vmatprep.subr.mxu0 %v73_v25  ;;  %189 = vmatprep.subr.mxu1 %v75_v26  ;;  %v62_v40 = vld [vmem:[%s570_s1 + $0xd0] sm:$0xff]  ;;  %v57_v41 = vld [vmem:[%s570_s1 + $0xa8] sm:$0xff]  ;;  %v59_v42 = vld [vmem:[%s570_s1 + $0xb8] sm:$0xff] }
   0xf   :  { %113 = vmatpush1.msra.mxu0 %v72_v27  ;;  %190 = vmatpush1.msra.mxu1 %v74_v28  ;;  %v56_v43 = vld [vmem:[%s570_s1 + $0xa0] sm:$0xff]  ;;  %v58_v44 = vld [vmem:[%s570_s1 + $0xb0] sm:$0xff]  ;;  %v53_v45 = vld [vmem:[%s570_s1 + $0x88] sm:$0xff] }
  0x10   :  { %114 = vmatprep.subr.mxu0 %v69_v29  ;;  %191 = vmatprep.subr.mxu1 %v71_v30  ;;  %v55_v46 = vld [vmem:[%s570_s1 + $0x98] sm:$0xff]  ;;  %v52_v47 = vld [vmem:[%s570_s1 + $0x80] sm:$0xff]  ;;  %v54_v48 = vld [vmem:[%s570_s1 + $0x90] sm:$0xff] }
  0x11   :  { %115 = vmatpush1.msra.mxu0 %v68_v31  ;;  %192 = vmatpush1.msra.mxu1 %v70_v32  ;;  %v49_v49 = vld [vmem:[%s570_s1 + $0x68] sm:$0xff]  ;;  %v51_v50 = vld [vmem:[%s570_s1 + $0x78] sm:$0xff]  ;;  %v48_v51 = vld [vmem:[%s570_s1 + $0x60] sm:$0xff] }
  0x12   :  { %116 = vmatprep.subr.mxu0 %v65_v33  ;;  %193 = vmatprep.subr.mxu1 %v67_v34  ;;  %v50_v52 = vld [vmem:[%s570_s1 + $0x70] sm:$0xff]  ;;  %v45_v53 = vld [vmem:[%s570_s1 + $0x48] sm:$0xff]  ;;  %v47_v54 = vld [vmem:[%s570_s1 + $0x58] sm:$0xff] }
  0x13   :  { %117 = vmatpush1.msra.mxu0 %v64_v35  ;;  %194 = vmatpush1.msra.mxu1 %v66_v36  ;;  %v44_v55 = vld [vmem:[%s570_s1 + $0x40] sm:$0xff]  ;;  %v46_v56 = vld [vmem:[%s570_s1 + $0x50] sm:$0xff]  ;;  %v41_v57 = vld [vmem:[%s570_s1 + $0x28] sm:$0xff] }
  0x14   :  { %118 = vmatprep.subr.mxu0 %v61_v37  ;;  %195 = vmatprep.subr.mxu1 %v63_v38  ;;  %v43_v58 = vld [vmem:[%s570_s1 + $0x38] sm:$0xff]  ;;  %v40_v59 = vld [vmem:[%s570_s1 + $0x20] sm:$0xff]  ;;  %v42_v60 = vld [vmem:[%s570_s1 + $0x30] sm:$0xff] }
  0x15   :  { %119 = vmatpush1.msra.mxu0 %v60_v39  ;;  %196 = vmatpush1.msra.mxu1 %v62_v40  ;;  %v37_v61 = vld [vmem:[%s570_s1 + $0x8] sm:$0xff]  ;;  %v39_v62 = vld [vmem:[%s570_s1 + $0x18] sm:$0xff]  ;;  %v36_v63 = vld [vmem:[%s570_s1] sm:$0xff] }
  0x16   :  { %120 = vmatprep.subr.mxu0 %v57_v41  ;;  %197 = vmatprep.subr.mxu1 %v59_v42  ;;  %v38_v0 = vld [vmem:[%s570_s1 + $0x10] sm:$0xff]  ;;  %v34_v1 = vld [vmem:[%s571_s0] sm:$0xff]  ;;  %v35_v4 = vld [vmem:[%s571_s0 + $0x8] sm:$0xff] }
  0x17   :  { %121 = vmatpush1.msra.mxu0 %v56_v43  ;;  %198 = vmatpush1.msra.mxu1 %v58_v44  ;;  %v281_v2 = vld [vmem:[%s572_s2] sm:$0xff]  ;;  %v282_v6 = vld [vmem:[%s572_s2 + $0x8] sm:$0xff] }
  0x18   :  { %122 = vmatprep.subr.mxu0 %v53_v45  ;;  %199 = vmatprep.subr.mxu1 %v55_v46 }
  0x19   :  { %123 = vmatpush1.msra.mxu0 %v52_v47  ;;  %200 = vmatpush1.msra.mxu1 %v54_v48 }
  0x1a   :  { %124 = vmatprep.subr.mxu0 %v49_v49  ;;  %201 = vmatprep.subr.mxu1 %v51_v50 }
  0x1b   :  { %125 = vmatpush1.msra.mxu0 %v48_v51  ;;  %202 = vmatpush1.msra.mxu1 %v50_v52 }
  0x1c   :  { %126 = vmatprep.subr.mxu0 %v45_v53  ;;  %203 = vmatprep.subr.mxu1 %v47_v54 }
  0x1d   :  { %127 = vmatpush1.msra.mxu0 %v44_v55  ;;  %204 = vmatpush1.msra.mxu1 %v46_v56 }
  0x1e   :  { %128 = vmatprep.subr.mxu0 %v41_v57  ;;  %205 = vmatprep.subr.mxu1 %v43_v58 }
  0x1f   :  { %129 = vmatpush1.msra.mxu0 %v40_v59  ;;  %206 = vmatpush1.msra.mxu1 %v42_v60 }
  0x20   :  { %130 = vmatprep.subr.mxu0 %v37_v61  ;;  %207 = vmatprep.subr.mxu1 %v39_v62 }
  0x21   :  { %131 = vmatpush1.msra.mxu0 %v36_v63  ;;  %208 = vmatpush1.msra.mxu1 %v38_v0 }
  0x22   :  { %165 = vmatmul.mubr.f32.vlgmr.msra.gmra.mxu0 %v34_v1  ;;  %242 = vmatmul.mubr.f32.vlgmr.msra.gmra.mxu1 %v34_v1 }
  0x23   :  { %170 = vmatprep.mubr.f32.mxu0 %v316_v3  ;;  %247 = vmatprep.mubr.f32.mxu1 %v316_v3 }
  0x24   :  { %315 = vset.pattern.permute.xlu0 %v317_v5 }
  0x25   :  { %285 = vperm.xlu0 %315, %v281_v2  }
  0x26   :  { %171 = vmatmul.mubr.f32.gmra.mxu0 %v35_v4  ;;  %248 = vmatmul.mubr.f32.gmra.mxu1 %v35_v4 }
  0x29   :  { %290 = vperm.xlu0 %315, %v282_v6  }
  0xa0   :  { %v286_v7 = vpop.permute.xlu0 %285 }
  0xa4   :  { %v291_v13 = vpop.permute.xlu0 %290 }
  0xe2   :  { %v166_v8 = vpop.f32.mrf.mxu0  ;;  %v243_v9 = vpop.f32.mrf.mxu1 }
  0xe3   :  { %v293_v10 = vadd.f32 %v286_v7, %v166_v8  ;;  %v295_v11 = vadd.f32 %v286_v7, %v243_v9 }
  0xe4   :  { %v168_v3 = vpop.f32.mrf.mxu0  ;;  %v245_v12 = vpop.f32.mrf.mxu1 }
  0xe5   :  { %301 = vst [vmem:[%s573_s3] sm:$0xff] %v293_v10  ;;  %303 = vst [vmem:[%s573_s3 + $0x10] sm:$0xff] %v295_v11  ;;  %v294_v14 = vadd.f32 %v286_v7, %v168_v3  ;;  %v296_v15 = vadd.f32 %v286_v7, %v245_v12 }
  0xe6   :  { %v172_v16 = vpop.f32.mrf.mxu0  ;;  %v249_v17 = vpop.f32.mrf.mxu1 }
  0xe7   :  { %302 = vst [vmem:[%s573_s3 + $0x8] sm:$0xff] %v294_v14  ;;  %304 = vst [vmem:[%s573_s3 + $0x18] sm:$0xff] %v296_v15  ;;  %v297_v18 = vadd.f32 %v291_v13, %v172_v16  ;;  %v299_v19 = vadd.f32 %v291_v13, %v249_v17 }
  0xe8   :  { %v174_v20 = vpop.f32.mrf.mxu0  ;;  %v251_v21 = vpop.f32.mrf.mxu1 }
  0xe9   :  { %305 = vst [vmem:[%s573_s3 + $0x20] sm:$0xff] %v297_v18  ;;  %307 = vst [vmem:[%s573_s3 + $0x30] sm:$0xff] %v299_v19  ;;  %v298_v22 = vadd.f32 %v291_v13, %v174_v20  ;;  %v300_v23 = vadd.f32 %v291_v13, %v251_v21 }
  0xeb   :  { %306 = vst [vmem:[%s573_s3 + $0x28] sm:$0xff] %v298_v22  ;;  %308 = vst [vmem:[%s573_s3 + $0x38] sm:$0xff] %v300_v23 }

// kernel: forward.15
= control target key start
LH: loop header
LB: loop body
LE: loop exit
PB: predicated region body
PF: predicated region fallthrough
CT: control target
= control target key end

     0   :  { %s226_s0 = inlined_call_operand.vmem [shape: f32[32,256], index: 0, kind: input, shape index: {}]   ;;  %s227_s1 = inlined_call_operand.vmem [shape: f32[32,256], index: 1, kind: output, shape index: {}]  }
   0x1   :  { %v133_v0 = vld [vmem:[%s226_s0 + $0x20] sm:$0xff]  ;;  %v138_v1 = vld [vmem:[%s226_s0 + $0x28] sm:$0xff]  ;;  %v155_v5 = vld [vmem:[%s226_s0 + $0x30] sm:$0xff] }
   0x2   :  { %v143_v2 = vld [vmem:[%s226_s0] sm:$0xff]  ;;  %v22_v3 = vadd.f32 %v138_v1, %v133_v0  ;;  %v150_v4 = vld [vmem:[%s226_s0 + $0x8] sm:$0xff]  ;;  %v160_v6 = vld [vmem:[%s226_s0 + $0x38] sm:$0xff]  ;;  %v34_v17 = vmul.f32 %v155_v5, %v155_v5  ;;  %v32_v20 = vmul.f32 %v133_v0, %v133_v0  ;;  %v33_v21 = vmul.f32 %v138_v1, %v138_v1 }
   0x3   :  { %v16_v7 = vadd.f32 %v150_v4, %v143_v2  ;;  %v167_v8 = vld [vmem:[%s226_s0 + $0x10] sm:$0xff]  ;;  %v172_v9 = vld [vmem:[%s226_s0 + $0x18] sm:$0xff]  ;;  %v25_v10 = vadd.f32 %v160_v6, %v155_v5  ;;  %v28_v14 = vmul.f32 %v143_v2, %v143_v2  ;;  %v29_v15 = vmul.f32 %v150_v4, %v150_v4 }
   0x4   :  { %23 = vadd.xlane.f32.xlu1 %v22_v3  ;;  %v30_v11 = vmul.f32 %v167_v8, %v167_v8  ;;  %v31_v12 = vmul.f32 %v172_v9, %v172_v9  ;;  %v19_v13 = vadd.f32 %v172_v9, %v167_v8  ;;  %v35_v18 = vmul.f32 %v160_v6, %v160_v6 }
   0x5   :  { %17 = vadd.xlane.f32.xlu0 %v16_v7  ;;  %v36_v19 = vadd.f32 %v29_v15, %v28_v14  ;;  %v42_v23 = vadd.f32 %v33_v21, %v32_v20 }
   0x6   :  { %v39_v16 = vadd.f32 %v31_v12, %v30_v11  ;;  %v45_v22 = vadd.f32 %v35_v18, %v34_v17 }
   0x8   :  { %26 = vadd.xlane.f32.xlu1 %v25_v10 }
   0x9   :  { %20 = vadd.xlane.f32.xlu0 %v19_v13 }
   0xc   :  { %40 = vadd.xlane.f32.xlu1 %v39_v16 }
   0xd   :  { %37 = vadd.xlane.f32.xlu0 %v36_v19 }
  0x10   :  { %46 = vadd.xlane.f32.xlu1 %v45_v22 }
  0x11   :  { %43 = vadd.xlane.f32.xlu0 %v42_v23 }
  0x8d   :  { %v24_v24 = vpop.xlane.xlu1 %23 }
  0x8e   :  { %v18_v25 = vpop.xlane.xlu0 %17  ;;  %v50_v35 = vmul.f32 0.00390625, %v24_v24 }
  0x8f   :  { %v48_v28 = vmul.f32 0.00390625, %v18_v25 }
  0x90   :  { %v58_v46 = vmul.f32 %v50_v35, %v50_v35 }
  0x91   :  { %v27_v26 = vpop.xlane.xlu1 %26  ;;  %v56_v36 = vmul.f32 %v48_v28, %v48_v28  ;;  %v68_v59 = vsub.f32 %v143_v2, %v48_v28  ;;  %v69_v60 = vsub.f32 %v150_v4, %v48_v28 }
  0x92   :  { %v21_v27 = vpop.xlane.xlu0 %20  ;;  %v51_v31 = vmul.f32 0.00390625, %v27_v26 }
  0x93   :  { %v49_v29 = vmul.f32 0.00390625, %v21_v27 }
  0x94   :  { %v59_v42 = vmul.f32 %v51_v31, %v51_v31  ;;  %v74_v10 = vsub.f32 %v155_v5, %v51_v31  ;;  %v75_v11 = vsub.f32 %v160_v6, %v51_v31 }
  0x95   :  { %v41_v30 = vpop.xlane.xlu1 %40  ;;  %v57_v33 = vmul.f32 %v49_v29, %v49_v29  ;;  %v70_v56 = vsub.f32 %v167_v8, %v49_v29  ;;  %v71_v57 = vsub.f32 %v172_v9, %v49_v29  ;;  %v72_v8 = vsub.f32 %v133_v0, %v50_v35 }
  0x96   :  { %v53_v32 = vmul.f32 0.00390625, %v41_v30  ;;  %v38_v34 = vpop.xlane.xlu0 %37  ;;  %v73_v9 = vsub.f32 %v138_v1, %v50_v35 }
  0x97   :  { %v52_v37 = vmul.f32 0.00390625, %v38_v34 }
  0x98   :  { %v61_v38 = vsub.f32 %v53_v32, %v57_v33 }
  0x99   :  { %v60_v39 = vsub.f32 %v52_v37, %v56_v36  ;;  %v47_v40 = vpop.xlane.xlu1 %46 }
  0x9a   :  { %v65_v41 = vmax.f32 %v61_v38, 0.0  ;;  %v55_v43 = vmul.f32 0.00390625, %v47_v40  ;;  %v44_v44 = vpop.xlane.xlu0 %43 }
  0x9b   :  { %v64_v45 = vmax.f32 %v60_v39, 0.0  ;;  %v54_v47 = vmul.f32 0.00390625, %v44_v44 }
  0x9c   :  { %v77_v48 = vadd.f32 1e-05, %v65_v41  ;;  %v63_v49 = vsub.f32 %v55_v43, %v59_v42 }
  0x9d   :  { %v76_v50 = vadd.f32 1e-05, %v64_v45  ;;  %v62_v51 = vsub.f32 %v54_v47, %v58_v46 }
  0x9e   :  { %112 = vrsqrt.f32 %v77_v48  ;;  %v67_v52 = vmax.f32 %v63_v49, 0.0 }
  0x9f   :  { %114 = vrsqrt.f32 %v76_v50  ;;  %v66_v53 = vmax.f32 %v62_v51, 0.0 }
  0xa0   :  { %v79_v54 = vadd.f32 1e-05, %v67_v52 }
  0xa1   :  { %v78_v55 = vadd.f32 1e-05, %v66_v53 }
  0xa2   :  { %116 = vrsqrt.f32 %v79_v54 }
  0xa3   :  { %118 = vrsqrt.f32 %v78_v55 }
  0xab   :  { %v113_v58 = vpop.eup %112 }
  0xac   :  { %v115_v61 = vpop.eup %114  ;;  %v86_v62 = vmul.f32 %v113_v58, %v70_v56  ;;  %v87_v63 = vmul.f32 %v113_v58, %v71_v57 }
  0xad   :  { %v84_v3 = vmul.f32 %v115_v61, %v68_v59  ;;  %v85_v7 = vmul.f32 %v115_v61, %v69_v60 }
  0xae   :  { %v94_v12 = vmax.f32 %v86_v62, 0.0  ;;  %v95_v13 = vmax.f32 %v87_v63, 0.0 }
  0xaf   :  { %v117_v14 = vpop.eup %116  ;;  %v92_v15 = vmax.f32 %v84_v3, 0.0  ;;  %v93_v2 = vmax.f32 %v85_v7, 0.0 }
  0xb0   :  { %v119_v16 = vpop.eup %118  ;;  %102 = vst [vmem:[%s227_s1 + $0x10] sm:$0xff] %v94_v12  ;;  %103 = vst [vmem:[%s227_s1 + $0x18] sm:$0xff] %v95_v13  ;;  %v90_v4 = vmul.f32 %v117_v14, %v74_v10  ;;  %v91_v5 = vmul.f32 %v117_v14, %v75_v11 }
  0xb1   :  { %100 = vst [vmem:[%s227_s1] sm:$0xff] %v92_v15  ;;  %101 = vst [vmem:[%s227_s1 + $0x8] sm:$0xff] %v93_v2  ;;  %v88_v0 = vmul.f32 %v119_v16, %v72_v8  ;;  %v89_v1 = vmul.f32 %v119_v16, %v73_v9 }
  0xb2   :  { %v98_v6 = vmax.f32 %v90_v4, 0.0  ;;  %v99_v17 = vmax.f32 %v91_v5, 0.0 }
  0xb3   :  { %v96_v18 = vmax.f32 %v88_v0, 0.0  ;;  %v97_v19 = vmax.f32 %v89_v1, 0.0 }
  0xb4   :  { %106 = vst [vmem:[%s227_s1 + $0x30] sm:$0xff] %v98_v6  ;;  %107 = vst [vmem:[%s227_s1 + $0x38] sm:$0xff] %v99_v17 }
  0xb5   :  { %104 = vst [vmem:[%s227_s1 + $0x20] sm:$0xff] %v96_v18  ;;  %105 = vst [vmem:[%s227_s1 + $0x28] sm:$0xff] %v97_v19 }

// kernel: forward.16
= control target key start
LH: loop header
LB: loop body
LE: loop exit
PB: predicated region body
PF: predicated region fallthrough
CT: control target
= control target key end

     0   :  { %v281_v3 = vmov 0   ;;  %s446_s1 = inlined_call_operand.vmem [shape: f32[256,128], index: 1, kind: input, shape index: {}]   ;;  %s447_s0 = inlined_call_operand.vmem [shape: f32[32,256], index: 0, kind: input, shape index: {}]   ;;  %s448_s2 = inlined_call_operand.vmem [shape: f32[32,1], index: 2, kind: input, shape index: {}]   ;;  %s449_s3 = inlined_call_operand.vmem [shape: f32[32,128], index: 3, kind: output, shape index: {}]  }
   0x1   :  { %v65_v0 = vld [vmem:[%s446_s1 + $0xf8] sm:$0xff]  ;;  %v64_v2 = vld [vmem:[%s446_s1 + $0xf0] sm:$0xff]  ;;  %280 = vset.pattern.permute.xlu1 %v281_v3  ;;  %279 = vset.pattern.permute.xlu0 %v281_v3  ;;  %v63_v5 = vld [vmem:[%s446_s1 + $0xe8] sm:$0xff] }
   0x2   :  { %v49_v1 = vld [vmem:[%s446_s1 + $0x78] sm:$0xff]  ;;  %202 = vmatprep.subr.mxu0 %v65_v0  ;;  %246 = vmatprep.subr.mxu1 %v65_v0  ;;  %v48_v4 = vld [vmem:[%s446_s1 + $0x70] sm:$0xff]  ;;  %v47_v6 = vld [vmem:[%s446_s1 + $0x68] sm:$0xff] }
   0x3   :  { %203 = vmatpush3.msra.mxu0 %v49_v1  ;;  %262 = vmatpush3.msra.mxu1 %v49_v1  ;;  %v62_v7 = vld [vmem:[%s446_s1 + $0xe0] sm:$0xff]  ;;  %v61_v9 = vld [vmem:[%s446_s1 + $0xd8] sm:$0xff]  ;;  %v60_v11 = vld [vmem:[%s446_s1 + $0xd0] sm:$0xff] }
   0x4   :  { %204 = vmatprep.subr.mxu0 %v64_v2  ;;  %247 = vmatprep.subr.mxu1 %v64_v2  ;;  %v46_v8 = vld [vmem:[%s446_s1 + $0x60] sm:$0xff]  ;;  %v45_v10 = vld [vmem:[%s446_s1 + $0x58] sm:$0xff]  ;;  %v44_v12 = vld [vmem:[%s446_s1 + $0x50] sm:$0xff] }
   0x5   :  { %205 = vmatpush3.msra.mxu0 %v48_v4  ;;  %263 = vmatpush3.msra.mxu1 %v48_v4  ;;  %v59_v13 = vld [vmem:[%s446_s1 + $0xc8] sm:$0xff]  ;;  %v58_v15 = vld [vmem:[%s446_s1 + $0xc0] sm:$0xff]  ;;  %v57_v17 = vld [vmem:[%s446_s1 + $0xb8] sm:$0xff] }
   0x6   :  { %206 = vmatprep.subr.mxu0 %v63_v5  ;;  %248 = vmatprep.subr.mxu1 %v63_v5  ;;  %v43_v14 = vld [vmem:[%s446_s1 + $0x48] sm:$0xff]  ;;  %v42_v16 = vld [vmem:[%s446_s1 + $0x40] sm:$0xff]  ;;  %v41_v18 = vld [vmem:[%s446_s1 + $0x38] sm:$0xff] }
   0x7   :  { %207 = vmatpush3.msra.mxu0 %v47_v6  ;;  %264 = vmatpush3.msra.mxu1 %v47_v6  ;;  %v56_v19 = vld [vmem:[%s446_s1 + $0xb0] sm:$0xff]  ;;  %v55_v21 = vld [vmem:[%s446_s1 + $0xa8] sm:$0xff]  ;;  %v54_v23 = vld [vmem:[%s446_s1 + $0xa0] sm:$0xff] }
   0x8   :  { %208 = vmatprep.subr.mxu0 %v62_v7  ;;  %249 = vmatprep.subr.mxu1 %v62_v7  ;;  %v40_v20 = vld [vmem:[%s446_s1 + $0x30] sm:$0xff]  ;;  %v39_v22 = vld [vmem:[%s446_s1 + $0x28] sm:$0xff]  ;;  %v38_v24 = vld [vmem:[%s446_s1 + $0x20] sm:$0xff] }
   0x9   :  { %209 = vmatpush3.msra.mxu0 %v46_v8  ;;  %265 = vmatpush3.msra.mxu1 %v46_v8  ;;  %v53_v25 = vld [vmem:[%s446_s1 + $0x98] sm:$0xff]  ;;  %v52_v27 = vld [vmem:[%s446_s1 + $0x90] sm:$0xff]  ;;  %v51_v29 = vld [vmem:[%s446_s1 + $0x88] sm:$0xff] }
   0xa   :  { %210 = vmatprep.subr.mxu0 %v61_v9  ;;  %250 = vmatprep.subr.mxu1 %v61_v9  ;;  %v37_v26 = vld [vmem:[%s446_s1 + $0x18] sm:$0xff]  ;;  %v36_v28 = vld [vmem:[%s446_s1 + $0x10] sm:$0xff]  ;;  %v35_v30 = vld [vmem:[%s446_s1 + $0x8] sm:$0xff] }
   0xb   :  { %211 = vmatpush3.msra.mxu0 %v45_v10  ;;  %266 = vmatpush3.msra.mxu1 %v45_v10  ;;  %v50_v31 = vld [vmem:[%s446_s1 + $0x80] sm:$0xff]  ;;  %v27_v33 = vld [vmem:[%s447_s0 + $0x8] sm:$0xff]  ;;  %v29_v37 = vld [vmem:[%s447_s0 + $0x18] sm:$0xff] }
   0xc   :  { %212 = vmatprep.subr.mxu0 %v60_v11  ;;  %251 = vmatprep.subr.mxu1 %v60_v11  ;;  %v34_v32 = vld [vmem:[%s446_s1] sm:$0xff]  ;;  %v31_v34 = vld [vmem:[%s447_s0 + $0x28] sm:$0xff]  ;;  %v33_v38 = vld [vmem:[%s447_s0 + $0x38] sm:$0xff] }
   0xd   :  { %213 = vmatpush3.msra.mxu0 %v44_v12  ;;  %267 = vmatpush3.msra.mxu1 %v44_v12  ;;  %v26_v35 = vld [vmem:[%s447_s0] sm:$0xff]  ;;  %v168_v39 = vld [vmem:[%s448_s2 + $0x10] sm:$0xff]  ;;  %v169_v43 = vld [vmem:[%s448_s2 + $0x18] sm:$0xff] }
   0xe   :  { %214 = vmatprep.subr.mxu0 %v59_v13  ;;  %252 = vmatprep.subr.mxu1 %v59_v13  ;;  %v30_v36 = vld [vmem:[%s447_s0 + $0x20] sm:$0xff]  ;;  %v28_v41 = vld [vmem:[%s447_s0 + $0x10] sm:$0xff]  ;;  %v167_v44 = vld [vmem:[%s448_s2 + $0x8] sm:$0xff] }
   0xf   :  { %215 = vmatpush3.msra.mxu0 %v43_v14  ;;  %268 = vmatpush3.msra.mxu1 %v43_v14  ;;  %v166_v40 = vld [vmem:[%s448_s2] sm:$0xff]  ;;  %v32_v42 = vld [vmem:[%s447_s0 + $0x30] sm:$0xff] }
  0x10   :  { %216 = vmatprep.subr.mxu0 %v58_v15  ;;  %253 = vmatprep.subr.mxu1 %v58_v15 }
  0x11   :  { %217 = vmatpush3.msra.mxu0 %v42_v16  ;;  %269 = vmatpush3.msra.mxu1 %v42_v16 }
  0x12   :  { %218 = vmatprep.subr.mxu0 %v57_v17  ;;  %254 = vmatprep.subr.mxu1 %v57_v17 }
  0x13   :  { %219 = vmatpush3.msra.mxu0 %v41_v18  ;;  %270 = vmatpush3.msra.mxu1 %v41_v18 }
  0x14   :  { %220 = vmatprep.subr.mxu0 %v56_v19  ;;  %255 = vmatprep.subr.mxu1 %v56_v19 }
  0x15   :  { %221 = vmatpush3.msra.mxu0 %v40_v20  ;;  %271 = vmatpush3.msra.mxu1 %v40_v20 }
  0x16   :  { %222 = vmatprep.subr.mxu0 %v55_v21  ;;  %256 = vmatprep.subr.mxu1 %v55_v21 }
  0x17   :  { %223 = vmatpush3.msra.mxu0 %v39_v22  ;;  %272 = vmatpush3.msra.mxu1 %v39_v22 }
  0x18   :  { %224 = vmatprep.subr.mxu0 %v54_v23  ;;  %257 = vmatprep.subr.mxu1 %v54_v23 }
  0x19   :  { %225 = vmatpush3.msra.mxu0 %v38_v24  ;;  %273 = vmatpush3.msra.mxu1 %v38_v24 }
  0x1a   :  { %226 = vmatprep.subr.mxu0 %v53_v25  ;;  %258 = vmatprep.subr.mxu1 %v53_v25 }
  0x1b   :  { %227 = vmatpush3.msra.mxu0 %v37_v26  ;;  %274 = vmatpush3.msra.mxu1 %v37_v26 }
  0x1c   :  { %228 = vmatprep.subr.mxu0 %v52_v27  ;;  %259 = vmatprep.subr.mxu1 %v52_v27 }
  0x1d   :  { %229 = vmatpush3.msra.mxu0 %v36_v28  ;;  %275 = vmatpush3.msra.mxu1 %v36_v28 }
  0x1e   :  { %230 = vmatprep.subr.mxu0 %v51_v29  ;;  %260 = vmatprep.subr.mxu1 %v51_v29 }
  0x1f   :  { %231 = vmatpush3.msra.mxu0 %v35_v30  ;;  %276 = vmatpush3.msra.mxu1 %v35_v30 }
  0x20   :  { %232 = vmatprep.subr.mxu0 %v50_v31  ;;  %261 = vmatprep.subr.mxu1 %v50_v31 }
  0x21   :  { %233 = vmatpush3.msra.mxu0 %v34_v32  ;;  %277 = vmatpush3.msra.mxu1 %v34_v32 }
  0x22   :  { %130 = vmatprep.mubr.f32.mxu0 %v27_v33  ;;  %140 = vmatprep.mubr.f32.mxu1 %v31_v34 }
  0x23   :  { %131 = vmatmul.mubr.f32.vlgmr.msra.gmra.mxu0 %v26_v35  ;;  %141 = vmatmul.mubr.f32.vlgmr.msra.gmra.mxu1 %v30_v36 }
  0x24   :  { %135 = vmatprep.mubr.f32.mxu0 %v29_v37  ;;  %145 = vmatprep.mubr.f32.mxu1 %v33_v38 }
  0x25   :  { %182 = vperm.xlu1 %280, %v168_v39   ;;  %172 = vperm.xlu0 %279, %v166_v40  }
  0x27   :  { %136 = vmatmul.mubr.f32.gmra.mxu0 %v28_v41  ;;  %146 = vmatmul.mubr.f32.gmra.mxu1 %v32_v42 }
  0x29   :  { %187 = vperm.xlu1 %280, %v169_v43   ;;  %177 = vperm.xlu0 %279, %v167_v44  }
  0xa0   :  { %v183_v47 = vpop.permute.xlu1 %182  ;;  %v173_v48 = vpop.permute.xlu0 %172 }
  0xa4   :  { %v188_v61 = vpop.permute.xlu1 %187  ;;  %v178_v62 = vpop.permute.xlu0 %177 }
  0xe3   :  { %v234_v45 = vpop.f32.mrf.mxu0  ;;  %v240_v46 = vpop.f32.mrf.mxu1 }
  0xe5   :  { %v235_v49 = vpop.f32.mrf.mxu0  ;;  %v241_v50 = vpop.f32.mrf.mxu1 }
  0xe6   :  { %v236_v51 = vadd.f32 %v235_v49, %v234_v45  ;;  %v242_v52 = vadd.f32 %v241_v50, %v240_v46 }
  0xe7   :  { %v237_v53 = vpop.f32.mrf.mxu0  ;;  %v243_v54 = vpop.f32.mrf.mxu1 }
  0xe8   :  { %v190_v55 = vadd.f32 %v236_v51, %v173_v48  ;;  %v192_v56 = vadd.f32 %v242_v52, %v183_v47 }
  0xe9   :  { %v238_v57 = vpop.f32.mrf.mxu0  ;;  %v244_v58 = vpop.f32.mrf.mxu1 }
  0xea   :  { %194 = vst [vmem:[%s449_s3] sm:$0xff] %v190_v55  ;;  %196 = vst [vmem:[%s449_s3 + $0x10] sm:$0xff] %v192_v56  ;;  %v239_v59 = vadd.f32 %v238_v57, %v237_v53  ;;  %v245_v60 = vadd.f32 %v244_v58, %v243_v54 }
  0xec   :  { %v191_v63 = vadd.f32 %v239_v59, %v178_v62  ;;  %v193_v0 = vadd.f32 %v245_v60, %v188_v61 }
  0xee   :  { %195 = vst [vmem:[%s449_s3 + $0x8] sm:$0xff] %v191_v63  ;;  %197 = vst [vmem:[%s449_s3 + $0x18] sm:$0xff] %v193_v0 }

// kernel: forward.17
= control target key start
LH: loop header
LB: loop body
LE: loop exit
PB: predicated region body
PF: predicated region fallthrough
CT: control target
= control target key end

     0   :  { %vm16_vm0 = vcmask 523264   ;;  %s351_s0 = inlined_call_operand.vmem [shape: f32[64,64], index: 0, kind: input, shape index: {}]   ;;  %s352_s1 = inlined_call_operand.vmem [shape: f32[64,64], index: 1, kind: output, shape index: {}]  }
   0x1   :  { %v194_v0 = vld [vmem:[%s351_s0 + $0x10] sm:$0xff]  ;;  %v199_v1 = vld [vmem:[%s351_s0] sm:$0xff]  ;;  %v204_v2 = vld [vmem:[%s351_s0 + $0x18] sm:$0xff] }
   0x2   :  { %v23_v3 = vsel %vm16_vm0, %v194_v0, 0.0  ;;  %v17_v4 = vsel %vm16_vm0, %v199_v1, 0.0  ;;  %v213_v5 = vld [vmem:[%s351_s0 + $0x8] sm:$0xff]  ;;  %v26_v6 = vsel %vm16_vm0, %v204_v2, 0.0  ;;  %v227_v9 = vld [vmem:[%s351_s0 + $0x20] sm:$0xff]  ;;  %v236_v12 = vld [vmem:[%s351_s0 + $0x38] sm:$0xff]  ;;  %v41_v17 = vmul.f32 %v199_v1, %v199_v1 }
   0x3   :  { %24 = vadd.xlane.f32.xlu1 %v23_v3  ;;  %18 = vadd.xlane.f32.xlu0 %v17_v4  ;;  %v20_v7 = vsel %vm16_vm0, %v213_v5, 0.0  ;;  %v222_v8 = vld [vmem:[%s351_s0 + $0x28] sm:$0xff]  ;;  %v29_v11 = vsel %vm16_vm0, %v227_v9, 0.0  ;;  %v241_v13 = vld [vmem:[%s351_s0 + $0x30] sm:$0xff]  ;;  %v38_v14 = vsel %vm16_vm0, %v236_v12, 0.0  ;;  %v42_v16 = vmul.f32 %v213_v5, %v213_v5 }
   0x4   :  { %v32_v10 = vsel %vm16_vm0, %v222_v8, 0.0  ;;  %v35_v15 = vsel %vm16_vm0, %v241_v13, 0.0  ;;  %v49_v19 = vsel %vm16_vm0, %v41_v17, 0.0  ;;  %v44_v20 = vmul.f32 %v204_v2, %v204_v2 }
   0x5   :  { %v52_v18 = vsel %vm16_vm0, %v42_v16, 0.0  ;;  %v43_v21 = vmul.f32 %v194_v0, %v194_v0  ;;  %v46_v24 = vmul.f32 %v222_v8, %v222_v8  ;;  %v45_v25 = vmul.f32 %v227_v9, %v227_v9 }
   0x6   :  { %v58_v22 = vsel %vm16_vm0, %v44_v20, 0.0  ;;  %v48_v28 = vmul.f32 %v236_v12, %v236_v12  ;;  %v47_v29 = vmul.f32 %v241_v13, %v241_v13 }
   0x7   :  { %27 = vadd.xlane.f32.xlu1 %v26_v6  ;;  %21 = vadd.xlane.f32.xlu0 %v20_v7  ;;  %v55_v23 = vsel %vm16_vm0, %v43_v21, 0.0  ;;  %v64_v26 = vsel %vm16_vm0, %v46_v24, 0.0  ;;  %v61_v27 = vsel %vm16_vm0, %v45_v25, 0.0 }
   0x8   :  { %v70_v30 = vsel %vm16_vm0, %v48_v28, 0.0  ;;  %v67_v31 = vsel %vm16_vm0, %v47_v29, 0.0 }
   0xb   :  { %33 = vadd.xlane.f32.xlu1 %v32_v10  ;;  %30 = vadd.xlane.f32.xlu0 %v29_v11 }
   0xf   :  { %39 = vadd.xlane.f32.xlu1 %v38_v14  ;;  %36 = vadd.xlane.f32.xlu0 %v35_v15 }
  0x13   :  { %53 = vadd.xlane.f32.xlu1 %v52_v18  ;;  %50 = vadd.xlane.f32.xlu0 %v49_v19 }
  0x17   :  { %59 = vadd.xlane.f32.xlu1 %v58_v22  ;;  %56 = vadd.xlane.f32.xlu0 %v55_v23 }
  0x1b   :  { %65 = vadd.xlane.f32.xlu1 %v64_v26  ;;  %62 = vadd.xlane.f32.xlu0 %v61_v27 }
  0x1f   :  { %71 = vadd.xlane.f32.xlu1 %v70_v30  ;;  %68 = vadd.xlane.f32.xlu0 %v67_v31 }
  0x8c   :  { %v25_v32 = vpop.xlane.xlu1 %24  ;;  %v19_v33 = vpop.xlane.xlu0 %18 }
  0x8d   :  { %v271_v40 = vmul.f32 0.015625, %v19_v33  ;;  %v275_v42 = vmul.f32 0.015625, %v25_v32 }
  0x8f   :  { %v89_v46 = vmul.f32 %v271_v40, %v271_v40  ;;  %v91_v52 = vmul.f32 %v275_v42, %v275_v42 }
  0x90   :  { %v28_v34 = vpop.xlane.xlu1 %27  ;;  %v22_v35 = vpop.xlane.xlu0 %21 }
  0x91   :  { %v273_v41 = vmul.f32 0.015625, %v22_v35  ;;  %v277_v43 = vmul.f32 0.015625, %v28_v34 }
  0x93   :  { %v90_v47 = vmul.f32 %v273_v41, %v273_v41  ;;  %v92_v53 = vmul.f32 %v277_v43, %v277_v43 }
  0x94   :  { %v34_v36 = vpop.xlane.xlu1 %33  ;;  %v31_v37 = vpop.xlane.xlu0 %30 }
  0x95   :  { %v287_v54 = vmul.f32 0.015625, %v34_v36  ;;  %v289_v61 = vmul.f32 0.015625, %v31_v37 }
  0x97   :  { %v94_v6 = vmul.f32 %v287_v54, %v287_v54  ;;  %v93_v18 = vmul.f32 %v289_v61, %v289_v61 }
  0x98   :  { %v40_v38 = vpop.xlane.xlu1 %39  ;;  %v37_v39 = vpop.xlane.xlu0 %36 }
  0x99   :  { %v293_v7 = vmul.f32 0.015625, %v40_v38  ;;  %v295_v10 = vmul.f32 0.015625, %v37_v39 }
  0x9b   :  { %v96_v23 = vmul.f32 %v293_v7, %v293_v7  ;;  %v95_v24 = vmul.f32 %v295_v10, %v295_v10 }
  0x9c   :  { %v54_v44 = vpop.xlane.xlu1 %53  ;;  %v51_v45 = vpop.xlane.xlu0 %50 }
  0x9d   :  { %v82_v48 = vmul.f32 0.015625, %v54_v44  ;;  %v81_v49 = vmul.f32 0.015625, %v51_v45  ;;  %v114_v44 = vsub.f32 %v213_v5, %v273_v41 }
  0x9f   :  { %v98_v50 = vsub.f32 %v82_v48, %v90_v47  ;;  %v97_v51 = vsub.f32 %v81_v49, %v89_v46  ;;  %v113_v46 = vsub.f32 %v199_v1, %v271_v40 }
  0xa0   :  { %v60_v55 = vpop.xlane.xlu1 %59  ;;  %v57_v56 = vpop.xlane.xlu0 %56 }
  0xa1   :  { %v106_v57 = vmax.f32 %v98_v50, 0.0  ;;  %v105_v58 = vmax.f32 %v97_v51, 0.0  ;;  %v84_v59 = vmul.f32 0.015625, %v60_v55  ;;  %v83_v60 = vmul.f32 0.015625, %v57_v56 }
  0xa2   :  { %v116_v50 = vsub.f32 %v204_v2, %v277_v43  ;;  %v118_v2 = vsub.f32 %v222_v8, %v287_v54  ;;  %v120_v8 = vsub.f32 %v236_v12, %v293_v7 }
  0xa3   :  { %v122_v62 = vadd.f32 1e-05, %v106_v57  ;;  %v121_v63 = vadd.f32 1e-05, %v105_v58  ;;  %v100_v3 = vsub.f32 %v84_v59, %v92_v53  ;;  %v99_v4 = vsub.f32 %v83_v60, %v91_v52 }
  0xa4   :  { %v66_v11 = vpop.xlane.xlu1 %65  ;;  %v63_v14 = vpop.xlane.xlu0 %62  ;;  %v115_v53 = vsub.f32 %v194_v0, %v275_v42  ;;  %v117_v0 = vsub.f32 %v227_v9, %v289_v61  ;;  %v119_v9 = vsub.f32 %v241_v13, %v295_v10 }
  0xa5   :  { %165 = vrsqrt.f32 %v122_v62  ;;  %v108_v15 = vmax.f32 %v100_v3, 0.0  ;;  %v107_v16 = vmax.f32 %v99_v4, 0.0  ;;  %v86_v17 = vmul.f32 0.015625, %v66_v11 }
  0xa6   :  { %167 = vrsqrt.f32 %v121_v63  ;;  %v85_v19 = vmul.f32 0.015625, %v63_v14 }
  0xa7   :  { %v124_v20 = vadd.f32 1e-05, %v108_v15  ;;  %v123_v21 = vadd.f32 1e-05, %v107_v16  ;;  %v102_v22 = vsub.f32 %v86_v17, %v94_v6 }
  0xa8   :  { %v101_v25 = vsub.f32 %v85_v19, %v93_v18  ;;  %v72_v26 = vpop.xlane.xlu1 %71  ;;  %v69_v27 = vpop.xlane.xlu0 %68 }
  0xa9   :  { %169 = vrsqrt.f32 %v124_v20  ;;  %v110_v28 = vmax.f32 %v102_v22, 0.0  ;;  %v88_v29 = vmul.f32 0.015625, %v72_v26  ;;  %v87_v30 = vmul.f32 0.015625, %v69_v27 }
  0xaa   :  { %171 = vrsqrt.f32 %v123_v21  ;;  %v109_v31 = vmax.f32 %v101_v25, 0.0 }
  0xab   :  { %v126_v32 = vadd.f32 1e-05, %v110_v28  ;;  %v104_v33 = vsub.f32 %v88_v29, %v96_v23  ;;  %v103_v34 = vsub.f32 %v87_v30, %v95_v24 }
  0xac   :  { %v125_v35 = vadd.f32 1e-05, %v109_v31 }
  0xad   :  { %173 = vrsqrt.f32 %v126_v32  ;;  %v112_v36 = vmax.f32 %v104_v33, 0.0  ;;  %v111_v37 = vmax.f32 %v103_v34, 0.0 }
  0xae   :  { %175 = vrsqrt.f32 %v125_v35 }
  0xaf   :  { %v128_v38 = vadd.f32 1e-05, %v112_v36  ;;  %v127_v39 = vadd.f32 1e-05, %v111_v37 }
  0xb1   :  { %177 = vrsqrt.f32 %v128_v38 }
  0xb2   :  { %v166_v45 = vpop.eup %165  ;;  %179 = vrsqrt.f32 %v127_v39 }
  0xb3   :  { %v168_v47 = vpop.eup %167  ;;  %v138_v48 = vmul.f32 %v166_v45, %v114_v44 }
  0xb4   :  { %v137_v49 = vmul.f32 %v168_v47, %v113_v46 }
  0xb5   :  { %v146_v51 = vmax.f32 %v138_v48, 0.0 }
  0xb6   :  { %v170_v52 = vpop.eup %169  ;;  %v145_v55 = vmax.f32 %v137_v49, 0.0 }
  0xb7   :  { %v172_v56 = vpop.eup %171  ;;  %154 = vst.msk [vmem:[%s352_s1 + $0x8] sm:$0xff] %vm16_vm0, %v146_v51  ;;  %v140_v1 = vmul.f32 %v170_v52, %v116_v50 }
  0xb8   :  { %153 = vst.msk [vmem:[%s352_s1] sm:$0xff] %vm16_vm0, %v145_v55  ;;  %v139_v5 = vmul.f32 %v172_v56, %v115_v53 }
  0xb9   :  { %v148_v40 = vmax.f32 %v140_v1, 0.0 }
  0xba   :  { %v174_v41 = vpop.eup %173  ;;  %v147_v42 = vmax.f32 %v139_v5, 0.0 }
  0xbb   :  { %v176_v43 = vpop.eup %175  ;;  %156 = vst.msk [vmem:[%s352_s1 + $0x18] sm:$0xff] %vm16_vm0, %v148_v40  ;;  %v142_v57 = vmul.f32 %v174_v41, %v118_v2 }
  0xbc   :  { %155 = vst.msk [vmem:[%s352_s1 + $0x10] sm:$0xff] %vm16_vm0, %v147_v42  ;;  %v141_v58 = vmul.f32 %v176_v43, %v117_v0 }
  0xbd   :  { %v150_v54 = vmax.f32 %v142_v57, 0.0 }
  0xbe   :  { %v178_v59 = vpop.eup %177  ;;  %v149_v60 = vmax.f32 %v141_v58, 0.0 }
  0xbf   :  { %v180_v61 = vpop.eup %179  ;;  %158 = vst.msk [vmem:[%s352_s1 + $0x28] sm:$0xff] %vm16_vm0, %v150_v54  ;;  %v144_v62 = vmul.f32 %v178_v59, %v120_v8 }
  0xc0   :  { %157 = vst.msk [vmem:[%s352_s1 + $0x20] sm:$0xff] %vm16_vm0, %v149_v60  ;;  %v143_v63 = vmul.f32 %v180_v61, %v119_v9 }
  0xc1   :  { %v152_v12 = vmax.f32 %v144_v62, 0.0 }
  0xc2   :  { %v151_v3 = vmax.f32 %v143_v63, 0.0 }
  0xc3   :  { %160 = vst.msk [vmem:[%s352_s1 + $0x38] sm:$0xff] %vm16_vm0, %v152_v12 }
  0xc4   :  { %159 = vst.msk [vmem:[%s352_s1 + $0x30] sm:$0xff] %vm16_vm0, %v151_v3 }

// kernel: forward.18
= control target key start
LH: loop header
LB: loop body
LE: loop exit
PB: predicated region body
PF: predicated region fallthrough
CT: control target
= control target key end

     0   :  { %s902_s12 = smov 0   ;;  %s904_s13 = smov 0   ;;  %s1087_s0 = inlined_call_operand.vmem [shape: f32[64,512], index: 0, kind: input, shape index: {}]   ;;  %s1088_s1 = inlined_call_operand.vmem [shape: f32[512,128], index: 1, kind: input, shape index: {}]   ;;  %s1089_s2 = inlined_call_operand.vmem [shape: f32[64,1], index: 2, kind: input, shape index: {}]   ;;  %s1090_s3 = inlined_call_operand.vmem [shape: f32[64,128], index: 3, kind: output, shape index: {}]  }
   0x1   :  { %s906_s14 = smov 0   ;;  %s908_s15 = smov 0  }
   0x2   :  { %s910_s16 = smov 0  }
   0x3 LB: > { %s25_s17 = sadd.s32 1, %s874_s15  ;;  %p48_p1 = scmp.ne.s32.totalorder %s866_s13, %s862_s12  ;;  %s878_s16 = sphi %s910_s16, %s13_s16   ;;  %s874_s15 = sphi %s908_s15, %s1094_s15   ;;  %s870_s14 = sphi %s906_s14, %s1093_s14   ;;  %s866_s13 = sphi %s904_s13, %s1092_s13   ;;  %s862_s12 = sphi %s902_s12, %s1091_s12  }
   0x4   : > { %p26_p0 = scmp.ge.s32.totalorder %s25_s17, 2  ;;  %p49_p2 = scmp.eq.s32.totalorder %s878_s16, 0 }
   0x5   : > { %s41_s19 = sadd.s32 1, %s866_s13  ;;  %p693_p5 = scmp.ge.s32.totalorder %s878_s16, 2 }
   0x6   : > { %s1096_s17 = smov (%p26_p0, %s25_s17), 0  ;;  %p50_p3 = por %p49_p2, %p48_p1 }
   0x7   : > { %s37_s18 = ssub.s32 %s874_s15, %s1096_s17  ;;  %165 = sbr.rel (%p693_p5) target bundleno = 24 (0x18), region = 20 }
   0x8   : > { %p39_p4 = scmp.eq.s32.totalorder %s37_s18, 0 }
   0xa   : > { %s937_s20 = scalar_select %p39_p4, %s866_s13, %s41_s19  }
   0xc   : > { %168 = sbr.rel (!%p50_p3) target bundleno = 24 (0x18), region = 24  ;;  %s170_s21 = sand.u32 (%p50_p3), 1, %s866_s13  }
   0xd   : > { %s707_s22 = sshll.u32 (%p50_p3), %s874_s15, 4  ;;  %s694_s23 = sshll.u32 (%p50_p3), %s170_s21, 7 }
   0xe   : > { %s945_s26 = scalar_lea.vmem (%p50_p3), %s1087_s0, %s707_s22  ;;  %s172_s27 = scalar_lea.vmem (%p50_p3), [#allocation3], %s694_s23 }
   0xf   : > { %v191_v0 = vld [vmem:[%s945_s26] sm:$0xff] (%p50_p3)  ;;  %v193_v1 = vld [vmem:[%s945_s26 + $0x8] sm:$0xff] (%p50_p3) }
  0x10   : > { %v195_v2 = vld [vmem:[%s945_s26 + $0x20] sm:$0xff] (%p50_p3)  ;;  %192 = vst [vmem:[%s172_s27] sm:$0xff] (%p50_p3), %v191_v0  ;;  %194 = vst [vmem:[%s172_s27 + $0x8] sm:$0xff] (%p50_p3), %v193_v1  ;;  %v197_v3 = vld [vmem:[%s945_s26 + $0x28] sm:$0xff] (%p50_p3) }
  0x11   : > { %196 = vst [vmem:[%s172_s27 + $0x10] sm:$0xff] %v195_v2  ;;  %v199_v4 = vld [vmem:[%s945_s26 + $0x40] sm:$0xff]  ;;  %v201_v5 = vld [vmem:[%s945_s26 + $0x48] sm:$0xff]  ;;  %198 = vst [vmem:[%s172_s27 + $0x18] sm:$0xff] %v197_v3 }
  0x12   : > { %200 = vst [vmem:[%s172_s27 + $0x20] sm:$0xff] %v199_v4  ;;  %202 = vst [vmem:[%s172_s27 + $0x28] sm:$0xff] %v201_v5  ;;  %v203_v6 = vld [vmem:[%s945_s26 + $0x60] sm:$0xff]  ;;  %v205_v7 = vld [vmem:[%s945_s26 + $0x68] sm:$0xff] }
  0x13   : > { %v207_v8 = vld [vmem:[%s945_s26 + $0x80] sm:$0xff]  ;;  %204 = vst [vmem:[%s172_s27 + $0x30] sm:$0xff] %v203_v6  ;;  %206 = vst [vmem:[%s172_s27 + $0x38] sm:$0xff] %v205_v7  ;;  %v209_v9 = vld [vmem:[%s945_s26 + $0x88] sm:$0xff] }
  0x14   : > { %208 = vst [vmem:[%s172_s27 + $0x40] sm:$0xff] %v207_v8  ;;  %v211_v10 = vld [vmem:[%s945_s26 + $0xa0] sm:$0xff]  ;;  %v213_v11 = vld [vmem:[%s945_s26 + $0xa8] sm:$0xff]  ;;  %210 = vst [vmem:[%s172_s27 + $0x48] sm:$0xff] %v209_v9 }
  0x15   : > { %212 = vst [vmem:[%s172_s27 + $0x50] sm:$0xff] %v211_v10  ;;  %214 = vst [vmem:[%s172_s27 + $0x58] sm:$0xff] %v213_v11  ;;  %v215_v12 = vld [vmem:[%s945_s26 + $0xc0] sm:$0xff]  ;;  %v217_v13 = vld [vmem:[%s945_s26 + $0xc8] sm:$0xff] }
  0x16   : > { %v219_v14 = vld [vmem:[%s945_s26 + $0xe0] sm:$0xff]  ;;  %216 = vst [vmem:[%s172_s27 + $0x60] sm:$0xff] %v215_v12  ;;  %218 = vst [vmem:[%s172_s27 + $0x68] sm:$0xff] %v217_v13  ;;  %v221_v15 = vld [vmem:[%s945_s26 + $0xe8] sm:$0xff] }
  0x17   : > { %220 = vst [vmem:[%s172_s27 + $0x70] sm:$0xff] %v219_v14  ;;  %222 = vst [vmem:[%s172_s27 + $0x78] sm:$0xff] %v221_v15 }
  0x18 PF: > { %p697_p6 = scmp.ge.s32.totalorder %s878_s16, 1  ;;  %p239_p7 = scmp.lt.s32.totalorder %s878_s16, 3 }
  0x1a   : > { %p240_p8 = pnand %p697_p6, %p239_p7 }
  0x1b   : > { %s246_s28 = sand.u32 (!%p240_p8), 1, %s862_s12   ;;  %s699_s29 = sshll.u32 (!%p240_p8), %s870_s14, 5 }
  0x1c   : > { %243 = sbr.rel (%p240_p8) target bundleno = 430 (0x1ae), region = 51  ;;  %s698_s30 = sshll.u32 (!%p240_p8), %s246_s28, 7 }
  0x1d   : > { %p288_p9 = scmp.lt.s32.totalorder (!%p240_p8), %s699_s29, 63  ;;  %s972_s8 = scalar_lea.vmem (!%p240_p8), [#allocation3], %s698_s30 }
  0x1e   : > { %p701_p10 = scmp.ne.s32.totalorder (!%p240_p8), %s870_s14, 0 }
  0x21   : > { %s1098_s29 = smov (!%p288_p9, %s699_s29), 63  ;;  %314 = sbr.rel (%p701_p10) target bundleno = 43 (0x2b), region = 59 }
  0x22   : > { %s700_s4 = sshll.u32 %s1098_s29, 3 }
  0x23   : > { %s970_s7 = scalar_lea.vmem %s1088_s1, %s700_s4 }
  0x26   : > { %v880_v16 = vmov 0.0  }
  0x27   : > { %315 = vst [vmem:[#allocation2 + $0x30] sm:$0xff] %v880_v16  ;;  %316 = vst [vmem:[#allocation2] sm:$0xff] %v880_v16 }
  0x28   : > { %317 = vst [vmem:[#allocation2 + $0x18] sm:$0xff] %v880_v16  ;;  %318 = vst [vmem:[#allocation2 + $0x10] sm:$0xff] %v880_v16 }
  0x29   : > { %319 = vst [vmem:[#allocation2 + $0x8] sm:$0xff] %v880_v16  ;;  %320 = vst [vmem:[#allocation2 + $0x20] sm:$0xff] %v880_v16 }
  0x2a   : > { %321 = vst [vmem:[#allocation2 + $0x28] sm:$0xff] %v880_v16  ;;  %322 = vst [vmem:[#allocation2 + $0x38] sm:$0xff] %v880_v16 }
  0x2b PF: > { %v378_v17 = vld [vmem:[%s970_s7 + $0xf8] sm:$0xff]  ;;  %v377_v19 = vld [vmem:[%s970_s7 + $0xf0] sm:$0xff]  ;;  %v376_v21 = vld [vmem:[%s970_s7 + $0xe8] sm:$0xff]  ;;  %p702_p11 = scmp.ne.s32.totalorder %s870_s14, 1 }
  0x2c   : > { %v362_v18 = vld [vmem:[%s970_s7 + $0x78] sm:$0xff]  ;;  %708 = vmatprep.subr.mxu0 %v378_v17  ;;  %764 = vmatprep.subr.mxu1 %v378_v17  ;;  %v361_v20 = vld [vmem:[%s970_s7 + $0x70] sm:$0xff]  ;;  %v360_v22 = vld [vmem:[%s970_s7 + $0x68] sm:$0xff] }
  0x2d   : > { %709 = vmatpush3.msra.mxu0 %v362_v18  ;;  %780 = vmatpush3.msra.mxu1 %v362_v18  ;;  %v375_v23 = vld [vmem:[%s970_s7 + $0xe0] sm:$0xff]  ;;  %v374_v25 = vld [vmem:[%s970_s7 + $0xd8] sm:$0xff]  ;;  %v373_v27 = vld [vmem:[%s970_s7 + $0xd0] sm:$0xff] }
  0x2e   : > { %710 = vmatprep.subr.mxu0 %v377_v19  ;;  %765 = vmatprep.subr.mxu1 %v377_v19  ;;  %v359_v24 = vld [vmem:[%s970_s7 + $0x60] sm:$0xff]  ;;  %v358_v26 = vld [vmem:[%s970_s7 + $0x58] sm:$0xff]  ;;  %v357_v28 = vld [vmem:[%s970_s7 + $0x50] sm:$0xff] }
  0x2f   : > { %711 = vmatpush3.msra.mxu0 %v361_v20  ;;  %781 = vmatpush3.msra.mxu1 %v361_v20  ;;  %v372_v29 = vld [vmem:[%s970_s7 + $0xc8] sm:$0xff]  ;;  %v371_v31 = vld [vmem:[%s970_s7 + $0xc0] sm:$0xff]  ;;  %v370_v33 = vld [vmem:[%s970_s7 + $0xb8] sm:$0xff] }
  0x30   : > { %712 = vmatprep.subr.mxu0 %v376_v21  ;;  %766 = vmatprep.subr.mxu1 %v376_v21  ;;  %v356_v30 = vld [vmem:[%s970_s7 + $0x48] sm:$0xff]  ;;  %v355_v32 = vld [vmem:[%s970_s7 + $0x40] sm:$0xff]  ;;  %v354_v34 = vld [vmem:[%s970_s7 + $0x38] sm:$0xff] }
  0x31   : > { %713 = vmatpush3.msra.mxu0 %v360_v22  ;;  %782 = vmatpush3.msra.mxu1 %v360_v22  ;;  %v369_v35 = vld [vmem:[%s970_s7 + $0xb0] sm:$0xff]  ;;  %v368_v37 = vld [vmem:[%s970_s7 + $0xa8] sm:$0xff]  ;;  %v367_v39 = vld [vmem:[%s970_s7 + $0xa0] sm:$0xff] }
  0x32   : > { %714 = vmatprep.subr.mxu0 %v375_v23  ;;  %767 = vmatprep.subr.mxu1 %v375_v23  ;;  %v353_v36 = vld [vmem:[%s970_s7 + $0x30] sm:$0xff]  ;;  %v352_v38 = vld [vmem:[%s970_s7 + $0x28] sm:$0xff]  ;;  %v351_v40 = vld [vmem:[%s970_s7 + $0x20] sm:$0xff] }
  0x33   : > { %715 = vmatpush3.msra.mxu0 %v359_v24  ;;  %783 = vmatpush3.msra.mxu1 %v359_v24  ;;  %v366_v41 = vld [vmem:[%s970_s7 + $0x98] sm:$0xff]  ;;  %v365_v43 = vld [vmem:[%s970_s7 + $0x90] sm:$0xff]  ;;  %v364_v45 = vld [vmem:[%s970_s7 + $0x88] sm:$0xff] }
  0x34   : > { %716 = vmatprep.subr.mxu0 %v374_v25  ;;  %768 = vmatprep.subr.mxu1 %v374_v25  ;;  %v350_v42 = vld [vmem:[%s970_s7 + $0x18] sm:$0xff]  ;;  %v349_v44 = vld [vmem:[%s970_s7 + $0x10] sm:$0xff]  ;;  %v348_v46 = vld [vmem:[%s970_s7 + $0x8] sm:$0xff] }
  0x35   : > { %717 = vmatpush3.msra.mxu0 %v358_v26  ;;  %784 = vmatpush3.msra.mxu1 %v358_v26  ;;  %v363_v47 = vld [vmem:[%s970_s7 + $0x80] sm:$0xff]  ;;  %v332_v49 = vld [vmem:[%s972_s8 + $0x8] sm:$0xff]  ;;  %v334_v53 = vld [vmem:[%s972_s8 + $0x18] sm:$0xff] }
  0x36   : > { %718 = vmatprep.subr.mxu0 %v373_v27  ;;  %769 = vmatprep.subr.mxu1 %v373_v27  ;;  %v347_v48 = vld [vmem:[%s970_s7] sm:$0xff]  ;;  %v340_v50 = vld [vmem:[%s972_s8 + $0x48] sm:$0xff]  ;;  %v342_v54 = vld [vmem:[%s972_s8 + $0x58] sm:$0xff] }
  0x37   : > { %719 = vmatpush3.msra.mxu0 %v357_v28  ;;  %785 = vmatpush3.msra.mxu1 %v357_v28  ;;  %v331_v51 = vld [vmem:[%s972_s8] sm:$0xff]  ;;  %v333_v55 = vld [vmem:[%s972_s8 + $0x10] sm:$0xff]  ;;  %v336_v57 = vld [vmem:[%s972_s8 + $0x28] sm:$0xff] }
  0x38   : > { %720 = vmatprep.subr.mxu0 %v372_v29  ;;  %770 = vmatprep.subr.mxu1 %v372_v29  ;;  %v339_v52 = vld [vmem:[%s972_s8 + $0x40] sm:$0xff]  ;;  %v341_v56 = vld [vmem:[%s972_s8 + $0x50] sm:$0xff]  ;;  %v344_v58 = vld [vmem:[%s972_s8 + $0x68] sm:$0xff] }
  0x39   : > { %721 = vmatpush3.msra.mxu0 %v356_v30  ;;  %786 = vmatpush3.msra.mxu1 %v356_v30  ;;  %v335_v59 = vld [vmem:[%s972_s8 + $0x20] sm:$0xff]  ;;  %v338_v61 = vld [vmem:[%s972_s8 + $0x38] sm:$0xff]  ;;  %v337_v63 = vld [vmem:[%s972_s8 + $0x30] sm:$0xff] }
  0x3a   : > { %722 = vmatprep.subr.mxu0 %v371_v31  ;;  %771 = vmatprep.subr.mxu1 %v371_v31  ;;  %v343_v60 = vld [vmem:[%s972_s8 + $0x60] sm:$0xff]  ;;  %v346_v62 = vld [vmem:[%s972_s8 + $0x78] sm:$0xff]  ;;  %v345_v0 = vld [vmem:[%s972_s8 + $0x70] sm:$0xff] }
  0x3b   : > { %723 = vmatpush3.msra.mxu0 %v355_v32  ;;  %787 = vmatpush3.msra.mxu1 %v355_v32  ;;  %v323_v3 = vld [vmem:[#allocation2 + $0x30] sm:$0xff]  ;;  %v327_v5 = vld [vmem:[#allocation2 + $0x8] sm:$0xff]  ;;  %v324_v13 = vld [vmem:[#allocation2] sm:$0xff] }
  0x3c   : > { %724 = vmatprep.subr.mxu0 %v370_v33  ;;  %772 = vmatprep.subr.mxu1 %v370_v33  ;;  %v328_v15 = vld [vmem:[#allocation2 + $0x20] sm:$0xff]  ;;  %v325_v23 = vld [vmem:[#allocation2 + $0x18] sm:$0xff]  ;;  %v329_v25 = vld [vmem:[#allocation2 + $0x28] sm:$0xff] }
  0x3d   : > { %725 = vmatpush3.msra.mxu0 %v354_v34  ;;  %788 = vmatpush3.msra.mxu1 %v354_v34  ;;  %v326_v33 = vld [vmem:[#allocation2 + $0x10] sm:$0xff] }
  0x3e   : > { %726 = vmatprep.subr.mxu0 %v369_v35  ;;  %773 = vmatprep.subr.mxu1 %v369_v35  ;;  %v330_v35 = vld [vmem:[#allocation2 + $0x38] sm:$0xff] }
  0x3f   : > { %727 = vmatpush3.msra.mxu0 %v353_v36  ;;  %789 = vmatpush3.msra.mxu1 %v353_v36 }
  0x40   : > { %728 = vmatprep.subr.mxu0 %v368_v37  ;;  %774 = vmatprep.subr.mxu1 %v368_v37 }
  0x41   : > { %729 = vmatpush3.msra.mxu0 %v352_v38  ;;  %790 = vmatpush3.msra.mxu1 %v352_v38 }
  0x42   : > { %730 = vmatprep.subr.mxu0 %v367_v39  ;;  %775 = vmatprep.subr.mxu1 %v367_v39 }
  0x43   : > { %731 = vmatpush3.msra.mxu0 %v351_v40  ;;  %791 = vmatpush3.msra.mxu1 %v351_v40 }
  0x44   : > { %732 = vmatprep.subr.mxu0 %v366_v41  ;;  %776 = vmatprep.subr.mxu1 %v366_v41 }
  0x45   : > { %733 = vmatpush3.msra.mxu0 %v350_v42  ;;  %792 = vmatpush3.msra.mxu1 %v350_v42 }
  0x46   : > { %734 = vmatprep.subr.mxu0 %v365_v43  ;;  %777 = vmatprep.subr.mxu1 %v365_v43 }
  0x47   : > { %735 = vmatpush3.msra.mxu0 %v349_v44  ;;  %793 = vmatpush3.msra.mxu1 %v349_v44 }
  0x48   : > { %736 = vmatprep.subr.mxu0 %v364_v45  ;;  %778 = vmatprep.subr.mxu1 %v364_v45 }
  0x49   : > { %737 = vmatpush3.msra.mxu0 %v348_v46  ;;  %794 = vmatpush3.msra.mxu1 %v348_v46 }
  0x4a   : > { %738 = vmatprep.subr.mxu0 %v363_v47  ;;  %779 = vmatprep.subr.mxu1 %v363_v47 }
  0x4b   : > { %739 = vmatpush3.msra.mxu0 %v347_v48  ;;  %795 = vmatpush3.msra.mxu1 %v347_v48 }
  0x4c   : > { %443 = vmatprep.mubr.f32.mxu0 %v332_v49  ;;  %463 = vmatprep.mubr.f32.mxu1 %v340_v50 }
  0x4d   : > { %444 = vmatmul.mubr.f32.vlgmr.msra.gmra.mxu0 %v331_v51  ;;  %464 = vmatmul.mubr.f32.vlgmr.msra.gmra.mxu1 %v339_v52 }
  0x4e   : > { %448 = vmatprep.mubr.f32.mxu0 %v334_v53  ;;  %468 = vmatprep.mubr.f32.mxu1 %v342_v54 }
  0x51   : > { %449 = vmatmul.mubr.f32.gmra.mxu0 %v333_v55  ;;  %469 = vmatmul.mubr.f32.gmra.mxu1 %v341_v56 }
  0x52   : > { %453 = vmatprep.mubr.f32.mxu0 %v336_v57  ;;  %473 = vmatprep.mubr.f32.mxu1 %v344_v58 }
  0x55   : > { %454 = vmatmul.mubr.f32.gmra.mxu0 %v335_v59  ;;  %474 = vmatmul.mubr.f32.gmra.mxu1 %v343_v60 }
  0x56   : > { %458 = vmatprep.mubr.f32.mxu0 %v338_v61  ;;  %478 = vmatprep.mubr.f32.mxu1 %v346_v62 }
  0x59   : > { %459 = vmatmul.mubr.f32.gmra.mxu0 %v337_v63  ;;  %479 = vmatmul.mubr.f32.gmra.mxu1 %v345_v0 }
 0x10d   : > { %v740_v1 = vpop.f32.mrf.mxu0  ;;  %v752_v2 = vpop.f32.mrf.mxu1 }
 0x10f   : > { %v741_v4 = vpop.f32.mrf.mxu0  ;;  %v753_v6 = vpop.f32.mrf.mxu1 }
 0x110   : > { %v742_v7 = vadd.f32 %v741_v4, %v740_v1  ;;  %v754_v8 = vadd.f32 %v753_v6, %v752_v2 }
 0x111   : > { %v743_v9 = vpop.f32.mrf.mxu0  ;;  %v755_v10 = vpop.f32.mrf.mxu1 }
 0x112   : > { %v484_v11 = vadd.f32 %v742_v7, %v323_v3  ;;  %v488_v12 = vadd.f32 %v754_v8, %v327_v5 }
 0x113   : > { %v744_v14 = vpop.f32.mrf.mxu0  ;;  %v756_v16 = vpop.f32.mrf.mxu1 }
 0x114   : > { %492 = vst [vmem:[#allocation2 + $0x30] sm:$0xff] %v484_v11  ;;  %496 = vst [vmem:[#allocation2 + $0x8] sm:$0xff] %v488_v12  ;;  %v745_v17 = vadd.f32 %v744_v14, %v743_v9  ;;  %v757_v18 = vadd.f32 %v756_v16, %v755_v10 }
 0x115   : > { %v746_v19 = vpop.f32.mrf.mxu0  ;;  %v758_v20 = vpop.f32.mrf.mxu1 }
 0x116   : > { %v485_v21 = vadd.f32 %v745_v17, %v324_v13  ;;  %v489_v22 = vadd.f32 %v757_v18, %v328_v15 }
 0x117   : > { %v747_v24 = vpop.f32.mrf.mxu0  ;;  %v759_v26 = vpop.f32.mrf.mxu1 }
 0x118   : > { %493 = vst [vmem:[#allocation2] sm:$0xff] %v485_v21  ;;  %497 = vst [vmem:[#allocation2 + $0x20] sm:$0xff] %v489_v22  ;;  %v748_v27 = vadd.f32 %v747_v24, %v746_v19  ;;  %v760_v28 = vadd.f32 %v759_v26, %v758_v20 }
 0x119   : > { %v749_v29 = vpop.f32.mrf.mxu0  ;;  %v761_v30 = vpop.f32.mrf.mxu1 }
 0x11a   : > { %v486_v31 = vadd.f32 %v748_v27, %v325_v23  ;;  %v490_v32 = vadd.f32 %v760_v28, %v329_v25 }
 0x11b   : > { %v750_v34 = vpop.f32.mrf.mxu0  ;;  %v762_v36 = vpop.f32.mrf.mxu1 }
 0x11c   : > { %494 = vst [vmem:[#allocation2 + $0x18] sm:$0xff] %v486_v31  ;;  %498 = vst [vmem:[#allocation2 + $0x28] sm:$0xff] %v490_v32  ;;  %v751_v37 = vadd.f32 %v750_v34, %v749_v29  ;;  %v763_v38 = vadd.f32 %v762_v36, %v761_v30  ;;  %503 = sbr.rel (%p702_p11) target bundleno = 430 (0x1ae), region = 63 }
 0x11e   : > { %v487_v39 = vadd.f32 %v751_v37, %v326_v33  ;;  %v491_v40 = vadd.f32 %v763_v38, %v330_v35 }
 0x120   : > { %495 = vst [vmem:[#allocation2 + $0x10] sm:$0xff] %v487_v39  ;;  %499 = vst [vmem:[#allocation2 + $0x38] sm:$0xff] %v491_v40 }
 0x121   : > { %v514_v41 = vld [vmem:[%s1089_s2 + $0x10] sm:$0xff]  ;;  %v512_v42 = vld [vmem:[%s1089_s2] sm:$0xff]  ;;  %v881_v43 = vmov 0   ;;  %v515_v44 = vld [vmem:[%s1089_s2 + $0x18] sm:$0xff] }
 0x122   : > { %839 = vset.pattern.permute.xlu1 %v881_v43  ;;  %838 = vset.pattern.permute.xlu0 %v881_v43  ;;  %v513_v45 = vld [vmem:[%s1089_s2 + $0x8] sm:$0xff]  ;;  %v516_v47 = vld [vmem:[%s1089_s2 + $0x20] sm:$0xff]  ;;  %v519_v48 = vld [vmem:[%s1089_s2 + $0x38] sm:$0xff] }
 0x123   : > { %532 = vperm.xlu1 %839, %v514_v41   ;;  %522 = vperm.xlu0 %838, %v512_v42   ;;  %v517_v46 = vld [vmem:[%s1089_s2 + $0x28] sm:$0xff]  ;;  %v518_v49 = vld [vmem:[%s1089_s2 + $0x30] sm:$0xff]  ;;  %v506_v50 = vld [vmem:[#allocation2 + $0x18] sm:$0xff] }
 0x124   : > { %v504_v51 = vld [vmem:[#allocation2 + $0x30] sm:$0xff]  ;;  %v505_v57 = vld [vmem:[#allocation2] sm:$0xff]  ;;  %v508_v63 = vld [vmem:[#allocation2 + $0x8] sm:$0xff] }
 0x125   : > { %v509_v62 = vld [vmem:[#allocation2 + $0x20] sm:$0xff]  ;;  %v510_v5 = vld [vmem:[#allocation2 + $0x28] sm:$0xff] }
 0x127   : > { %537 = vperm.xlu1 %839, %v515_v44   ;;  %527 = vperm.xlu0 %838, %v513_v45   ;;  %v507_v56 = vld [vmem:[#allocation2 + $0x10] sm:$0xff]  ;;  %v511_v4 = vld [vmem:[#allocation2 + $0x38] sm:$0xff] }
 0x12b   : > { %547 = vperm.xlu1 %839, %v517_v46   ;;  %542 = vperm.xlu0 %838, %v516_v47  }
 0x12f   : > { %557 = vperm.xlu1 %839, %v519_v48   ;;  %552 = vperm.xlu0 %838, %v518_v49  }
 0x19e   : > { %v533_v52 = vpop.permute.xlu1 %532  ;;  %v523_v53 = vpop.permute.xlu0 %522 }
 0x19f   : > { %v562_v54 = vadd.f32 %v533_v52, %v506_v50  ;;  %v560_v55 = vadd.f32 %v523_v53, %v504_v51 }
 0x1a1   : > { %570 = vst [vmem:[%s1090_s3 + $0x10] sm:$0xff] %v562_v54  ;;  %568 = vst [vmem:[%s1090_s3] sm:$0xff] %v560_v55 }
 0x1a2   : > { %v538_v58 = vpop.permute.xlu1 %537  ;;  %v528_v59 = vpop.permute.xlu0 %527 }
 0x1a3   : > { %v563_v60 = vadd.f32 %v538_v58, %v507_v56  ;;  %v561_v61 = vadd.f32 %v528_v59, %v505_v57 }
 0x1a5   : > { %571 = vst [vmem:[%s1090_s3 + $0x18] sm:$0xff] %v563_v60  ;;  %569 = vst [vmem:[%s1090_s3 + $0x8] sm:$0xff] %v561_v61 }
 0x1a6   : > { %v548_v0 = vpop.permute.xlu1 %547  ;;  %v543_v1 = vpop.permute.xlu0 %542 }
 0x1a7   : > { %v565_v2 = vadd.f32 %v548_v0, %v509_v62  ;;  %v564_v3 = vadd.f32 %v543_v1, %v508_v63 }
 0x1a9   : > { %573 = vst [vmem:[%s1090_s3 + $0x28] sm:$0xff] %v565_v2  ;;  %572 = vst [vmem:[%s1090_s3 + $0x20] sm:$0xff] %v564_v3 }
 0x1aa   : > { %v558_v6 = vpop.permute.xlu1 %557  ;;  %v553_v7 = vpop.permute.xlu0 %552 }
 0x1ab   : > { %v567_v8 = vadd.f32 %v558_v6, %v511_v4  ;;  %v566_v9 = vadd.f32 %v553_v7, %v510_v5 }
 0x1ad   : > { %575 = vst [vmem:[%s1090_s3 + $0x38] sm:$0xff] %v567_v8  ;;  %574 = vst [vmem:[%s1090_s3 + $0x30] sm:$0xff] %v566_v9 }
 0x1ae PF: > { %s13_s16 = sadd.s32 1, %s878_s16   ;;  %s1091_s12 = smov %s866_s13 }
 0x1af   : > { %p10_p12 = scmp.ge.s32.totalorder %s13_s16, 4   ;;  %s1092_s13 = smov %s937_s20 }
 0x1b0   : > { %s1093_s14 = smov %s874_s15  ;;  %s1094_s15 = smov %s1096_s17 }
 0x1b1   :  { %12 = sbr.rel (!%p10_p12) target bundleno = 3 (0x3), region = 104 }

// kernel: forward.19
= control target key start
LH: loop header
LB: loop body
LE: loop exit
PB: predicated region body
PF: predicated region fallthrough
CT: control target
= control target key end

     0   :  { %vm24_vm0 = vcmask 130048   ;;  %s712_s0 = inlined_call_operand.vmem [shape: f32[128,16], index: 0, kind: input, shape index: {}]   ;;  %s713_s1 = inlined_call_operand.vmem [shape: f32[128,16], index: 1, kind: output, shape index: {}]  }
   0x1   :  { %v362_v0 = vld [vmem:[%s712_s0 + $0x10] sm:$0xff]  ;;  %v367_v1 = vld [vmem:[%s712_s0] sm:$0xff]  ;;  %v372_v2 = vld [vmem:[%s712_s0 + $0x18] sm:$0xff] }
   0x2   :  { %v31_v3 = vsel %vm24_vm0, %v362_v0, 0.0  ;;  %v25_v4 = vsel %vm24_vm0, %v367_v1, 0.0  ;;  %v381_v5 = vld [vmem:[%s712_s0 + $0x8] sm:$0xff]  ;;  %v34_v6 = vsel %vm24_vm0, %v372_v2, 0.0  ;;  %v395_v9 = vld [vmem:[%s712_s0 + $0x20] sm:$0xff]  ;;  %v404_v12 = vld [vmem:[%s712_s0 + $0x38] sm:$0xff]  ;;  %v73_v33 = vmul.f32 %v367_v1, %v367_v1 }
   0x3   :  { %32 = vadd.xlane.f32.xlu1 %v31_v3  ;;  %26 = vadd.xlane.f32.xlu0 %v25_v4  ;;  %v28_v7 = vsel %vm24_vm0, %v381_v5, 0.0  ;;  %v390_v8 = vld [vmem:[%s712_s0 + $0x28] sm:$0xff]  ;;  %v37_v11 = vsel %vm24_vm0, %v395_v9, 0.0  ;;  %v409_v13 = vld [vmem:[%s712_s0 + $0x30] sm:$0xff]  ;;  %v46_v14 = vsel %vm24_vm0, %v404_v12, 0.0  ;;  %v423_v17 = vld [vmem:[%s712_s0 + $0x40] sm:$0xff]  ;;  %v74_v32 = vmul.f32 %v381_v5, %v381_v5 }
   0x4   :  { %v40_v10 = vsel %vm24_vm0, %v390_v8, 0.0  ;;  %v43_v15 = vsel %vm24_vm0, %v409_v13, 0.0  ;;  %v418_v16 = vld [vmem:[%s712_s0 + $0x48] sm:$0xff]  ;;  %v49_v19 = vsel %vm24_vm0, %v423_v17, 0.0  ;;  %v432_v20 = vld [vmem:[%s712_s0 + $0x58] sm:$0xff]  ;;  %v437_v21 = vld [vmem:[%s712_s0 + $0x50] sm:$0xff]  ;;  %v76_v36 = vmul.f32 %v372_v2, %v372_v2 }
   0x5   :  { %v52_v18 = vsel %vm24_vm0, %v418_v16, 0.0  ;;  %v58_v22 = vsel %vm24_vm0, %v432_v20, 0.0  ;;  %v55_v23 = vsel %vm24_vm0, %v437_v21, 0.0  ;;  %v446_v24 = vld [vmem:[%s712_s0 + $0x68] sm:$0xff]  ;;  %v451_v25 = vld [vmem:[%s712_s0 + $0x60] sm:$0xff]  ;;  %v460_v28 = vld [vmem:[%s712_s0 + $0x78] sm:$0xff]  ;;  %v75_v37 = vmul.f32 %v362_v0, %v362_v0 }
   0x6   :  { %v64_v26 = vsel %vm24_vm0, %v446_v24, 0.0  ;;  %v61_v27 = vsel %vm24_vm0, %v451_v25, 0.0  ;;  %v465_v29 = vld [vmem:[%s712_s0 + $0x70] sm:$0xff]  ;;  %v70_v30 = vsel %vm24_vm0, %v460_v28, 0.0  ;;  %v92_v34 = vsel %vm24_vm0, %v74_v32, 0.0 }
   0x7   :  { %35 = vadd.xlane.f32.xlu1 %v34_v6  ;;  %29 = vadd.xlane.f32.xlu0 %v28_v7  ;;  %v67_v31 = vsel %vm24_vm0, %v465_v29, 0.0  ;;  %v89_v35 = vsel %vm24_vm0, %v73_v33, 0.0  ;;  %v98_v38 = vsel %vm24_vm0, %v76_v36, 0.0  ;;  %v95_v39 = vsel %vm24_vm0, %v75_v37, 0.0 }
   0x8   :  { %v78_v40 = vmul.f32 %v390_v8, %v390_v8  ;;  %v77_v41 = vmul.f32 %v395_v9, %v395_v9  ;;  %v80_v44 = vmul.f32 %v404_v12, %v404_v12  ;;  %v79_v45 = vmul.f32 %v409_v13, %v409_v13 }
   0x9   :  { %v82_v48 = vmul.f32 %v418_v16, %v418_v16  ;;  %v81_v49 = vmul.f32 %v423_v17, %v423_v17  ;;  %v84_v52 = vmul.f32 %v432_v20, %v432_v20  ;;  %v83_v53 = vmul.f32 %v437_v21, %v437_v21 }
   0xa   :  { %v104_v42 = vsel %vm24_vm0, %v78_v40, 0.0  ;;  %v101_v43 = vsel %vm24_vm0, %v77_v41, 0.0  ;;  %v110_v46 = vsel %vm24_vm0, %v80_v44, 0.0  ;;  %v107_v47 = vsel %vm24_vm0, %v79_v45, 0.0 }
   0xb   :  { %41 = vadd.xlane.f32.xlu1 %v40_v10  ;;  %38 = vadd.xlane.f32.xlu0 %v37_v11  ;;  %v116_v50 = vsel %vm24_vm0, %v82_v48, 0.0  ;;  %v113_v51 = vsel %vm24_vm0, %v81_v49, 0.0  ;;  %v122_v54 = vsel %vm24_vm0, %v84_v52, 0.0  ;;  %v119_v55 = vsel %vm24_vm0, %v83_v53, 0.0 }
   0xc   :  { %v86_v56 = vmul.f32 %v446_v24, %v446_v24  ;;  %v85_v57 = vmul.f32 %v451_v25, %v451_v25  ;;  %v88_v60 = vmul.f32 %v460_v28, %v460_v28  ;;  %v87_v61 = vmul.f32 %v465_v29, %v465_v29 }
   0xe   :  { %v128_v58 = vsel %vm24_vm0, %v86_v56, 0.0  ;;  %v125_v59 = vsel %vm24_vm0, %v85_v57, 0.0  ;;  %v134_v62 = vsel %vm24_vm0, %v88_v60, 0.0  ;;  %v131_v63 = vsel %vm24_vm0, %v87_v61, 0.0 }
   0xf   :  { %47 = vadd.xlane.f32.xlu1 %v46_v14  ;;  %44 = vadd.xlane.f32.xlu0 %v43_v15 }
  0x13   :  { %53 = vadd.xlane.f32.xlu1 %v52_v18  ;;  %50 = vadd.xlane.f32.xlu0 %v49_v19 }
  0x17   :  { %59 = vadd.xlane.f32.xlu1 %v58_v22  ;;  %56 = vadd.xlane.f32.xlu0 %v55_v23 }
  0x1b   :  { %65 = vadd.xlane.f32.xlu1 %v64_v26  ;;  %62 = vadd.xlane.f32.xlu0 %v61_v27 }
  0x1f   :  { %71 = vadd.xlane.f32.xlu1 %v70_v30  ;;  %68 = vadd.xlane.f32.xlu0 %v67_v31 }
  0x23   :  { %93 = vadd.xlane.f32.xlu1 %v92_v34  ;;  %90 = vadd.xlane.f32.xlu0 %v89_v35 }
  0x27   :  { %99 = vadd.xlane.f32.xlu1 %v98_v38  ;;  %96 = vadd.xlane.f32.xlu0 %v95_v39 }
  0x2b   :  { %105 = vadd.xlane.f32.xlu1 %v104_v42  ;;  %102 = vadd.xlane.f32.xlu0 %v101_v43 }
  0x2f   :  { %111 = vadd.xlane.f32.xlu1 %v110_v46  ;;  %108 = vadd.xlane.f32.xlu0 %v107_v47 }
  0x33   :  { %117 = vadd.xlane.f32.xlu1 %v116_v50  ;;  %114 = vadd.xlane.f32.xlu0 %v113_v51 }
  0x37   :  { %123 = vadd.xlane.f32.xlu1 %v122_v54  ;;  %120 = vadd.xlane.f32.xlu0 %v119_v55 }
  0x3b   :  { %129 = vadd.xlane.f32.xlu1 %v128_v58  ;;  %126 = vadd.xlane.f32.xlu0 %v125_v59 }
  0x3f   :  { %135 = vadd.xlane.f32.xlu1 %v134_v62  ;;  %132 = vadd.xlane.f32.xlu0 %v131_v63 }
  0x8c   :  { %v33_v3 = vpop.xlane.xlu1 %32  ;;  %v27_v4 = vpop.xlane.xlu0 %26 }
  0x8d   :  { %v531_v32 = vmul.f32 0.0625, %v27_v4  ;;  %v535_v34 = vmul.f32 0.0625, %v33_v3 }
  0x8f   :  { %v169_v38 = vmul.f32 %v531_v32, %v531_v32  ;;  %v171_v44 = vmul.f32 %v535_v34, %v535_v34  ;;  %v219_v58 = vsub.f32 %v362_v0, %v535_v34 }
  0x90   :  { %v36_v6 = vpop.xlane.xlu1 %35  ;;  %v30_v7 = vpop.xlane.xlu0 %29 }
  0x91   :  { %v533_v33 = vmul.f32 0.0625, %v30_v7  ;;  %v537_v35 = vmul.f32 0.0625, %v36_v6  ;;  %v217_v7 = vsub.f32 %v367_v1, %v531_v32 }
  0x93   :  { %v170_v39 = vmul.f32 %v533_v33, %v533_v33  ;;  %v172_v45 = vmul.f32 %v537_v35, %v537_v35 }
  0x94   :  { %v42_v10 = vpop.xlane.xlu1 %41  ;;  %v39_v11 = vpop.xlane.xlu0 %38 }
  0x95   :  { %v547_v46 = vmul.f32 0.0625, %v42_v10  ;;  %v549_v53 = vmul.f32 0.0625, %v39_v11 }
  0x97   :  { %v174_v59 = vmul.f32 %v547_v46, %v547_v46  ;;  %v173_v10 = vmul.f32 %v549_v53, %v549_v53 }
  0x98   :  { %v48_v14 = vpop.xlane.xlu1 %47  ;;  %v45_v15 = vpop.xlane.xlu0 %44 }
  0x99   :  { %v555_v60 = vmul.f32 0.0625, %v48_v14  ;;  %v557_v61 = vmul.f32 0.0625, %v45_v15  ;;  %v220_v14 = vsub.f32 %v372_v2, %v537_v35 }
  0x9c   :  { %v54_v18 = vpop.xlane.xlu1 %53  ;;  %v51_v19 = vpop.xlane.xlu0 %50 }
  0xa0   :  { %v519_v22 = vpop.xlane.xlu1 %59  ;;  %v521_v23 = vpop.xlane.xlu0 %56 }
  0xa4   :  { %v523_v26 = vpop.xlane.xlu1 %65  ;;  %v525_v27 = vpop.xlane.xlu0 %62 }
  0xa8   :  { %v527_v30 = vpop.xlane.xlu1 %71  ;;  %v529_v31 = vpop.xlane.xlu0 %68 }
  0xac   :  { %v94_v36 = vpop.xlane.xlu1 %93  ;;  %v91_v37 = vpop.xlane.xlu0 %90 }
  0xad   :  { %v154_v40 = vmul.f32 0.0625, %v94_v36  ;;  %v153_v41 = vmul.f32 0.0625, %v91_v37 }
  0xaf   :  { %v186_v42 = vsub.f32 %v154_v40, %v170_v39  ;;  %v185_v43 = vsub.f32 %v153_v41, %v169_v38  ;;  %v176_v38 = vmul.f32 %v555_v60, %v555_v60  ;;  %v175_v39 = vmul.f32 %v557_v61, %v557_v61 }
  0xb0   :  { %v100_v47 = vpop.xlane.xlu1 %99  ;;  %v97_v48 = vpop.xlane.xlu0 %96  ;;  %v569_v40 = vmul.f32 0.0625, %v54_v18 }
  0xb1   :  { %v202_v49 = vmax.f32 %v186_v42, 0.0  ;;  %v201_v50 = vmax.f32 %v185_v43, 0.0  ;;  %v156_v51 = vmul.f32 0.0625, %v100_v47  ;;  %v155_v52 = vmul.f32 0.0625, %v97_v48 }
  0xb2   :  { %v218_v48 = vsub.f32 %v381_v5, %v533_v33 }
  0xb3   :  { %v234_v54 = vadd.f32 1e-05, %v202_v49  ;;  %v233_v55 = vadd.f32 1e-05, %v201_v50  ;;  %v188_v56 = vsub.f32 %v156_v51, %v172_v45  ;;  %v187_v57 = vsub.f32 %v155_v52, %v171_v44 }
  0xb4   :  { %v106_v62 = vpop.xlane.xlu1 %105  ;;  %v103_v63 = vpop.xlane.xlu0 %102  ;;  %v573_v49 = vmul.f32 0.0625, %v51_v19  ;;  %v222_v51 = vsub.f32 %v390_v8, %v547_v46 }
  0xb5   :  { %317 = vrsqrt.f32 %v234_v54  ;;  %v204_v3 = vmax.f32 %v188_v56, 0.0  ;;  %v203_v4 = vmax.f32 %v187_v57, 0.0  ;;  %v158_v6 = vmul.f32 0.0625, %v106_v62 }
  0xb6   :  { %319 = vrsqrt.f32 %v233_v55  ;;  %v157_v11 = vmul.f32 0.0625, %v103_v63  ;;  %v178_v55 = vmul.f32 %v569_v40, %v569_v40  ;;  %v580_v56 = vmul.f32 0.0625, %v519_v22 }
  0xb7   :  { %v236_v36 = vadd.f32 1e-05, %v204_v3  ;;  %v235_v15 = vadd.f32 1e-05, %v203_v4  ;;  %v190_v37 = vsub.f32 %v158_v6, %v174_v59  ;;  %v583_v57 = vmul.f32 0.0625, %v521_v23 }
  0xb8   :  { %v189_v41 = vsub.f32 %v157_v11, %v173_v10  ;;  %v112_v42 = vpop.xlane.xlu1 %111  ;;  %v109_v43 = vpop.xlane.xlu0 %108  ;;  %v177_v3 = vmul.f32 %v573_v49, %v573_v49  ;;  %v588_v4 = vmul.f32 0.0625, %v523_v26  ;;  %v221_v22 = vsub.f32 %v395_v9, %v549_v53 }
  0xb9   :  { %321 = vrsqrt.f32 %v236_v36  ;;  %v206_v44 = vmax.f32 %v190_v37, 0.0  ;;  %v160_v45 = vmul.f32 0.0625, %v112_v42  ;;  %v159_v47 = vmul.f32 0.0625, %v109_v43 }
  0xba   :  { %323 = vrsqrt.f32 %v235_v15  ;;  %v205_v50 = vmax.f32 %v189_v41, 0.0  ;;  %v180_v36 = vmul.f32 %v580_v56, %v580_v56  ;;  %v179_v15 = vmul.f32 %v583_v57, %v583_v57 }
  0xbb   :  { %v238_v52 = vadd.f32 1e-05, %v206_v44  ;;  %v192_v18 = vsub.f32 %v160_v45, %v176_v38  ;;  %v191_v54 = vsub.f32 %v159_v47, %v175_v39  ;;  %v597_v37 = vmul.f32 0.0625, %v525_v27 }
  0xbc   :  { %v237_v5 = vadd.f32 1e-05, %v205_v50  ;;  %v118_v19 = vpop.xlane.xlu1 %117  ;;  %v115_v33 = vpop.xlane.xlu0 %114  ;;  %v182_v45 = vmul.f32 %v588_v4, %v588_v4  ;;  %v602_v47 = vmul.f32 0.0625, %v527_v30 }
  0xbd   :  { %325 = vrsqrt.f32 %v238_v52  ;;  %v208_v59 = vmax.f32 %v192_v18, 0.0  ;;  %v207_v62 = vmax.f32 %v191_v54, 0.0  ;;  %v162_v63 = vmul.f32 0.0625, %v118_v19 }
  0xbe   :  { %327 = vrsqrt.f32 %v237_v5  ;;  %v161_v6 = vmul.f32 0.0625, %v115_v33  ;;  %v181_v5 = vmul.f32 %v597_v37, %v597_v37  ;;  %v607_v19 = vmul.f32 0.0625, %v529_v31 }
  0xbf   :  { %v240_v23 = vadd.f32 1e-05, %v208_v59  ;;  %v239_v10 = vadd.f32 1e-05, %v207_v62  ;;  %v194_v11 = vsub.f32 %v162_v63, %v178_v55  ;;  %v184_v31 = vmul.f32 %v602_v47, %v602_v47 }
  0xc0   :  { %v193_v38 = vsub.f32 %v161_v6, %v177_v3  ;;  %v124_v26 = vpop.xlane.xlu1 %123  ;;  %v121_v39 = vpop.xlane.xlu0 %120 }
  0xc1   :  { %329 = vrsqrt.f32 %v240_v23  ;;  %v210_v41 = vmax.f32 %v194_v11, 0.0  ;;  %v164_v42 = vmul.f32 0.0625, %v124_v26  ;;  %v163_v43 = vmul.f32 0.0625, %v121_v39 }
  0xc2   :  { %v318_v44 = vpop.eup %317  ;;  %331 = vrsqrt.f32 %v239_v10  ;;  %v209_v50 = vmax.f32 %v193_v38, 0.0 }
  0xc3   :  { %v320_v52 = vpop.eup %319  ;;  %v266_v18 = vmul.f32 %v318_v44, %v218_v48  ;;  %v242_v27 = vadd.f32 1e-05, %v210_v41  ;;  %v196_v54 = vsub.f32 %v164_v42, %v180_v36  ;;  %v195_v55 = vsub.f32 %v163_v43, %v179_v15 }
  0xc4   :  { %v265_v33 = vmul.f32 %v320_v52, %v217_v7  ;;  %v241_v59 = vadd.f32 1e-05, %v209_v50  ;;  %v130_v30 = vpop.xlane.xlu1 %129  ;;  %v127_v62 = vpop.xlane.xlu0 %126  ;;  %v183_v15 = vmul.f32 %v607_v19, %v607_v19 }
  0xc5   :  { %v282_v63 = vmax.f32 %v266_v18, 0.0  ;;  %333 = vrsqrt.f32 %v242_v27  ;;  %v212_v3 = vmax.f32 %v196_v54, 0.0  ;;  %v211_v48 = vmax.f32 %v195_v55, 0.0 }
  0xc6   :  { %v322_v6 = vpop.eup %321  ;;  %v281_v23 = vmax.f32 %v265_v33, 0.0  ;;  %335 = vrsqrt.f32 %v241_v59  ;;  %v166_v10 = vmul.f32 0.0625, %v130_v30  ;;  %v165_v11 = vmul.f32 0.0625, %v127_v62 }
  0xc7   :  { %v324_v36 = vpop.eup %323  ;;  %298 = vst.msk [vmem:[%s713_s1 + $0x8] sm:$0xff] %vm24_vm0, %v282_v63  ;;  %v268_v1 = vmul.f32 %v322_v6, %v220_v14  ;;  %v244_v32 = vadd.f32 1e-05, %v212_v3  ;;  %v243_v7 = vadd.f32 1e-05, %v211_v48  ;;  %v224_v55 = vsub.f32 %v404_v12, %v555_v60 }
  0xc8   :  { %297 = vst.msk [vmem:[%s713_s1] sm:$0xff] %vm24_vm0, %v281_v23  ;;  %v267_v38 = vmul.f32 %v324_v36, %v219_v58  ;;  %v198_v26 = vsub.f32 %v166_v10, %v182_v45  ;;  %v197_v39 = vsub.f32 %v165_v11, %v181_v5  ;;  %v136_v41 = vpop.xlane.xlu1 %135  ;;  %v133_v42 = vpop.xlane.xlu0 %132  ;;  %v225_v62 = vsub.f32 %v423_v17, %v573_v49 }
  0xc9   :  { %v284_v2 = vmax.f32 %v268_v1, 0.0  ;;  %337 = vrsqrt.f32 %v244_v32  ;;  %v168_v35 = vmul.f32 0.0625, %v136_v41  ;;  %v167_v14 = vmul.f32 0.0625, %v133_v42 }
  0xca   :  { %v326_v43 = vpop.eup %325  ;;  %v283_v44 = vmax.f32 %v267_v38, 0.0  ;;  %339 = vrsqrt.f32 %v243_v7  ;;  %v214_v50 = vmax.f32 %v198_v26, 0.0  ;;  %v213_v52 = vmax.f32 %v197_v39, 0.0 }
  0xcb   :  { %v328_v18 = vpop.eup %327  ;;  %300 = vst.msk [vmem:[%s713_s1 + $0x18] sm:$0xff] %vm24_vm0, %v284_v2  ;;  %v270_v0 = vmul.f32 %v326_v43, %v222_v51  ;;  %v200_v34 = vsub.f32 %v168_v35, %v184_v31  ;;  %v199_v58 = vsub.f32 %v167_v14, %v183_v15  ;;  %v223_v51 = vsub.f32 %v409_v13, %v557_v61 }
  0xcc   :  { %299 = vst.msk [vmem:[%s713_s1 + $0x10] sm:$0xff] %vm24_vm0, %v283_v44  ;;  %v269_v45 = vmul.f32 %v328_v18, %v221_v22  ;;  %v246_v27 = vadd.f32 1e-05, %v214_v50  ;;  %v245_v54 = vadd.f32 1e-05, %v213_v52  ;;  %v226_v13 = vsub.f32 %v418_v16, %v569_v40 }
  0xcd   :  { %v286_v5 = vmax.f32 %v270_v0, 0.0  ;;  %v216_v33 = vmax.f32 %v200_v34, 0.0  ;;  %v215_v8 = vmax.f32 %v199_v58, 0.0  ;;  %v228_v40 = vsub.f32 %v432_v20, %v580_v56 }
  0xce   :  { %v330_v46 = vpop.eup %329  ;;  %v285_v59 = vmax.f32 %v269_v45, 0.0  ;;  %341 = vrsqrt.f32 %v246_v27  ;;  %v227_v49 = vsub.f32 %v437_v21, %v583_v57  ;;  %v230_v56 = vsub.f32 %v446_v24, %v588_v4 }
  0xcf   :  { %v332_v30 = vpop.eup %331  ;;  %302 = vst.msk [vmem:[%s713_s1 + $0x28] sm:$0xff] %vm24_vm0, %v286_v5  ;;  %v272_v9 = vmul.f32 %v330_v46, %v224_v55  ;;  %343 = vrsqrt.f32 %v245_v54  ;;  %v248_v53 = vadd.f32 1e-05, %v216_v33  ;;  %v247_v22 = vadd.f32 1e-05, %v215_v8 }
  0xd0   :  { %301 = vst.msk [vmem:[%s713_s1 + $0x20] sm:$0xff] %vm24_vm0, %v285_v59  ;;  %v271_v12 = vmul.f32 %v332_v30, %v223_v51  ;;  %v229_v57 = vsub.f32 %v451_v25, %v597_v37  ;;  %v232_v24 = vsub.f32 %v460_v28, %v602_v47  ;;  %v231_v25 = vsub.f32 %v465_v29, %v607_v19 }
  0xd1   :  { %v288_v60 = vmax.f32 %v272_v9, 0.0  ;;  %345 = vrsqrt.f32 %v248_v53 }
  0xd2   :  { %v334_v61 = vpop.eup %333  ;;  %v287_v63 = vmax.f32 %v271_v12, 0.0  ;;  %347 = vrsqrt.f32 %v247_v22 }
  0xd3   :  { %v336_v3 = vpop.eup %335  ;;  %304 = vst.msk [vmem:[%s713_s1 + $0x38] sm:$0xff] %vm24_vm0, %v288_v60  ;;  %v274_v48 = vmul.f32 %v334_v61, %v226_v13 }
  0xd4   :  { %303 = vst.msk [vmem:[%s713_s1 + $0x30] sm:$0xff] %vm24_vm0, %v287_v63  ;;  %v273_v16 = vmul.f32 %v336_v3, %v225_v62 }
  0xd5   :  { %v290_v6 = vmax.f32 %v274_v48, 0.0 }
  0xd6   :  { %v338_v17 = vpop.eup %337  ;;  %v289_v23 = vmax.f32 %v273_v16, 0.0 }
  0xd7   :  { %v340_v10 = vpop.eup %339  ;;  %306 = vst.msk [vmem:[%s713_s1 + $0x48] sm:$0xff] %vm24_vm0, %v290_v6  ;;  %v276_v11 = vmul.f32 %v338_v17, %v228_v40 }
  0xd8   :  { %305 = vst.msk [vmem:[%s713_s1 + $0x40] sm:$0xff] %vm24_vm0, %v289_v23  ;;  %v275_v36 = vmul.f32 %v340_v10, %v227_v49 }
  0xd9   :  { %v292_v20 = vmax.f32 %v276_v11, 0.0 }
  0xda   :  { %v291_v31 = vmax.f32 %v275_v36, 0.0 }
  0xdb   :  { %v342_v21 = vpop.eup %341  ;;  %308 = vst.msk [vmem:[%s713_s1 + $0x58] sm:$0xff] %vm24_vm0, %v292_v20 }
  0xdc   :  { %v344_v1 = vpop.eup %343  ;;  %307 = vst.msk [vmem:[%s713_s1 + $0x50] sm:$0xff] %vm24_vm0, %v291_v31  ;;  %v278_v32 = vmul.f32 %v342_v21, %v230_v56 }
  0xdd   :  { %v277_v4 = vmul.f32 %v344_v1, %v229_v57 }
  0xde   :  { %v346_v7 = vpop.eup %345  ;;  %v294_v37 = vmax.f32 %v278_v32, 0.0 }
  0xdf   :  { %v348_v15 = vpop.eup %347  ;;  %v293_v38 = vmax.f32 %v277_v4, 0.0  ;;  %v280_v26 = vmul.f32 %v346_v7, %v232_v24 }
  0xe0   :  { %310 = vst.msk [vmem:[%s713_s1 + $0x68] sm:$0xff] %vm24_vm0, %v294_v37  ;;  %v279_v39 = vmul.f32 %v348_v15, %v231_v25 }
  0xe1   :  { %309 = vst.msk [vmem:[%s713_s1 + $0x60] sm:$0xff] %vm24_vm0, %v293_v38  ;;  %v296_v28 = vmax.f32 %v280_v26, 0.0 }
  0xe2   :  { %v295_v47 = vmax.f32 %v279_v39, 0.0 }
  0xe3   :  { %312 = vst.msk [vmem:[%s713_s1 + $0x78] sm:$0xff] %vm24_vm0, %v296_v28 }
  0xe4   :  { %311 = vst.msk [vmem:[%s713_s1 + $0x70] sm:$0xff] %vm24_vm0, %v295_v47 }

// kernel: forward.20
= control target key start
LH: loop header
LB: loop body
LE: loop exit
PB: predicated region body
PF: predicated region fallthrough
CT: control target
= control target key end

     0   :  { %s1118_s12 = smov 0   ;;  %s1120_s13 = smov 0   ;;  %s1417_s0 = inlined_call_operand.vmem [shape: f32[128,1024], index: 0, kind: input, shape index: {}]   ;;  %s1418_s1 = inlined_call_operand.vmem [shape: f32[1024,128], index: 1, kind: input, shape index: {}]   ;;  %s1419_s2 = inlined_call_operand.vmem [shape: f32[128,1], index: 2, kind: input, shape index: {}]   ;;  %s1420_s3 = inlined_call_operand.vmem [shape: f32[128,128], index: 3, kind: output, shape index: {}]  }
   0x1   :  { %s1122_s14 = smov 0   ;;  %s1124_s15 = smov 0  }
   0x2   :  { %s1126_s16 = smov 0  }
   0x3 LB: > { %s25_s17 = sadd.s32 1, %s1090_s15  ;;  %p48_p1 = scmp.ne.s32.totalorder %s1082_s13, %s1078_s12  ;;  %s1094_s16 = sphi %s1126_s16, %s13_s16   ;;  %s1090_s15 = sphi %s1124_s15, %s1424_s15   ;;  %s1086_s14 = sphi %s1122_s14, %s1423_s14   ;;  %s1082_s13 = sphi %s1120_s13, %s1422_s13   ;;  %s1078_s12 = sphi %s1118_s12, %s1421_s12  }
   0x4   : > { %p26_p0 = scmp.ge.s32.totalorder %s25_s17, 4  ;;  %p49_p2 = scmp.eq.s32.totalorder %s1094_s16, 0 }
   0x5   : > { %s41_s19 = sadd.s32 1, %s1082_s13  ;;  %p885_p5 = scmp.ge.s32.totalorder %s1094_s16, 4 }
   0x6   : > { %s1426_s17 = smov (%p26_p0, %s25_s17), 0  ;;  %p50_p3 = por %p49_p2, %p48_p1 }
   0x7   : > { %s37_s18 = ssub.s32 %s1090_s15, %s1426_s17  ;;  %165 = sbr.rel (%p885_p5) target bundleno = 32 (0x20), region = 20 }
   0x8   : > { %p39_p4 = scmp.eq.s32.totalorder %s37_s18, 0 }
   0xa   : > { %s1153_s20 = scalar_select %p39_p4, %s1082_s13, %s41_s19  }
   0xc   : > { %168 = sbr.rel (!%p50_p3) target bundleno = 32 (0x20), region = 24  ;;  %s170_s21 = sand.u32 (%p50_p3), 1, %s1082_s13  }
   0xd   : > { %s899_s22 = sshll.u32 (%p50_p3), %s1090_s15, 4  ;;  %s886_s23 = sshll.u32 (%p50_p3), %s170_s21, 8 }
   0xe   : > { %s1161_s26 = scalar_lea.vmem (%p50_p3), %s1417_s0, %s899_s22  ;;  %s1166_s27 = scalar_lea.vmem (%p50_p3), [#allocation3], %s886_s23 }
   0xf   : > { %v191_v0 = vld [vmem:[%s1161_s26] sm:$0xff] (%p50_p3)  ;;  %v193_v1 = vld [vmem:[%s1161_s26 + $0x8] sm:$0xff] (%p50_p3) }
  0x10   : > { %v195_v2 = vld [vmem:[%s1161_s26 + $0x40] sm:$0xff] (%p50_p3)  ;;  %192 = vst [vmem:[%s1166_s27] sm:$0xff] (%p50_p3), %v191_v0  ;;  %194 = vst [vmem:[%s1166_s27 + $0x8] sm:$0xff] (%p50_p3), %v193_v1  ;;  %v197_v3 = vld [vmem:[%s1161_s26 + $0x48] sm:$0xff] (%p50_p3) }
  0x11   : > { %196 = vst [vmem:[%s1166_s27 + $0x10] sm:$0xff] %v195_v2  ;;  %v199_v4 = vld [vmem:[%s1161_s26 + $0x80] sm:$0xff]  ;;  %v201_v5 = vld [vmem:[%s1161_s26 + $0x88] sm:$0xff]  ;;  %198 = vst [vmem:[%s1166_s27 + $0x18] sm:$0xff] %v197_v3 }
  0x12   : > { %200 = vst [vmem:[%s1166_s27 + $0x20] sm:$0xff] %v199_v4  ;;  %202 = vst [vmem:[%s1166_s27 + $0x28] sm:$0xff] %v201_v5  ;;  %v203_v6 = vld [vmem:[%s1161_s26 + $0xc0] sm:$0xff]  ;;  %v205_v7 = vld [vmem:[%s1161_s26 + $0xc8] sm:$0xff] }
  0x13   : > { %v207_v8 = vld [vmem:[%s1161_s26 + $0x100] sm:$0xff]  ;;  %204 = vst [vmem:[%s1166_s27 + $0x30] sm:$0xff] %v203_v6  ;;  %206 = vst [vmem:[%s1166_s27 + $0x38] sm:$0xff] %v205_v7  ;;  %v209_v9 = vld [vmem:[%s1161_s26 + $0x108] sm:$0xff] }
  0x14   : > { %208 = vst [vmem:[%s1166_s27 + $0x40] sm:$0xff] %v207_v8  ;;  %v211_v10 = vld [vmem:[%s1161_s26 + $0x140] sm:$0xff]  ;;  %v213_v11 = vld [vmem:[%s1161_s26 + $0x148] sm:$0xff]  ;;  %210 = vst [vmem:[%s1166_s27 + $0x48] sm:$0xff] %v209_v9 }
  0x15   : > { %212 = vst [vmem:[%s1166_s27 + $0x50] sm:$0xff] %v211_v10  ;;  %214 = vst [vmem:[%s1166_s27 + $0x58] sm:$0xff] %v213_v11  ;;  %v215_v12 = vld [vmem:[%s1161_s26 + $0x180] sm:$0xff]  ;;  %v217_v13 = vld [vmem:[%s1161_s26 + $0x188] sm:$0xff] }
  0x16   : > { %v219_v14 = vld [vmem:[%s1161_s26 + $0x1c0] sm:$0xff]  ;;  %216 = vst [vmem:[%s1166_s27 + $0x60] sm:$0xff] %v215_v12  ;;  %218 = vst [vmem:[%s1166_s27 + $0x68] sm:$0xff] %v217_v13  ;;  %v221_v15 = vld [vmem:[%s1161_s26 + $0x1c8] sm:$0xff] }
  0x17   : > { %220 = vst [vmem:[%s1166_s27 + $0x70] sm:$0xff] %v219_v14  ;;  %v223_v16 = vld [vmem:[%s1161_s26 + $0x200] sm:$0xff]  ;;  %v225_v17 = vld [vmem:[%s1161_s26 + $0x208] sm:$0xff]  ;;  %222 = vst [vmem:[%s1166_s27 + $0x78] sm:$0xff] %v221_v15 }
  0x18   : > { %224 = vst [vmem:[%s1166_s27 + $0x80] sm:$0xff] %v223_v16  ;;  %226 = vst [vmem:[%s1166_s27 + $0x88] sm:$0xff] %v225_v17  ;;  %v227_v18 = vld [vmem:[%s1161_s26 + $0x240] sm:$0xff]  ;;  %v229_v19 = vld [vmem:[%s1161_s26 + $0x248] sm:$0xff] }
  0x19   : > { %v231_v20 = vld [vmem:[%s1161_s26 + $0x280] sm:$0xff]  ;;  %228 = vst [vmem:[%s1166_s27 + $0x90] sm:$0xff] %v227_v18  ;;  %230 = vst [vmem:[%s1166_s27 + $0x98] sm:$0xff] %v229_v19  ;;  %v233_v21 = vld [vmem:[%s1161_s26 + $0x288] sm:$0xff] }
  0x1a   : > { %232 = vst [vmem:[%s1166_s27 + $0xa0] sm:$0xff] %v231_v20  ;;  %v235_v22 = vld [vmem:[%s1161_s26 + $0x2c0] sm:$0xff]  ;;  %v237_v23 = vld [vmem:[%s1161_s26 + $0x2c8] sm:$0xff]  ;;  %234 = vst [vmem:[%s1166_s27 + $0xa8] sm:$0xff] %v233_v21 }
  0x1b   : > { %236 = vst [vmem:[%s1166_s27 + $0xb0] sm:$0xff] %v235_v22  ;;  %238 = vst [vmem:[%s1166_s27 + $0xb8] sm:$0xff] %v237_v23  ;;  %v239_v24 = vld [vmem:[%s1161_s26 + $0x300] sm:$0xff]  ;;  %v241_v25 = vld [vmem:[%s1161_s26 + $0x308] sm:$0xff] }
  0x1c   : > { %v243_v26 = vld [vmem:[%s1161_s26 + $0x340] sm:$0xff]  ;;  %240 = vst [vmem:[%s1166_s27 + $0xc0] sm:$0xff] %v239_v24  ;;  %242 = vst [vmem:[%s1166_s27 + $0xc8] sm:$0xff] %v241_v25  ;;  %v245_v27 = vld [vmem:[%s1161_s26 + $0x348] sm:$0xff] }
  0x1d   : > { %244 = vst [vmem:[%s1166_s27 + $0xd0] sm:$0xff] %v243_v26  ;;  %v247_v28 = vld [vmem:[%s1161_s26 + $0x380] sm:$0xff]  ;;  %v249_v29 = vld [vmem:[%s1161_s26 + $0x388] sm:$0xff]  ;;  %246 = vst [vmem:[%s1166_s27 + $0xd8] sm:$0xff] %v245_v27 }
  0x1e   : > { %248 = vst [vmem:[%s1166_s27 + $0xe0] sm:$0xff] %v247_v28  ;;  %250 = vst [vmem:[%s1166_s27 + $0xe8] sm:$0xff] %v249_v29  ;;  %v251_v30 = vld [vmem:[%s1161_s26 + $0x3c0] sm:$0xff]  ;;  %v253_v31 = vld [vmem:[%s1161_s26 + $0x3c8] sm:$0xff] }
  0x1f   : > { %252 = vst [vmem:[%s1166_s27 + $0xf0] sm:$0xff] %v251_v30  ;;  %254 = vst [vmem:[%s1166_s27 + $0xf8] sm:$0xff] %v253_v31 }
  0x20 PF: > { %p889_p6 = scmp.ge.s32.totalorder %s1094_s16, 1  ;;  %p271_p7 = scmp.lt.s32.totalorder %s1094_s16, 5 }
  0x22   : > { %p272_p8 = pnand %p889_p6, %p271_p7 }
  0x23   : > { %s278_s28 = sand.u32 (!%p272_p8), 1, %s1078_s12   ;;  %s891_s29 = sshll.u32 (!%p272_p8), %s1086_s14, 5 }
  0x24   : > { %275 = sbr.rel (%p272_p8) target bundleno = 474 (0x1da), region = 51  ;;  %s890_s30 = sshll.u32 (!%p272_p8), %s278_s28, 8 }
  0x25   : > { %p320_p9 = scmp.lt.s32.totalorder (!%p272_p8), %s891_s29, 127  ;;  %s1238_s8 = scalar_lea.vmem (!%p272_p8), [#allocation3], %s890_s30 }
  0x26   : > { %p893_p10 = scmp.ne.s32.totalorder (!%p272_p8), %s1086_s14, 0 }
  0x29   : > { %s1428_s29 = smov (!%p320_p9, %s891_s29), 127  ;;  %346 = sbr.rel (%p893_p10) target bundleno = 55 (0x37), region = 59 }
  0x2a   : > { %s892_s4 = sshll.u32 %s1428_s29, 3 }
  0x2b   : > { %s1236_s7 = scalar_lea.vmem %s1418_s1, %s892_s4 }
  0x2e   : > { %v1096_v32 = vmov 0.0  }
  0x2f   : > { %347 = vst [vmem:[#allocation2 + $0x30] sm:$0xff] %v1096_v32  ;;  %348 = vst [vmem:[#allocation2] sm:$0xff] %v1096_v32 }
  0x30   : > { %349 = vst [vmem:[#allocation2 + $0x58] sm:$0xff] %v1096_v32  ;;  %350 = vst [vmem:[#allocation2 + $0x18] sm:$0xff] %v1096_v32 }
  0x31   : > { %351 = vst [vmem:[#allocation2 + $0x50] sm:$0xff] %v1096_v32  ;;  %352 = vst [vmem:[#allocation2 + $0x68] sm:$0xff] %v1096_v32 }
  0x32   : > { %353 = vst [vmem:[#allocation2 + $0x8] sm:$0xff] %v1096_v32  ;;  %354 = vst [vmem:[#allocation2 + $0x48] sm:$0xff] %v1096_v32 }
  0x33   : > { %355 = vst [vmem:[#allocation2 + $0x40] sm:$0xff] %v1096_v32  ;;  %356 = vst [vmem:[#allocation2 + $0x20] sm:$0xff] %v1096_v32 }
  0x34   : > { %357 = vst [vmem:[#allocation2 + $0x10] sm:$0xff] %v1096_v32  ;;  %358 = vst [vmem:[#allocation2 + $0x38] sm:$0xff] %v1096_v32 }
  0x35   : > { %359 = vst [vmem:[#allocation2 + $0x60] sm:$0xff] %v1096_v32  ;;  %360 = vst [vmem:[#allocation2 + $0x70] sm:$0xff] %v1096_v32 }
  0x36   : > { %361 = vst [vmem:[#allocation2 + $0x78] sm:$0xff] %v1096_v32  ;;  %362 = vst [vmem:[#allocation2 + $0x28] sm:$0xff] %v1096_v32 }
  0x37 PF: > { %v442_v33 = vld [vmem:[%s1236_s7 + $0xf8] sm:$0xff]  ;;  %v441_v35 = vld [vmem:[%s1236_s7 + $0xf0] sm:$0xff]  ;;  %v440_v37 = vld [vmem:[%s1236_s7 + $0xe8] sm:$0xff]  ;;  %p894_p11 = scmp.ne.s32.totalorder %s1086_s14, 3 }
  0x38   : > { %v426_v34 = vld [vmem:[%s1236_s7 + $0x78] sm:$0xff]  ;;  %900 = vmatprep.subr.mxu0 %v442_v33  ;;  %980 = vmatprep.subr.mxu1 %v442_v33  ;;  %v425_v36 = vld [vmem:[%s1236_s7 + $0x70] sm:$0xff]  ;;  %v424_v38 = vld [vmem:[%s1236_s7 + $0x68] sm:$0xff] }
  0x39   : > { %901 = vmatpush3.msra.mxu0 %v426_v34  ;;  %996 = vmatpush3.msra.mxu1 %v426_v34  ;;  %v439_v39 = vld [vmem:[%s1236_s7 + $0xe0] sm:$0xff]  ;;  %v438_v41 = vld [vmem:[%s1236_s7 + $0xd8] sm:$0xff]  ;;  %v437_v43 = vld [vmem:[%s1236_s7 + $0xd0] sm:$0xff] }
  0x3a   : > { %902 = vmatprep.subr.mxu0 %v441_v35  ;;  %981 = vmatprep.subr.mxu1 %v441_v35  ;;  %v423_v40 = vld [vmem:[%s1236_s7 + $0x60] sm:$0xff]  ;;  %v422_v42 = vld [vmem:[%s1236_s7 + $0x58] sm:$0xff]  ;;  %v421_v44 = vld [vmem:[%s1236_s7 + $0x50] sm:$0xff] }
  0x3b   : > { %903 = vmatpush3.msra.mxu0 %v425_v36  ;;  %997 = vmatpush3.msra.mxu1 %v425_v36  ;;  %v436_v45 = vld [vmem:[%s1236_s7 + $0xc8] sm:$0xff]  ;;  %v435_v47 = vld [vmem:[%s1236_s7 + $0xc0] sm:$0xff]  ;;  %v434_v49 = vld [vmem:[%s1236_s7 + $0xb8] sm:$0xff] }
  0x3c   : > { %904 = vmatprep.subr.mxu0 %v440_v37  ;;  %982 = vmatprep.subr.mxu1 %v440_v37  ;;  %v420_v46 = vld [vmem:[%s1236_s7 + $0x48] sm:$0xff]  ;;  %v419_v48 = vld [vmem:[%s1236_s7 + $0x40] sm:$0xff]  ;;  %v418_v50 = vld [vmem:[%s1236_s7 + $0x38] sm:$0xff] }
  0x3d   : > { %905 = vmatpush3.msra.mxu0 %v424_v38  ;;  %998 = vmatpush3.msra.mxu1 %v424_v38  ;;  %v433_v51 = vld [vmem:[%s1236_s7 + $0xb0] sm:$0xff]  ;;  %v432_v53 = vld [vmem:[%s1236_s7 + $0xa8] sm:$0xff]  ;;  %v431_v55 = vld [vmem:[%s1236_s7 + $0xa0] sm:$0xff] }
  0x3e   : > { %906 = vmatprep.subr.mxu0 %v439_v39  ;;  %983 = vmatprep.subr.mxu1 %v439_v39  ;;  %v417_v52 = vld [vmem:[%s1236_s7 + $0x30] sm:$0xff]  ;;  %v416_v54 = vld [vmem:[%s1236_s7 + $0x28] sm:$0xff]  ;;  %v415_v56 = vld [vmem:[%s1236_s7 + $0x20] sm:$0xff] }
  0x3f   : > { %907 = vmatpush3.msra.mxu0 %v423_v40  ;;  %999 = vmatpush3.msra.mxu1 %v423_v40  ;;  %v430_v57 = vld [vmem:[%s1236_s7 + $0x98] sm:$0xff]  ;;  %v429_v59 = vld [vmem:[%s1236_s7 + $0x90] sm:$0xff]  ;;  %v428_v61 = vld [vmem:[%s1236_s7 + $0x88] sm:$0xff] }
  0x40   : > { %908 = vmatprep.subr.mxu0 %v438_v41  ;;  %984 = vmatprep.subr.mxu1 %v438_v41  ;;  %v414_v58 = vld [vmem:[%s1236_s7 + $0x18] sm:$0xff]  ;;  %v413_v60 = vld [vmem:[%s1236_s7 + $0x10] sm:$0xff]  ;;  %v412_v62 = vld [vmem:[%s1236_s7 + $0x8] sm:$0xff] }
  0x41   : > { %909 = vmatpush3.msra.mxu0 %v422_v42  ;;  %1000 = vmatpush3.msra.mxu1 %v422_v42  ;;  %v427_v63 = vld [vmem:[%s1236_s7 + $0x80] sm:$0xff]  ;;  %v380_v1 = vld [vmem:[%s1238_s8 + $0x8] sm:$0xff]  ;;  %v382_v5 = vld [vmem:[%s1238_s8 + $0x18] sm:$0xff] }
  0x42   : > { %910 = vmatprep.subr.mxu0 %v437_v43  ;;  %985 = vmatprep.subr.mxu1 %v437_v43  ;;  %v411_v0 = vld [vmem:[%s1236_s7] sm:$0xff]  ;;  %v396_v2 = vld [vmem:[%s1238_s8 + $0x88] sm:$0xff]  ;;  %v398_v6 = vld [vmem:[%s1238_s8 + $0x98] sm:$0xff] }
  0x43   : > { %911 = vmatpush3.msra.mxu0 %v421_v44  ;;  %1001 = vmatpush3.msra.mxu1 %v421_v44  ;;  %v379_v3 = vld [vmem:[%s1238_s8] sm:$0xff]  ;;  %v381_v7 = vld [vmem:[%s1238_s8 + $0x10] sm:$0xff]  ;;  %v384_v9 = vld [vmem:[%s1238_s8 + $0x28] sm:$0xff] }
  0x44   : > { %912 = vmatprep.subr.mxu0 %v436_v45  ;;  %986 = vmatprep.subr.mxu1 %v436_v45  ;;  %v395_v4 = vld [vmem:[%s1238_s8 + $0x80] sm:$0xff]  ;;  %v397_v8 = vld [vmem:[%s1238_s8 + $0x90] sm:$0xff]  ;;  %v400_v10 = vld [vmem:[%s1238_s8 + $0xa8] sm:$0xff] }
  0x45   : > { %913 = vmatpush3.msra.mxu0 %v420_v46  ;;  %1002 = vmatpush3.msra.mxu1 %v420_v46  ;;  %v383_v11 = vld [vmem:[%s1238_s8 + $0x20] sm:$0xff]  ;;  %v386_v13 = vld [vmem:[%s1238_s8 + $0x38] sm:$0xff]  ;;  %v385_v15 = vld [vmem:[%s1238_s8 + $0x30] sm:$0xff] }
  0x46   : > { %914 = vmatprep.subr.mxu0 %v435_v47  ;;  %987 = vmatprep.subr.mxu1 %v435_v47  ;;  %v399_v12 = vld [vmem:[%s1238_s8 + $0xa0] sm:$0xff]  ;;  %v402_v14 = vld [vmem:[%s1238_s8 + $0xb8] sm:$0xff]  ;;  %v401_v16 = vld [vmem:[%s1238_s8 + $0xb0] sm:$0xff] }
  0x47   : > { %915 = vmatpush3.msra.mxu0 %v419_v48  ;;  %1003 = vmatpush3.msra.mxu1 %v419_v48  ;;  %v388_v17 = vld [vmem:[%s1238_s8 + $0x48] sm:$0xff]  ;;  %v387_v19 = vld [vmem:[%s1238_s8 + $0x40] sm:$0xff]  ;;  %v390_v21 = vld [vmem:[%s1238_s8 + $0x58] sm:$0xff] }
  0x48   : > { %916 = vmatprep.subr.mxu0 %v434_v49  ;;  %988 = vmatprep.subr.mxu1 %v434_v49  ;;  %v404_v18 = vld [vmem:[%s1238_s8 + $0xc8] sm:$0xff]  ;;  %v403_v20 = vld [vmem:[%s1238_s8 + $0xc0] sm:$0xff]  ;;  %v406_v22 = vld [vmem:[%s1238_s8 + $0xd8] sm:$0xff] }
  0x49   : > { %917 = vmatpush3.msra.mxu0 %v418_v50  ;;  %1004 = vmatpush3.msra.mxu1 %v418_v50  ;;  %v389_v23 = vld [vmem:[%s1238_s8 + $0x50] sm:$0xff]  ;;  %v392_v25 = vld [vmem:[%s1238_s8 + $0x68] sm:$0xff]  ;;  %v391_v27 = vld [vmem:[%s1238_s8 + $0x60] sm:$0xff] }
  0x4a   : > { %918 = vmatprep.subr.mxu0 %v433_v51  ;;  %989 = vmatprep.subr.mxu1 %v433_v51  ;;  %v405_v24 = vld [vmem:[%s1238_s8 + $0xd0] sm:$0xff]  ;;  %v408_v26 = vld [vmem:[%s1238_s8 + $0xe8] sm:$0xff]  ;;  %v407_v28 = vld [vmem:[%s1238_s8 + $0xe0] sm:$0xff] }
  0x4b   : > { %919 = vmatpush3.msra.mxu0 %v417_v52  ;;  %1005 = vmatpush3.msra.mxu1 %v417_v52  ;;  %v394_v29 = vld [vmem:[%s1238_s8 + $0x78] sm:$0xff]  ;;  %v393_v31 = vld [vmem:[%s1238_s8 + $0x70] sm:$0xff]  ;;  %v371_v37 = vld [vmem:[#allocation2 + $0x40] sm:$0xff] }
  0x4c   : > { %920 = vmatprep.subr.mxu0 %v432_v53  ;;  %990 = vmatprep.subr.mxu1 %v432_v53  ;;  %v410_v30 = vld [vmem:[%s1238_s8 + $0xf8] sm:$0xff]  ;;  %v409_v32 = vld [vmem:[%s1238_s8 + $0xf0] sm:$0xff]  ;;  %v364_v45 = vld [vmem:[#allocation2] sm:$0xff] }
  0x4d   : > { %921 = vmatpush3.msra.mxu0 %v416_v54  ;;  %1006 = vmatpush3.msra.mxu1 %v416_v54  ;;  %v363_v35 = vld [vmem:[#allocation2 + $0x30] sm:$0xff]  ;;  %v372_v47 = vld [vmem:[#allocation2 + $0x20] sm:$0xff] }
  0x4e   : > { %922 = vmatprep.subr.mxu0 %v431_v55  ;;  %991 = vmatprep.subr.mxu1 %v431_v55  ;;  %v365_v55 = vld [vmem:[#allocation2 + $0x58] sm:$0xff] }
  0x4f   : > { %923 = vmatpush3.msra.mxu0 %v415_v56  ;;  %1007 = vmatpush3.msra.mxu1 %v415_v56 }
  0x50   : > { %924 = vmatprep.subr.mxu0 %v430_v57  ;;  %992 = vmatprep.subr.mxu1 %v430_v57  ;;  %v373_v57 = vld [vmem:[#allocation2 + $0x10] sm:$0xff] }
  0x51   : > { %925 = vmatpush3.msra.mxu0 %v414_v58  ;;  %1008 = vmatpush3.msra.mxu1 %v414_v58 }
  0x52   : > { %926 = vmatprep.subr.mxu0 %v429_v59  ;;  %993 = vmatprep.subr.mxu1 %v429_v59 }
  0x53   : > { %927 = vmatpush3.msra.mxu0 %v413_v60  ;;  %1009 = vmatpush3.msra.mxu1 %v413_v60 }
  0x54   : > { %928 = vmatprep.subr.mxu0 %v428_v61  ;;  %994 = vmatprep.subr.mxu1 %v428_v61 }
  0x55   : > { %929 = vmatpush3.msra.mxu0 %v412_v62  ;;  %1010 = vmatpush3.msra.mxu1 %v412_v62 }
  0x56   : > { %930 = vmatprep.subr.mxu0 %v427_v63  ;;  %995 = vmatprep.subr.mxu1 %v427_v63 }
  0x57   : > { %931 = vmatpush3.msra.mxu0 %v411_v0  ;;  %1011 = vmatpush3.msra.mxu1 %v411_v0 }
  0x58   : > { %507 = vmatprep.mubr.f32.mxu0 %v380_v1  ;;  %547 = vmatprep.mubr.f32.mxu1 %v396_v2  ;;  %v366_v1 = vld [vmem:[#allocation2 + $0x18] sm:$0xff] }
  0x59   : > { %508 = vmatmul.mubr.f32.vlgmr.msra.gmra.mxu0 %v379_v3  ;;  %548 = vmatmul.mubr.f32.vlgmr.msra.gmra.mxu1 %v395_v4  ;;  %v374_v3 = vld [vmem:[#allocation2 + $0x38] sm:$0xff] }
  0x5a   : > { %512 = vmatprep.mubr.f32.mxu0 %v382_v5  ;;  %552 = vmatprep.mubr.f32.mxu1 %v398_v6 }
  0x5d   : > { %513 = vmatmul.mubr.f32.gmra.mxu0 %v381_v7  ;;  %553 = vmatmul.mubr.f32.gmra.mxu1 %v397_v8 }
  0x5e   : > { %517 = vmatprep.mubr.f32.mxu0 %v384_v9  ;;  %557 = vmatprep.mubr.f32.mxu1 %v400_v10 }
  0x61   : > { %518 = vmatmul.mubr.f32.gmra.mxu0 %v383_v11  ;;  %558 = vmatmul.mubr.f32.gmra.mxu1 %v399_v12  ;;  %v367_v11 = vld [vmem:[#allocation2 + $0x50] sm:$0xff] }
  0x62   : > { %522 = vmatprep.mubr.f32.mxu0 %v386_v13  ;;  %562 = vmatprep.mubr.f32.mxu1 %v402_v14  ;;  %v375_v13 = vld [vmem:[#allocation2 + $0x60] sm:$0xff] }
  0x65   : > { %523 = vmatmul.mubr.f32.gmra.mxu0 %v385_v15  ;;  %563 = vmatmul.mubr.f32.gmra.mxu1 %v401_v16 }
  0x66   : > { %527 = vmatprep.mubr.f32.mxu0 %v388_v17  ;;  %567 = vmatprep.mubr.f32.mxu1 %v404_v18 }
  0x69   : > { %528 = vmatmul.mubr.f32.gmra.mxu0 %v387_v19  ;;  %568 = vmatmul.mubr.f32.gmra.mxu1 %v403_v20 }
  0x6a   : > { %532 = vmatprep.mubr.f32.mxu0 %v390_v21  ;;  %572 = vmatprep.mubr.f32.mxu1 %v406_v22  ;;  %v368_v21 = vld [vmem:[#allocation2 + $0x68] sm:$0xff] }
  0x6d   : > { %533 = vmatmul.mubr.f32.gmra.mxu0 %v389_v23  ;;  %573 = vmatmul.mubr.f32.gmra.mxu1 %v405_v24  ;;  %v376_v23 = vld [vmem:[#allocation2 + $0x70] sm:$0xff] }
  0x6e   : > { %537 = vmatprep.mubr.f32.mxu0 %v392_v25  ;;  %577 = vmatprep.mubr.f32.mxu1 %v408_v26 }
  0x71   : > { %538 = vmatmul.mubr.f32.gmra.mxu0 %v391_v27  ;;  %578 = vmatmul.mubr.f32.gmra.mxu1 %v407_v28 }
  0x72   : > { %542 = vmatprep.mubr.f32.mxu0 %v394_v29  ;;  %582 = vmatprep.mubr.f32.mxu1 %v410_v30 }
  0x75   : > { %543 = vmatmul.mubr.f32.gmra.mxu0 %v393_v31  ;;  %583 = vmatmul.mubr.f32.gmra.mxu1 %v409_v32  ;;  %v369_v31 = vld [vmem:[#allocation2 + $0x8] sm:$0xff] }
 0x119   : > { %v932_v33 = vpop.f32.mrf.mxu0  ;;  %v956_v34 = vpop.f32.mrf.mxu1 }
 0x11b   : > { %v933_v36 = vpop.f32.mrf.mxu0  ;;  %v957_v38 = vpop.f32.mrf.mxu1 }
 0x11c   : > { %v934_v39 = vadd.f32 %v933_v36, %v932_v33  ;;  %v958_v40 = vadd.f32 %v957_v38, %v956_v34  ;;  %v377_v33 = vld [vmem:[#allocation2 + $0x78] sm:$0xff] }
 0x11d   : > { %v935_v41 = vpop.f32.mrf.mxu0  ;;  %v959_v42 = vpop.f32.mrf.mxu1 }
 0x11e   : > { %v588_v43 = vadd.f32 %v934_v39, %v363_v35  ;;  %v596_v44 = vadd.f32 %v958_v40, %v371_v37 }
 0x11f   : > { %v936_v46 = vpop.f32.mrf.mxu0  ;;  %v960_v48 = vpop.f32.mrf.mxu1 }
 0x120   : > { %604 = vst [vmem:[#allocation2 + $0x30] sm:$0xff] %v588_v43  ;;  %612 = vst [vmem:[#allocation2 + $0x40] sm:$0xff] %v596_v44  ;;  %v937_v49 = vadd.f32 %v936_v46, %v935_v41  ;;  %v961_v50 = vadd.f32 %v960_v48, %v959_v42  ;;  %v370_v41 = vld [vmem:[#allocation2 + $0x48] sm:$0xff] }
 0x121   : > { %v938_v51 = vpop.f32.mrf.mxu0  ;;  %v962_v52 = vpop.f32.mrf.mxu1  ;;  %v378_v43 = vld [vmem:[#allocation2 + $0x28] sm:$0xff] }
 0x122   : > { %v589_v53 = vadd.f32 %v937_v49, %v364_v45  ;;  %v597_v54 = vadd.f32 %v961_v50, %v372_v47 }
 0x123   : > { %v939_v56 = vpop.f32.mrf.mxu0  ;;  %v963_v58 = vpop.f32.mrf.mxu1 }
 0x124   : > { %605 = vst [vmem:[#allocation2] sm:$0xff] %v589_v53  ;;  %613 = vst [vmem:[#allocation2 + $0x20] sm:$0xff] %v597_v54  ;;  %v940_v59 = vadd.f32 %v939_v56, %v938_v51  ;;  %v964_v60 = vadd.f32 %v963_v58, %v962_v52 }
 0x125   : > { %v941_v61 = vpop.f32.mrf.mxu0  ;;  %v965_v62 = vpop.f32.mrf.mxu1 }
 0x126   : > { %v590_v63 = vadd.f32 %v940_v59, %v365_v55  ;;  %v598_v0 = vadd.f32 %v964_v60, %v373_v57 }
 0x127   : > { %v942_v2 = vpop.f32.mrf.mxu0  ;;  %v966_v4 = vpop.f32.mrf.mxu1 }
 0x128   : > { %606 = vst [vmem:[#allocation2 + $0x58] sm:$0xff] %v590_v63  ;;  %614 = vst [vmem:[#allocation2 + $0x10] sm:$0xff] %v598_v0  ;;  %v943_v5 = vadd.f32 %v942_v2, %v941_v61  ;;  %v967_v6 = vadd.f32 %v966_v4, %v965_v62 }
 0x129   : > { %v944_v7 = vpop.f32.mrf.mxu0  ;;  %v968_v8 = vpop.f32.mrf.mxu1 }
 0x12a   : > { %v591_v9 = vadd.f32 %v943_v5, %v366_v1  ;;  %v599_v10 = vadd.f32 %v967_v6, %v374_v3 }
 0x12b   : > { %v945_v12 = vpop.f32.mrf.mxu0  ;;  %v969_v14 = vpop.f32.mrf.mxu1 }
 0x12c   : > { %607 = vst [vmem:[#allocation2 + $0x18] sm:$0xff] %v591_v9  ;;  %615 = vst [vmem:[#allocation2 + $0x38] sm:$0xff] %v599_v10  ;;  %v946_v15 = vadd.f32 %v945_v12, %v944_v7  ;;  %v970_v16 = vadd.f32 %v969_v14, %v968_v8 }
 0x12d   : > { %v947_v17 = vpop.f32.mrf.mxu0  ;;  %v971_v18 = vpop.f32.mrf.mxu1 }
 0x12e   : > { %v592_v19 = vadd.f32 %v946_v15, %v367_v11  ;;  %v600_v20 = vadd.f32 %v970_v16, %v375_v13 }
 0x12f   : > { %v948_v22 = vpop.f32.mrf.mxu0  ;;  %v972_v24 = vpop.f32.mrf.mxu1 }
 0x130   : > { %608 = vst [vmem:[#allocation2 + $0x50] sm:$0xff] %v592_v19  ;;  %616 = vst [vmem:[#allocation2 + $0x60] sm:$0xff] %v600_v20  ;;  %v949_v25 = vadd.f32 %v948_v22, %v947_v17  ;;  %v973_v26 = vadd.f32 %v972_v24, %v971_v18 }
 0x131   : > { %v950_v27 = vpop.f32.mrf.mxu0  ;;  %v974_v28 = vpop.f32.mrf.mxu1 }
 0x132   : > { %v593_v29 = vadd.f32 %v949_v25, %v368_v21  ;;  %v601_v30 = vadd.f32 %v973_v26, %v376_v23 }
 0x133   : > { %v951_v32 = vpop.f32.mrf.mxu0  ;;  %v975_v34 = vpop.f32.mrf.mxu1 }
 0x134   : > { %609 = vst [vmem:[#allocation2 + $0x68] sm:$0xff] %v593_v29  ;;  %617 = vst [vmem:[#allocation2 + $0x70] sm:$0xff] %v601_v30  ;;  %v952_v35 = vadd.f32 %v951_v32, %v950_v27  ;;  %v976_v36 = vadd.f32 %v975_v34, %v974_v28 }
 0x135   : > { %v953_v37 = vpop.f32.mrf.mxu0  ;;  %v977_v38 = vpop.f32.mrf.mxu1 }
 0x136   : > { %v594_v39 = vadd.f32 %v952_v35, %v369_v31  ;;  %v602_v40 = vadd.f32 %v976_v36, %v377_v33 }
 0x137   : > { %v954_v42 = vpop.f32.mrf.mxu0  ;;  %v978_v44 = vpop.f32.mrf.mxu1 }
 0x138   : > { %610 = vst [vmem:[#allocation2 + $0x8] sm:$0xff] %v594_v39  ;;  %618 = vst [vmem:[#allocation2 + $0x78] sm:$0xff] %v602_v40  ;;  %v955_v45 = vadd.f32 %v954_v42, %v953_v37  ;;  %v979_v46 = vadd.f32 %v978_v44, %v977_v38  ;;  %623 = sbr.rel (%p894_p11) target bundleno = 474 (0x1da), region = 63 }
 0x13a   : > { %v595_v47 = vadd.f32 %v955_v45, %v370_v41  ;;  %v603_v48 = vadd.f32 %v979_v46, %v378_v43 }
 0x13c   : > { %611 = vst [vmem:[#allocation2 + $0x48] sm:$0xff] %v595_v47  ;;  %619 = vst [vmem:[#allocation2 + $0x28] sm:$0xff] %v603_v48 }
 0x13d   : > { %v642_v49 = vld [vmem:[%s1419_s2 + $0x10] sm:$0xff]  ;;  %v640_v50 = vld [vmem:[%s1419_s2] sm:$0xff]  ;;  %v1097_v51 = vmov 0   ;;  %v643_v52 = vld [vmem:[%s1419_s2 + $0x18] sm:$0xff] }
 0x13e   : > { %1055 = vset.pattern.permute.xlu1 %v1097_v51  ;;  %1054 = vset.pattern.permute.xlu0 %v1097_v51  ;;  %v641_v53 = vld [vmem:[%s1419_s2 + $0x8] sm:$0xff]  ;;  %v644_v55 = vld [vmem:[%s1419_s2 + $0x20] sm:$0xff]  ;;  %v647_v56 = vld [vmem:[%s1419_s2 + $0x38] sm:$0xff] }
 0x13f   : > { %668 = vperm.xlu1 %1055, %v642_v49   ;;  %658 = vperm.xlu0 %1054, %v640_v50   ;;  %v645_v54 = vld [vmem:[%s1419_s2 + $0x28] sm:$0xff]  ;;  %v646_v57 = vld [vmem:[%s1419_s2 + $0x30] sm:$0xff]  ;;  %v648_v59 = vld [vmem:[%s1419_s2 + $0x40] sm:$0xff] }
 0x140   : > { %v649_v58 = vld [vmem:[%s1419_s2 + $0x48] sm:$0xff]  ;;  %v651_v60 = vld [vmem:[%s1419_s2 + $0x58] sm:$0xff]  ;;  %v650_v61 = vld [vmem:[%s1419_s2 + $0x50] sm:$0xff] }
 0x141   : > { %v653_v62 = vld [vmem:[%s1419_s2 + $0x68] sm:$0xff]  ;;  %v652_v63 = vld [vmem:[%s1419_s2 + $0x60] sm:$0xff]  ;;  %v655_v0 = vld [vmem:[%s1419_s2 + $0x78] sm:$0xff] }
 0x142   : > { %v654_v1 = vld [vmem:[%s1419_s2 + $0x70] sm:$0xff]  ;;  %v626_v2 = vld [vmem:[#allocation2 + $0x58] sm:$0xff]  ;;  %v625_v9 = vld [vmem:[#allocation2] sm:$0xff] }
 0x143   : > { %673 = vperm.xlu1 %1055, %v643_v52   ;;  %663 = vperm.xlu0 %1054, %v641_v53   ;;  %v624_v3 = vld [vmem:[#allocation2 + $0x30] sm:$0xff]  ;;  %v627_v8 = vld [vmem:[#allocation2 + $0x18] sm:$0xff]  ;;  %v629_v14 = vld [vmem:[#allocation2 + $0x68] sm:$0xff] }
 0x144   : > { %v628_v15 = vld [vmem:[#allocation2 + $0x50] sm:$0xff]  ;;  %v631_v20 = vld [vmem:[#allocation2 + $0x48] sm:$0xff]  ;;  %v633_v26 = vld [vmem:[#allocation2 + $0x20] sm:$0xff] }
 0x145   : > { %v630_v21 = vld [vmem:[#allocation2 + $0x8] sm:$0xff]  ;;  %v632_v27 = vld [vmem:[#allocation2 + $0x40] sm:$0xff]  ;;  %v635_v32 = vld [vmem:[#allocation2 + $0x38] sm:$0xff] }
 0x146   : > { %v634_v33 = vld [vmem:[#allocation2 + $0x10] sm:$0xff]  ;;  %v636_v39 = vld [vmem:[#allocation2 + $0x60] sm:$0xff]  ;;  %v639_v44 = vld [vmem:[#allocation2 + $0x28] sm:$0xff] }
 0x147   : > { %683 = vperm.xlu1 %1055, %v645_v54   ;;  %678 = vperm.xlu0 %1054, %v644_v55   ;;  %v637_v38 = vld [vmem:[#allocation2 + $0x70] sm:$0xff]  ;;  %v638_v45 = vld [vmem:[#allocation2 + $0x78] sm:$0xff] }
 0x14b   : > { %693 = vperm.xlu1 %1055, %v647_v56   ;;  %688 = vperm.xlu0 %1054, %v646_v57  }
 0x14f   : > { %703 = vperm.xlu1 %1055, %v649_v58   ;;  %698 = vperm.xlu0 %1054, %v648_v59  }
 0x153   : > { %713 = vperm.xlu1 %1055, %v651_v60   ;;  %708 = vperm.xlu0 %1054, %v650_v61  }
 0x157   : > { %723 = vperm.xlu1 %1055, %v653_v62   ;;  %718 = vperm.xlu0 %1054, %v652_v63  }
 0x15b   : > { %733 = vperm.xlu1 %1055, %v655_v0   ;;  %728 = vperm.xlu0 %1054, %v654_v1  }
 0x1ba   : > { %v669_v4 = vpop.permute.xlu1 %668  ;;  %v659_v5 = vpop.permute.xlu0 %658 }
 0x1bb   : > { %v738_v6 = vadd.f32 %v669_v4, %v626_v2  ;;  %v736_v7 = vadd.f32 %v659_v5, %v624_v3 }
 0x1bd   : > { %754 = vst [vmem:[%s1420_s3 + $0x10] sm:$0xff] %v738_v6  ;;  %752 = vst [vmem:[%s1420_s3] sm:$0xff] %v736_v7 }
 0x1be   : > { %v674_v10 = vpop.permute.xlu1 %673  ;;  %v664_v11 = vpop.permute.xlu0 %663 }
 0x1bf   : > { %v739_v12 = vadd.f32 %v674_v10, %v627_v8  ;;  %v737_v13 = vadd.f32 %v664_v11, %v625_v9 }
 0x1c1   : > { %755 = vst [vmem:[%s1420_s3 + $0x18] sm:$0xff] %v739_v12  ;;  %753 = vst [vmem:[%s1420_s3 + $0x8] sm:$0xff] %v737_v13 }
 0x1c2   : > { %v684_v16 = vpop.permute.xlu1 %683  ;;  %v679_v17 = vpop.permute.xlu0 %678 }
 0x1c3   : > { %v741_v18 = vadd.f32 %v684_v16, %v629_v14  ;;  %v740_v19 = vadd.f32 %v679_v17, %v628_v15 }
 0x1c5   : > { %757 = vst [vmem:[%s1420_s3 + $0x28] sm:$0xff] %v741_v18  ;;  %756 = vst [vmem:[%s1420_s3 + $0x20] sm:$0xff] %v740_v19 }
 0x1c6   : > { %v694_v22 = vpop.permute.xlu1 %693  ;;  %v689_v23 = vpop.permute.xlu0 %688 }
 0x1c7   : > { %v743_v24 = vadd.f32 %v694_v22, %v631_v20  ;;  %v742_v25 = vadd.f32 %v689_v23, %v630_v21 }
 0x1c9   : > { %759 = vst [vmem:[%s1420_s3 + $0x38] sm:$0xff] %v743_v24  ;;  %758 = vst [vmem:[%s1420_s3 + $0x30] sm:$0xff] %v742_v25 }
 0x1ca   : > { %v704_v28 = vpop.permute.xlu1 %703  ;;  %v699_v29 = vpop.permute.xlu0 %698 }
 0x1cb   : > { %v745_v30 = vadd.f32 %v704_v28, %v633_v26  ;;  %v744_v31 = vadd.f32 %v699_v29, %v632_v27 }
 0x1cd   : > { %761 = vst [vmem:[%s1420_s3 + $0x48] sm:$0xff] %v745_v30  ;;  %760 = vst [vmem:[%s1420_s3 + $0x40] sm:$0xff] %v744_v31 }
 0x1ce   : > { %v714_v34 = vpop.permute.xlu1 %713  ;;  %v709_v35 = vpop.permute.xlu0 %708 }
 0x1cf   : > { %v747_v36 = vadd.f32 %v714_v34, %v635_v32  ;;  %v746_v37 = vadd.f32 %v709_v35, %v634_v33 }
 0x1d1   : > { %763 = vst [vmem:[%s1420_s3 + $0x58] sm:$0xff] %v747_v36  ;;  %762 = vst [vmem:[%s1420_s3 + $0x50] sm:$0xff] %v746_v37 }
 0x1d2   : > { %v724_v40 = vpop.permute.xlu1 %723  ;;  %v719_v41 = vpop.permute.xlu0 %718 }
 0x1d3   : > { %v749_v42 = vadd.f32 %v724_v40, %v637_v38  ;;  %v748_v43 = vadd.f32 %v719_v41, %v636_v39 }
 0x1d5   : > { %765 = vst [vmem:[%s1420_s3 + $0x68] sm:$0xff] %v749_v42  ;;  %764 = vst [vmem:[%s1420_s3 + $0x60] sm:$0xff] %v748_v43 }
 0x1d6   : > { %v734_v46 = vpop.permute.xlu1 %733  ;;  %v729_v47 = vpop.permute.xlu0 %728 }
 0x1d7   : > { %v751_v48 = vadd.f32 %v734_v46, %v639_v44  ;;  %v750_v49 = vadd.f32 %v729_v47, %v638_v45 }
 0x1d9   : > { %767 = vst [vmem:[%s1420_s3 + $0x78] sm:$0xff] %v751_v48  ;;  %766 = vst [vmem:[%s1420_s3 + $0x70] sm:$0xff] %v750_v49 }
 0x1da PF: > { %s13_s16 = sadd.s32 1, %s1094_s16   ;;  %s1421_s12 = smov %s1082_s13 }
 0x1db   : > { %p10_p12 = scmp.ge.s32.totalorder %s13_s16, 6   ;;  %s1422_s13 = smov %s1153_s20 }
 0x1dc   : > { %s1423_s14 = smov %s1090_s15  ;;  %s1424_s15 = smov %s1426_s17 }
 0x1dd   :  { %12 = sbr.rel (!%p10_p12) target bundleno = 3 (0x3), region = 104 }

// kernel: forward.21
= control target key start
LH: loop header
LB: loop body
LE: loop exit
PB: predicated region body
PF: predicated region fallthrough
CT: control target
= control target key end

     0   :  { %vm40_vm0 = vcmask 31744   ;;  %s1554_s0 = inlined_call_operand.vmem [shape: f32[256,4], index: 0, kind: input, shape index: {}]   ;;  %s1555_s1 = inlined_call_operand.vmem [shape: f32[256,4], index: 1, kind: output, shape index: {}]  }
   0x1   :  { %v708_v0 = vld [vmem:[%s1554_s0 + $0x10] sm:$0xff]  ;;  %v713_v1 = vld [vmem:[%s1554_s0] sm:$0xff]  ;;  %v718_v2 = vld [vmem:[%s1554_s0 + $0x18] sm:$0xff] }
   0x2   :  { %v47_v3 = vsel %vm40_vm0, %v708_v0, 0.0  ;;  %v41_v4 = vsel %vm40_vm0, %v713_v1, 0.0  ;;  %v727_v5 = vld [vmem:[%s1554_s0 + $0x8] sm:$0xff]  ;;  %v50_v6 = vsel %vm40_vm0, %v718_v2, 0.0  ;;  %v741_v9 = vld [vmem:[%s1554_s0 + $0x20] sm:$0xff]  ;;  %v750_v12 = vld [vmem:[%s1554_s0 + $0x38] sm:$0xff] }
   0x3   :  { %48 = vadd.xlane.f32.xlu1 %v47_v3  ;;  %42 = vadd.xlane.f32.xlu0 %v41_v4  ;;  %v44_v7 = vsel %vm40_vm0, %v727_v5, 0.0  ;;  %v736_v8 = vld [vmem:[%s1554_s0 + $0x28] sm:$0xff]  ;;  %v53_v11 = vsel %vm40_vm0, %v741_v9, 0.0  ;;  %1568 = vst [vmem:[#allocation2_spill] sm:$0xff] %v750_v12  ;;  %v755_v13 = vld [vmem:[%s1554_s0 + $0x30] sm:$0xff]  ;;  %v62_v14 = vsel %vm40_vm0, %v750_v12, 0.0  ;;  %v138_v3 = vmul.f32 %v727_v5, %v727_v5 }
   0x4   :  { %v56_v10 = vsel %vm40_vm0, %v736_v8, 0.0  ;;  %1569 = vst [vmem:[#allocation3_spill] sm:$0xff] %v755_v13  ;;  %v59_v15 = vsel %vm40_vm0, %v755_v13, 0.0  ;;  %v764_v16 = vld [vmem:[%s1554_s0 + $0x48] sm:$0xff]  ;;  %v769_v17 = vld [vmem:[%s1554_s0 + $0x40] sm:$0xff]  ;;  %v778_v20 = vld [vmem:[%s1554_s0 + $0x58] sm:$0xff]  ;;  %v137_v4 = vmul.f32 %v713_v1, %v713_v1 }
   0x5   :  { %1570 = vst [vmem:[#allocation4_spill] sm:$0xff] %v764_v16  ;;  %v68_v18 = vsel %vm40_vm0, %v764_v16, 0.0  ;;  %v65_v19 = vsel %vm40_vm0, %v769_v17, 0.0  ;;  %1571 = vst [vmem:[#allocation5_spill] sm:$0xff] %v778_v20  ;;  %v783_v21 = vld [vmem:[%s1554_s0 + $0x50] sm:$0xff]  ;;  %v74_v22 = vsel %vm40_vm0, %v778_v20, 0.0 }
   0x6   :  { %v71_v23 = vsel %vm40_vm0, %v783_v21, 0.0  ;;  %v792_v24 = vld [vmem:[%s1554_s0 + $0x68] sm:$0xff]  ;;  %v797_v25 = vld [vmem:[%s1554_s0 + $0x60] sm:$0xff]  ;;  %v806_v28 = vld [vmem:[%s1554_s0 + $0x78] sm:$0xff] }
   0x7   :  { %51 = vadd.xlane.f32.xlu1 %v50_v6  ;;  %45 = vadd.xlane.f32.xlu0 %v44_v7  ;;  %v80_v26 = vsel %vm40_vm0, %v792_v24, 0.0  ;;  %v77_v27 = vsel %vm40_vm0, %v797_v25, 0.0  ;;  %v811_v29 = vld [vmem:[%s1554_s0 + $0x70] sm:$0xff]  ;;  %v86_v30 = vsel %vm40_vm0, %v806_v28, 0.0  ;;  %v820_v32 = vld [vmem:[%s1554_s0 + $0x88] sm:$0xff]  ;;  %v825_v33 = vld [vmem:[%s1554_s0 + $0x80] sm:$0xff] }
   0x8   :  { %v83_v31 = vsel %vm40_vm0, %v811_v29, 0.0  ;;  %v92_v34 = vsel %vm40_vm0, %v820_v32, 0.0  ;;  %v89_v35 = vsel %vm40_vm0, %v825_v33, 0.0  ;;  %v834_v36 = vld [vmem:[%s1554_s0 + $0x98] sm:$0xff]  ;;  %v839_v37 = vld [vmem:[%s1554_s0 + $0x90] sm:$0xff]  ;;  %v848_v40 = vld [vmem:[%s1554_s0 + $0xa8] sm:$0xff] }
   0x9   :  { %v98_v38 = vsel %vm40_vm0, %v834_v36, 0.0  ;;  %v95_v39 = vsel %vm40_vm0, %v839_v37, 0.0  ;;  %v853_v41 = vld [vmem:[%s1554_s0 + $0xa0] sm:$0xff]  ;;  %v104_v42 = vsel %vm40_vm0, %v848_v40, 0.0  ;;  %v862_v44 = vld [vmem:[%s1554_s0 + $0xb8] sm:$0xff]  ;;  %v867_v45 = vld [vmem:[%s1554_s0 + $0xb0] sm:$0xff] }
   0xa   :  { %1572 = vst [vmem:[#allocation6_spill] sm:$0xff] %v853_v41  ;;  %v101_v43 = vsel %vm40_vm0, %v853_v41, 0.0  ;;  %v110_v46 = vsel %vm40_vm0, %v862_v44, 0.0  ;;  %v107_v47 = vsel %vm40_vm0, %v867_v45, 0.0  ;;  %v876_v48 = vld [vmem:[%s1554_s0 + $0xc8] sm:$0xff]  ;;  %v881_v49 = vld [vmem:[%s1554_s0 + $0xc0] sm:$0xff] }
   0xb   :  { %57 = vadd.xlane.f32.xlu1 %v56_v10  ;;  %54 = vadd.xlane.f32.xlu0 %v53_v11  ;;  %v116_v50 = vsel %vm40_vm0, %v876_v48, 0.0  ;;  %v113_v51 = vsel %vm40_vm0, %v881_v49, 0.0  ;;  %v890_v52 = vld [vmem:[%s1554_s0 + $0xd8] sm:$0xff]  ;;  %v895_v53 = vld [vmem:[%s1554_s0 + $0xd0] sm:$0xff]  ;;  %v904_v56 = vld [vmem:[%s1554_s0 + $0xe8] sm:$0xff]  ;;  %v172_v6 = vsel %vm40_vm0, %v138_v3, 0.0  ;;  %v140_v10 = vmul.f32 %v718_v2, %v718_v2 }
   0xc   :  { %v122_v54 = vsel %vm40_vm0, %v890_v52, 0.0  ;;  %v119_v55 = vsel %vm40_vm0, %v895_v53, 0.0  ;;  %v909_v57 = vld [vmem:[%s1554_s0 + $0xe0] sm:$0xff]  ;;  %v128_v58 = vsel %vm40_vm0, %v904_v56, 0.0  ;;  %v918_v60 = vld [vmem:[%s1554_s0 + $0xf8] sm:$0xff]  ;;  %v923_v61 = vld [vmem:[%s1554_s0 + $0xf0] sm:$0xff]  ;;  %v139_v11 = vmul.f32 %v708_v0, %v708_v0 }
   0xd   :  { %v125_v59 = vsel %vm40_vm0, %v909_v57, 0.0  ;;  %v134_v62 = vsel %vm40_vm0, %v918_v60, 0.0  ;;  %v131_v63 = vsel %vm40_vm0, %v923_v61, 0.0  ;;  %v169_v7 = vsel %vm40_vm0, %v137_v4, 0.0 }
   0xe   :  { %v154_v3 = vmul.f32 %v820_v32, %v820_v32  ;;  %v153_v4 = vmul.f32 %v825_v33, %v825_v33 }
   0xf   :  { %63 = vadd.xlane.f32.xlu1 %v62_v14  ;;  %60 = vadd.xlane.f32.xlu0 %v59_v15  ;;  %v178_v14 = vsel %vm40_vm0, %v140_v10, 0.0  ;;  %v175_v15 = vsel %vm40_vm0, %v139_v11, 0.0  ;;  %v156_v10 = vmul.f32 %v834_v36, %v834_v36  ;;  %v155_v11 = vmul.f32 %v839_v37, %v839_v37 }
  0x13   :  { %69 = vadd.xlane.f32.xlu1 %v68_v18  ;;  %66 = vadd.xlane.f32.xlu0 %v65_v19  ;;  %v142_v18 = vmul.f32 %v736_v8, %v736_v8  ;;  %v141_v19 = vmul.f32 %v741_v9, %v741_v9 }
  0x17   :  { %75 = vadd.xlane.f32.xlu1 %v74_v22  ;;  %72 = vadd.xlane.f32.xlu0 %v71_v23  ;;  %v184_v22 = vsel %vm40_vm0, %v142_v18, 0.0  ;;  %v181_v23 = vsel %vm40_vm0, %v141_v19, 0.0  ;;  %v158_v18 = vmul.f32 %v848_v40, %v848_v40  ;;  %v157_v19 = vmul.f32 %v853_v41, %v853_v41 }
  0x1b   :  { %81 = vadd.xlane.f32.xlu1 %v80_v26  ;;  %78 = vadd.xlane.f32.xlu0 %v77_v27  ;;  %v144_v26 = vmul.f32 %v750_v12, %v750_v12  ;;  %v143_v27 = vmul.f32 %v755_v13, %v755_v13 }
  0x1f   :  { %87 = vadd.xlane.f32.xlu1 %v86_v30  ;;  %84 = vadd.xlane.f32.xlu0 %v83_v31  ;;  %v190_v30 = vsel %vm40_vm0, %v144_v26, 0.0  ;;  %v187_v31 = vsel %vm40_vm0, %v143_v27, 0.0  ;;  %v160_v26 = vmul.f32 %v862_v44, %v862_v44  ;;  %v159_v27 = vmul.f32 %v867_v45, %v867_v45 }
  0x20   :  { %v164_v45 = vmul.f32 %v890_v52, %v890_v52 }
  0x23   :  { %93 = vadd.xlane.f32.xlu1 %v92_v34  ;;  %90 = vadd.xlane.f32.xlu0 %v89_v35  ;;  %v146_v34 = vmul.f32 %v764_v16, %v764_v16  ;;  %v145_v35 = vmul.f32 %v769_v17, %v769_v17 }
  0x27   :  { %99 = vadd.xlane.f32.xlu1 %v98_v38  ;;  %96 = vadd.xlane.f32.xlu0 %v95_v39  ;;  %v196_v38 = vsel %vm40_vm0, %v146_v34, 0.0  ;;  %v193_v39 = vsel %vm40_vm0, %v145_v35, 0.0  ;;  %v162_v34 = vmul.f32 %v876_v48, %v876_v48  ;;  %v161_v35 = vmul.f32 %v881_v49, %v881_v49 }
  0x28   :  { %v166_v49 = vmul.f32 %v904_v56, %v904_v56 }
  0x29   :  { %v241_v44 = vsel %vm40_vm0, %v161_v35, 0.0 }
  0x2b   :  { %105 = vadd.xlane.f32.xlu1 %v104_v42  ;;  %102 = vadd.xlane.f32.xlu0 %v101_v43  ;;  %v148_v42 = vmul.f32 %v778_v20, %v778_v20  ;;  %v147_v43 = vmul.f32 %v783_v21, %v783_v21 }
  0x2f   :  { %111 = vadd.xlane.f32.xlu1 %v110_v46  ;;  %108 = vadd.xlane.f32.xlu0 %v107_v47  ;;  %v202_v46 = vsel %vm40_vm0, %v148_v42, 0.0  ;;  %v199_v47 = vsel %vm40_vm0, %v147_v43, 0.0  ;;  %v250_v42 = vsel %vm40_vm0, %v164_v45, 0.0  ;;  %v165_v43 = vmul.f32 %v909_v57, %v909_v57 }
  0x31   :  { %v253_v52 = vsel %vm40_vm0, %v165_v43, 0.0 }
  0x33   :  { %117 = vadd.xlane.f32.xlu1 %v116_v50  ;;  %114 = vadd.xlane.f32.xlu0 %v113_v51  ;;  %v150_v50 = vmul.f32 %v792_v24, %v792_v24  ;;  %v149_v51 = vmul.f32 %v797_v25, %v797_v25 }
  0x37   :  { %123 = vadd.xlane.f32.xlu1 %v122_v54  ;;  %120 = vadd.xlane.f32.xlu0 %v119_v55  ;;  %v208_v54 = vsel %vm40_vm0, %v150_v50, 0.0  ;;  %v205_v55 = vsel %vm40_vm0, %v149_v51, 0.0 }
  0x3b   :  { %129 = vadd.xlane.f32.xlu1 %v128_v58  ;;  %126 = vadd.xlane.f32.xlu0 %v125_v59  ;;  %v152_v58 = vmul.f32 %v806_v28, %v806_v28  ;;  %v151_v59 = vmul.f32 %v811_v29, %v811_v29 }
  0x3f   :  { %135 = vadd.xlane.f32.xlu1 %v134_v62  ;;  %132 = vadd.xlane.f32.xlu0 %v131_v63  ;;  %v214_v62 = vsel %vm40_vm0, %v152_v58, 0.0  ;;  %v211_v63 = vsel %vm40_vm0, %v151_v59, 0.0 }
  0x43   :  { %173 = vadd.xlane.f32.xlu1 %v172_v6  ;;  %170 = vadd.xlane.f32.xlu0 %v169_v7  ;;  %v220_v6 = vsel %vm40_vm0, %v154_v3, 0.0  ;;  %v217_v7 = vsel %vm40_vm0, %v153_v4, 0.0 }
  0x47   :  { %179 = vadd.xlane.f32.xlu1 %v178_v14  ;;  %176 = vadd.xlane.f32.xlu0 %v175_v15  ;;  %v226_v14 = vsel %vm40_vm0, %v156_v10, 0.0  ;;  %v223_v15 = vsel %vm40_vm0, %v155_v11, 0.0 }
  0x4b   :  { %185 = vadd.xlane.f32.xlu1 %v184_v22  ;;  %182 = vadd.xlane.f32.xlu0 %v181_v23  ;;  %v232_v22 = vsel %vm40_vm0, %v158_v18, 0.0  ;;  %v229_v23 = vsel %vm40_vm0, %v157_v19, 0.0 }
  0x4f   :  { %191 = vadd.xlane.f32.xlu1 %v190_v30  ;;  %188 = vadd.xlane.f32.xlu0 %v187_v31  ;;  %v238_v30 = vsel %vm40_vm0, %v160_v26, 0.0  ;;  %v235_v31 = vsel %vm40_vm0, %v159_v27, 0.0 }
  0x53   :  { %197 = vadd.xlane.f32.xlu1 %v196_v38  ;;  %194 = vadd.xlane.f32.xlu0 %v193_v39  ;;  %v244_v38 = vsel %vm40_vm0, %v162_v34, 0.0  ;;  %v163_v39 = vmul.f32 %v895_v53, %v895_v53  ;;  %v168_v53 = vmul.f32 %v918_v60, %v918_v60 }
  0x55   :  { %v247_v48 = vsel %vm40_vm0, %v163_v39, 0.0  ;;  %v262_v50 = vsel %vm40_vm0, %v168_v53, 0.0 }
  0x57   :  { %203 = vadd.xlane.f32.xlu1 %v202_v46  ;;  %200 = vadd.xlane.f32.xlu0 %v199_v47  ;;  %v256_v46 = vsel %vm40_vm0, %v166_v49, 0.0  ;;  %v167_v47 = vmul.f32 %v923_v61, %v923_v61 }
  0x59   :  { %v259_v56 = vsel %vm40_vm0, %v167_v47, 0.0 }
  0x5b   :  { %209 = vadd.xlane.f32.xlu1 %v208_v54  ;;  %206 = vadd.xlane.f32.xlu0 %v205_v55 }
  0x5f   :  { %215 = vadd.xlane.f32.xlu1 %v214_v62  ;;  %212 = vadd.xlane.f32.xlu0 %v211_v63 }
  0x63   :  { %221 = vadd.xlane.f32.xlu1 %v220_v6  ;;  %218 = vadd.xlane.f32.xlu0 %v217_v7 }
  0x67   :  { %227 = vadd.xlane.f32.xlu1 %v226_v14  ;;  %224 = vadd.xlane.f32.xlu0 %v223_v15 }
  0x6b   :  { %233 = vadd.xlane.f32.xlu1 %v232_v22  ;;  %230 = vadd.xlane.f32.xlu0 %v229_v23 }
  0x6f   :  { %239 = vadd.xlane.f32.xlu1 %v238_v30  ;;  %236 = vadd.xlane.f32.xlu0 %v235_v31 }
  0x73   :  { %245 = vadd.xlane.f32.xlu1 %v244_v38  ;;  %242 = vadd.xlane.f32.xlu0 %v241_v44 }
  0x77   :  { %251 = vadd.xlane.f32.xlu1 %v250_v42  ;;  %248 = vadd.xlane.f32.xlu0 %v247_v48 }
  0x7b   :  { %257 = vadd.xlane.f32.xlu1 %v256_v46  ;;  %254 = vadd.xlane.f32.xlu0 %v253_v52 }
  0x7f   :  { %263 = vadd.xlane.f32.xlu1 %v262_v50  ;;  %260 = vadd.xlane.f32.xlu0 %v259_v56 }
  0x8c   :  { %v49_v57 = vpop.xlane.xlu1 %48  ;;  %v43_v51 = vpop.xlane.xlu0 %42 }
  0x8d   :  { %v1053_v38 = vmul.f32 0.25, %v49_v57  ;;  %v1059_v39 = vmul.f32 0.25, %v43_v51 }
  0x8f   :  { %v331_v46 = vmul.f32 %v1053_v38, %v1053_v38  ;;  %v329_v56 = vmul.f32 %v1059_v39, %v1059_v39 }
  0x90   :  { %v52_v54 = vpop.xlane.xlu1 %51  ;;  %v46_v55 = vpop.xlane.xlu0 %45 }
  0x91   :  { %v1061_v42 = vmul.f32 0.25, %v52_v54  ;;  %v1063_v48 = vmul.f32 0.25, %v46_v55 }
  0x93   :  { %v332_v51 = vmul.f32 %v1061_v42, %v1061_v42 }
  0x94   :  { %v58_v58 = vpop.xlane.xlu1 %57  ;;  %v55_v59 = vpop.xlane.xlu0 %54 }
  0x95   :  { %v1065_v49 = vmul.f32 0.25, %v58_v58  ;;  %v1067_v43 = vmul.f32 0.25, %v55_v59  ;;  %v330_v58 = vmul.f32 %v1063_v48, %v1063_v48 }
  0x97   :  { %v1097_v52 = vmul.f32 %v1065_v49, %v1065_v49 }
  0x98   :  { %v64_v62 = vpop.xlane.xlu1 %63  ;;  %v61_v63 = vpop.xlane.xlu0 %60 }
  0x99   :  { %v1073_v53 = vmul.f32 0.25, %v64_v62  ;;  %v1085_v54 = vmul.f32 0.25, %v61_v63  ;;  %v1103_v63 = vmul.f32 %v1067_v43, %v1067_v43 }
  0x9b   :  { %1577 = vst [vmem:[#allocation11_spill] sm:$0xff] %v1073_v53  ;;  %1580 = vst [vmem:[#allocation14_spill] sm:$0xff] %v1085_v54 }
  0x9c   :  { %v70_v60 = vpop.xlane.xlu1 %69  ;;  %v67_v3 = vpop.xlane.xlu0 %66 }
  0x9d   :  { %v1093_v62 = vmul.f32 0.25, %v70_v60  ;;  %v1105_v55 = vmul.f32 0.25, %v67_v3  ;;  %v1111_v60 = vmul.f32 %v1073_v53, %v1073_v53  ;;  %v1121_v3 = vmul.f32 %v1085_v54, %v1085_v54 }
  0x9f   :  { %1581 = vst [vmem:[#allocation15_spill] sm:$0xff] %v1093_v62  ;;  %v1135_v57 = vmul.f32 %v1105_v55, %v1105_v55 }
  0xa0   :  { %v76_v4 = vpop.xlane.xlu1 %75  ;;  %v73_v61 = vpop.xlane.xlu0 %72 }
  0xa1   :  { %v1113_v59 = vmul.f32 0.25, %v76_v4  ;;  %v1127_v4 = vmul.f32 %v1093_v62, %v1093_v62 }
  0xa3   :  { %1582 = vst [vmem:[#allocation16_spill] sm:$0xff] %v1113_v59  ;;  %v1141_v41 = vmul.f32 %v1113_v59, %v1113_v59 }
  0xa4   :  { %v82_v6 = vpop.xlane.xlu1 %81  ;;  %v79_v7 = vpop.xlane.xlu0 %78 }
  0xa8   :  { %v1025_v10 = vpop.xlane.xlu1 %87  ;;  %v1027_v11 = vpop.xlane.xlu0 %84 }
  0xa9   :  { %v1161_v54 = vmul.f32 0.25, %v1027_v11 }
  0xab   :  { %1584 = vst [vmem:[#allocation18_spill] sm:$0xff] %v1161_v54 }
  0xac   :  { %v1029_v14 = vpop.xlane.xlu1 %93  ;;  %v1031_v15 = vpop.xlane.xlu0 %90 }
  0xb0   :  { %v1033_v18 = vpop.xlane.xlu1 %99  ;;  %v1035_v19 = vpop.xlane.xlu0 %96 }
  0xb4   :  { %v1037_v22 = vpop.xlane.xlu1 %105  ;;  %v1039_v23 = vpop.xlane.xlu0 %102 }
  0xb8   :  { %v1041_v26 = vpop.xlane.xlu1 %111  ;;  %v1043_v27 = vpop.xlane.xlu0 %108 }
  0xbc   :  { %v1045_v30 = vpop.xlane.xlu1 %117  ;;  %v1047_v31 = vpop.xlane.xlu0 %114 }
  0xc0   :  { %v1049_v34 = vpop.xlane.xlu1 %123  ;;  %v1051_v35 = vpop.xlane.xlu0 %120 }
  0xc1   :  { %1573 = vst [vmem:[#allocation7_spill] sm:$0xff] %v1049_v34  ;;  %1574 = vst [vmem:[#allocation8_spill] sm:$0xff] %v1051_v35  ;;  %v1131_v34 = vmul.f32 0.25, %v82_v6 }
  0xc4   :  { %v1055_v44 = vpop.xlane.xlu1 %129  ;;  %v1057_v45 = vpop.xlane.xlu0 %126 }
  0xc5   :  { %1575 = vst [vmem:[#allocation9_spill] sm:$0xff] %v1055_v44  ;;  %1576 = vst [vmem:[#allocation10_spill] sm:$0xff] %v1057_v45 }
  0xc8   :  { %v1075_v47 = vpop.xlane.xlu1 %135  ;;  %v1077_v50 = vpop.xlane.xlu0 %132 }
  0xc9   :  { %1578 = vst [vmem:[#allocation12_spill] sm:$0xff] %v1075_v47  ;;  %1579 = vst [vmem:[#allocation13_spill] sm:$0xff] %v1077_v50  ;;  %v1115_v50 = vmul.f32 0.25, %v73_v61  ;;  %v1149_v61 = vmul.f32 0.25, %v79_v7 }
  0xcb   :  { %v1147_v6 = vmul.f32 %v1115_v50, %v1115_v50 }
  0xcc   :  { %v174_v47 = vpop.xlane.xlu1 %173  ;;  %v171_v45 = vpop.xlane.xlu0 %170 }
  0xcd   :  { %v298_v44 = vmul.f32 0.25, %v174_v47  ;;  %v297_v35 = vmul.f32 0.25, %v171_v45 }
  0xcf   :  { %v362_v45 = vsub.f32 %v298_v44, %v330_v58  ;;  %v361_v53 = vsub.f32 %v297_v35, %v329_v56  ;;  %v1155_v56 = vmul.f32 %v1131_v34, %v1131_v34  ;;  %v1158_v58 = vmul.f32 0.25, %v1025_v10 }
  0xd0   :  { %v180_v62 = vpop.xlane.xlu1 %179  ;;  %v177_v16 = vpop.xlane.xlu0 %176  ;;  %v1172_v10 = vmul.f32 0.25, %v1029_v14 }
  0xd1   :  { %v394_v13 = vmax.f32 %v362_v45, 0.0  ;;  %v393_v12 = vmax.f32 %v361_v53, 0.0  ;;  %v300_v47 = vmul.f32 0.25, %v180_v62  ;;  %v299_v44 = vmul.f32 0.25, %v177_v16  ;;  %1583 = vst [vmem:[#allocation17_spill] sm:$0xff] %v1158_v58 }
  0xd2   :  { %v1167_v53 = vmul.f32 %v1149_v61, %v1149_v61  ;;  %v1182_v62 = vmul.f32 %v1161_v54, %v1161_v54  ;;  %v1201_v54 = vmul.f32 0.25, %v1035_v19 }
  0xd3   :  { %v458_v7 = vadd.f32 1e-05, %v394_v13  ;;  %v457_v59 = vadd.f32 1e-05, %v393_v12  ;;  %v364_v20 = vsub.f32 %v300_v47, %v332_v51  ;;  %v363_v45 = vsub.f32 %v299_v44, %v331_v46 }
  0xd4   :  { %v186_v35 = vpop.xlane.xlu1 %185  ;;  %v183_v11 = vpop.xlane.xlu0 %182  ;;  %v1176_v46 = vmul.f32 %v1158_v58, %v1158_v58  ;;  %1585 = vst [vmem:[#allocation19_spill] sm:$0xff] %v1201_v54 }
  0xd5   :  { %621 = vrsqrt.f32 %v458_v7  ;;  %v396_v13 = vmax.f32 %v364_v20, 0.0  ;;  %v395_v12 = vmax.f32 %v363_v45, 0.0  ;;  %v302_v51 = vmul.f32 0.25, %v186_v35 }
  0xd6   :  { %623 = vrsqrt.f32 %v457_v59  ;;  %v301_v44 = vmul.f32 0.25, %v183_v11  ;;  %v1189_v35 = vmul.f32 %v1172_v10, %v1172_v10  ;;  %v1192_v45 = vmul.f32 0.25, %v1031_v15 }
  0xd7   :  { %v460_v14 = vadd.f32 1e-05, %v396_v13  ;;  %v459_v16 = vadd.f32 1e-05, %v395_v12  ;;  %v366_v7 = vsub.f32 %v302_v51, %v1097_v52  ;;  %v1198_v51 = vmul.f32 0.25, %v1033_v18 }
  0xd8   :  { %v365_v59 = vsub.f32 %v301_v44, %v1103_v63  ;;  %v192_v11 = vpop.xlane.xlu1 %191  ;;  %v189_v47 = vpop.xlane.xlu0 %188  ;;  %v1212_v18 = vmul.f32 0.25, %v1037_v22  ;;  %v1222_v22 = vmul.f32 %v1201_v54, %v1201_v54 }
  0xd9   :  { %625 = vrsqrt.f32 %v460_v14  ;;  %v398_v58 = vmax.f32 %v366_v7, 0.0  ;;  %v304_v13 = vmul.f32 0.25, %v192_v11  ;;  %v303_v12 = vmul.f32 0.25, %v189_v47 }
  0xda   :  { %627 = vrsqrt.f32 %v459_v16  ;;  %v397_v20 = vmax.f32 %v365_v59, 0.0  ;;  %v1207_v14 = vmul.f32 %v1192_v45, %v1192_v45 }
  0xdb   :  { %v462_v15 = vadd.f32 1e-05, %v398_v58  ;;  %v368_v63 = vsub.f32 %v304_v13, %v1111_v60  ;;  %v367_v44 = vsub.f32 %v303_v12, %v1121_v3  ;;  %v1216_v60 = vmul.f32 %v1198_v51, %v1198_v51 }
  0xdc   :  { %v461_v16 = vadd.f32 1e-05, %v397_v20  ;;  %v198_v7 = vpop.xlane.xlu1 %197  ;;  %v195_v59 = vpop.xlane.xlu0 %194 }
  0xdd   :  { %629 = vrsqrt.f32 %v462_v15  ;;  %v400_v19 = vmax.f32 %v368_v63, 0.0  ;;  %v399_v58 = vmax.f32 %v367_v44, 0.0  ;;  %v306_v11 = vmul.f32 0.25, %v198_v7 }
  0xde   :  { %631 = vrsqrt.f32 %v461_v16  ;;  %v305_v13 = vmul.f32 0.25, %v195_v59  ;;  %v1229_v44 = vmul.f32 %v1212_v18, %v1212_v18  ;;  %v1232_v7 = vmul.f32 0.25, %v1039_v23 }
  0xdf   :  { %v464_v20 = vadd.f32 1e-05, %v400_v19  ;;  %v463_v12 = vadd.f32 1e-05, %v399_v58  ;;  %v370_v15 = vsub.f32 %v306_v11, %v1127_v4  ;;  %v1238_v11 = vmul.f32 0.25, %v1041_v26 }
  0xe0   :  { %v369_v16 = vsub.f32 %v305_v13, %v1135_v57  ;;  %v204_v59 = vpop.xlane.xlu1 %203  ;;  %v201_v3 = vpop.xlane.xlu0 %200  ;;  %v1586_v23 = vsub.f32 %v727_v5, %v1063_v48  ;;  %v1587_v26 = vsub.f32 %v713_v1, %v1059_v39  ;;  %v1588_v1 = vsub.f32 %v718_v2, %v1061_v42 }
  0xe1   :  { %633 = vrsqrt.f32 %v464_v20  ;;  %v402_v47 = vmax.f32 %v370_v15, 0.0  ;;  %v308_v19 = vmul.f32 0.25, %v204_v59  ;;  %v307_v58 = vmul.f32 0.25, %v201_v3 }
  0xe2   :  { %v622_v52 = vpop.eup %621  ;;  %635 = vrsqrt.f32 %v463_v12  ;;  %v401_v63 = vmax.f32 %v369_v16, 0.0  ;;  %v1247_v3 = vmul.f32 %v1232_v7, %v1232_v7  ;;  %v1250_v59 = vmul.f32 0.25, %v1043_v27 }
  0xe3   :  { %v624_v54 = vpop.eup %623  ;;  %v522_v57 = vmul.f32 %v622_v52, %v1586_v23  ;;  %v466_v13 = vadd.f32 1e-05, %v402_v47  ;;  %v372_v20 = vsub.f32 %v308_v19, %v1141_v41  ;;  %v371_v15 = vsub.f32 %v307_v58, %v1147_v6 }
  0xe4   :  { %v521_v12 = vmul.f32 %v624_v54, %v1587_v26  ;;  %v465_v16 = vadd.f32 1e-05, %v401_v63  ;;  %v210_v4 = vpop.xlane.xlu1 %209  ;;  %v207_v5 = vpop.xlane.xlu0 %206  ;;  %v1257_v27 = vmul.f32 %v1238_v11, %v1238_v11 }
  0xe5   :  { %v554_v48 = vmax.f32 %v522_v57, 0.0  ;;  %637 = vrsqrt.f32 %v466_v13  ;;  %v404_v52 = vmax.f32 %v372_v20, 0.0  ;;  %v403_v41 = vmax.f32 %v371_v15, 0.0 }
  0xe6   :  { %v626_v47 = vpop.eup %625  ;;  %v553_v6 = vmax.f32 %v521_v12, 0.0  ;;  %639 = vrsqrt.f32 %v465_v16  ;;  %v310_v19 = vmul.f32 0.25, %v210_v4  ;;  %v309_v58 = vmul.f32 0.25, %v207_v5 }
  0xe7   :  { %v628_v23 = vpop.eup %627  ;;  %586 = vst.msk [vmem:[%s1555_s1 + $0x8] sm:$0xff] %vm40_vm0, %v554_v48  ;;  %v524_v39 = vmul.f32 %v626_v47, %v1588_v1  ;;  %v468_v54 = vadd.f32 1e-05, %v404_v52  ;;  %v467_v63 = vadd.f32 1e-05, %v403_v41  ;;  %v1267_v57 = vmul.f32 0.25, %v1045_v30 }
  0xe8   :  { %585 = vst.msk [vmem:[%s1555_s1] sm:$0xff] %vm40_vm0, %v553_v6  ;;  %v1589_v4 = vsub.f32 %v708_v0, %v1053_v38  ;;  %v374_v20 = vsub.f32 %v310_v19, %v1155_v56  ;;  %v373_v15 = vsub.f32 %v309_v58, %v1167_v53  ;;  %v216_v2 = vpop.xlane.xlu1 %215  ;;  %v213_v42 = vpop.xlane.xlu0 %212  ;;  %v1280_v0 = vmul.f32 %v1250_v59, %v1250_v59 }
  0xe9   :  { %v556_v26 = vmax.f32 %v524_v39, 0.0  ;;  %641 = vrsqrt.f32 %v468_v54  ;;  %v312_v12 = vmul.f32 0.25, %v216_v2  ;;  %v311_v30 = vmul.f32 0.25, %v213_v42 }
  0xea   :  { %v523_v13 = vmul.f32 %v628_v23, %v1589_v4  ;;  %v630_v16 = vpop.eup %629  ;;  %643 = vrsqrt.f32 %v467_v63  ;;  %v406_v48 = vmax.f32 %v374_v20, 0.0  ;;  %v405_v52 = vmax.f32 %v373_v15, 0.0 }
  0xeb   :  { %v632_v41 = vpop.eup %631  ;;  %588 = vst.msk [vmem:[%s1555_s1 + $0x18] sm:$0xff] %vm40_vm0, %v556_v26  ;;  %v1590_v38 = vsub.f32 %v736_v8, %v1065_v49  ;;  %v376_v53 = vsub.f32 %v312_v12, %v1176_v46  ;;  %v375_v47 = vsub.f32 %v311_v30, %v1182_v62  ;;  %v1292_v6 = vmul.f32 0.25, %v1047_v31  ;;  %v1595_v12 = vld [vmem:[#allocation7_spill] sm:$0xff] }
  0xec   :  { %v555_v5 = vmax.f32 %v523_v13, 0.0  ;;  %v1591_v19 = vsub.f32 %v741_v9, %v1067_v43  ;;  %v470_v23 = vadd.f32 1e-05, %v406_v48  ;;  %v469_v1 = vadd.f32 1e-05, %v405_v52  ;;  %v222_v8 = vpop.xlane.xlu1 %221  ;;  %v219_v49 = vpop.xlane.xlu0 %218  ;;  %v1592_v9 = vld [vmem:[#allocation2_spill] sm:$0xff] }
  0xed   :  { %v526_v56 = vmul.f32 %v630_v16, %v1590_v38  ;;  %v408_v46 = vmax.f32 %v376_v53, 0.0  ;;  %v407_v54 = vmax.f32 %v375_v47, 0.0  ;;  %v314_v62 = vmul.f32 0.25, %v222_v8  ;;  %v1593_v43 = vld [vmem:[#allocation11_spill] sm:$0xff] }
  0xee   :  { %587 = vst.msk [vmem:[%s1555_s1 + $0x10] sm:$0xff] %vm40_vm0, %v555_v5  ;;  %v525_v58 = vmul.f32 %v632_v41, %v1591_v19  ;;  %v634_v63 = vpop.eup %633  ;;  %v1303_v31 = vmul.f32 %v1267_v57, %v1267_v57  ;;  %645 = vrsqrt.f32 %v470_v23  ;;  %v313_v13 = vmul.f32 0.25, %v219_v49  ;;  %v1596_v16 = vld [vmem:[#allocation3_spill] sm:$0xff]  ;;  %v1597_v5 = vld [vmem:[#allocation14_spill] sm:$0xff] }
  0xef   :  { %v558_v39 = vmax.f32 %v526_v56, 0.0  ;;  %v636_v20 = vpop.eup %635  ;;  %v1594_v15 = vsub.f32 %v1592_v9, %v1593_v43  ;;  %647 = vrsqrt.f32 %v469_v1  ;;  %v472_v42 = vadd.f32 1e-05, %v408_v46 }
  0xf0   :  { %v557_v4 = vmax.f32 %v525_v58, 0.0  ;;  %v471_v26 = vadd.f32 1e-05, %v407_v54  ;;  %v1313_v30 = vmul.f32 0.25, %v1595_v12  ;;  %v1598_v48 = vsub.f32 %v1596_v16, %v1597_v5  ;;  %v228_v56 = vpop.xlane.xlu1 %227  ;;  %v225_v53 = vpop.xlane.xlu0 %224 }
  0xf1   :  { %590 = vst.msk [vmem:[%s1555_s1 + $0x28] sm:$0xff] %vm40_vm0, %v558_v39  ;;  %v528_v2 = vmul.f32 %v634_v63, %v1594_v15  ;;  %v378_v41 = vsub.f32 %v314_v62, %v1189_v35  ;;  %v377_v38 = vsub.f32 %v313_v13, %v1207_v14  ;;  %649 = vrsqrt.f32 %v472_v42  ;;  %v1599_v35 = vld [vmem:[#allocation4_spill] sm:$0xff]  ;;  %v1600_v14 = vld [vmem:[#allocation15_spill] sm:$0xff] }
  0xf2   :  { %589 = vst.msk [vmem:[%s1555_s1 + $0x20] sm:$0xff] %vm40_vm0, %v557_v4  ;;  %v527_v52 = vmul.f32 %v636_v20, %v1598_v48  ;;  %v316_v19 = vmul.f32 0.25, %v228_v56  ;;  %v315_v58 = vmul.f32 0.25, %v225_v53  ;;  %v638_v23 = vpop.eup %637  ;;  %651 = vrsqrt.f32 %v471_v26  ;;  %v1602_v13 = vld [vmem:[#allocation8_spill] sm:$0xff] }
  0xf3   :  { %v560_v47 = vmax.f32 %v528_v2, 0.0  ;;  %v410_v8 = vmax.f32 %v378_v41, 0.0  ;;  %v409_v49 = vmax.f32 %v377_v38, 0.0  ;;  %v640_v39 = vpop.eup %639  ;;  %v1326_v46 = vmul.f32 %v1292_v6, %v1292_v6 }
  0xf4   :  { %v559_v1 = vmax.f32 %v527_v52, 0.0  ;;  %v1601_v54 = vsub.f32 %v1599_v35, %v1600_v14  ;;  %v380_v63 = vsub.f32 %v316_v19, %v1216_v60  ;;  %v379_v4 = vsub.f32 %v315_v58, %v1222_v22  ;;  %v234_v42 = vpop.xlane.xlu1 %233  ;;  %v231_v26 = vpop.xlane.xlu0 %230 }
  0xf5   :  { %592 = vst.msk [vmem:[%s1555_s1 + $0x38] sm:$0xff] %vm40_vm0, %v560_v47  ;;  %v1338_v20 = vmul.f32 0.25, %v1602_v13  ;;  %v1603_v9 = vsub.f32 %v769_v17, %v1105_v55  ;;  %v474_v15 = vadd.f32 1e-05, %v410_v8  ;;  %v473_v2 = vadd.f32 1e-05, %v409_v49 }
  0xf6   :  { %v530_v62 = vmul.f32 %v638_v23, %v1601_v54  ;;  %591 = vst.msk [vmem:[%s1555_s1 + $0x30] sm:$0xff] %vm40_vm0, %v559_v1  ;;  %v412_v60 = vmax.f32 %v380_v63, 0.0  ;;  %v411_v16 = vmax.f32 %v379_v4, 0.0  ;;  %v318_v22 = vmul.f32 0.25, %v234_v42  ;;  %v642_v5 = vpop.eup %641  ;;  %v1604_v17 = vld [vmem:[#allocation5_spill] sm:$0xff]  ;;  %v1605_v55 = vld [vmem:[#allocation16_spill] sm:$0xff] }
  0xf7   :  { %v529_v43 = vmul.f32 %v640_v39, %v1603_v9  ;;  %v1349_v48 = vmul.f32 %v1313_v30, %v1313_v30  ;;  %653 = vrsqrt.f32 %v474_v15  ;;  %v317_v41 = vmul.f32 0.25, %v231_v26  ;;  %v644_v38 = vpop.eup %643  ;;  %v1610_v42 = vld [vmem:[#allocation12_spill] sm:$0xff] }
  0xf8   :  { %v562_v12 = vmax.f32 %v530_v62, 0.0  ;;  %v1606_v56 = vsub.f32 %v1604_v17, %v1605_v55  ;;  %655 = vrsqrt.f32 %v473_v2  ;;  %v476_v47 = vadd.f32 1e-05, %v412_v60  ;;  %v240_v39 = vpop.xlane.xlu1 %239  ;;  %v237_v35 = vpop.xlane.xlu0 %236 }
  0xf9   :  { %v561_v52 = vmax.f32 %v529_v43, 0.0  ;;  %v475_v19 = vadd.f32 1e-05, %v411_v16  ;;  %v1360_v58 = vmul.f32 %v1338_v20, %v1338_v20  ;;  %v1607_v23 = vsub.f32 %v783_v21, %v1115_v50  ;;  %v1608_v43 = vld [vmem:[#allocation9_spill] sm:$0xff]  ;;  %v1609_v21 = vld [vmem:[#allocation10_spill] sm:$0xff] }
  0xfa   :  { %594 = vst.msk [vmem:[%s1555_s1 + $0x48] sm:$0xff] %vm40_vm0, %v562_v12  ;;  %v532_v53 = vmul.f32 %v642_v5, %v1606_v56  ;;  %v382_v8 = vsub.f32 %v318_v22, %v1229_v44  ;;  %v381_v49 = vsub.f32 %v317_v41, %v1247_v3  ;;  %657 = vrsqrt.f32 %v476_v47  ;;  %v1613_v56 = vld [vmem:[#allocation13_spill] sm:$0xff] }
  0xfb   :  { %593 = vst.msk [vmem:[%s1555_s1 + $0x40] sm:$0xff] %vm40_vm0, %v561_v52  ;;  %v531_v1 = vmul.f32 %v644_v38, %v1607_v23  ;;  %v320_v54 = vmul.f32 0.25, %v240_v39  ;;  %v319_v62 = vmul.f32 0.25, %v237_v35  ;;  %659 = vrsqrt.f32 %v475_v19  ;;  %v646_v9 = vpop.eup %645  ;;  %v1614_v23 = vld [vmem:[#allocation17_spill] sm:$0xff] }
  0xfc   :  { %v564_v14 = vmax.f32 %v532_v53, 0.0  ;;  %v414_v4 = vmax.f32 %v382_v8, 0.0  ;;  %v413_v13 = vmax.f32 %v381_v49, 0.0  ;;  %v1372_v15 = vmul.f32 0.25, %v1608_v43  ;;  %v648_v2 = vpop.eup %647  ;;  %v246_v5 = vpop.xlane.xlu1 %245 }
  0xfd   :  { %v563_v63 = vmax.f32 %v531_v1, 0.0  ;;  %v1375_v50 = vmul.f32 0.25, %v1609_v21  ;;  %v384_v44 = vsub.f32 %v320_v54, %v1257_v27  ;;  %v383_v3 = vsub.f32 %v319_v62, %v1280_v0  ;;  %v243_v52 = vpop.xlane.xlu0 %242 }
  0xfe   :  { %596 = vst.msk [vmem:[%s1555_s1 + $0x58] sm:$0xff] %vm40_vm0, %v564_v14  ;;  %v1384_v26 = vmul.f32 0.25, %v1610_v42  ;;  %v1611_v12 = vsub.f32 %v792_v24, %v1131_v34  ;;  %v478_v16 = vadd.f32 1e-05, %v414_v4  ;;  %v477_v22 = vadd.f32 1e-05, %v413_v13  ;;  %v650_v55 = vpop.eup %649 }
  0xff   :  { %595 = vst.msk [vmem:[%s1555_s1 + $0x50] sm:$0xff] %vm40_vm0, %v563_v63  ;;  %v1612_v27 = vsub.f32 %v797_v25, %v1149_v61  ;;  %v416_v41 = vmax.f32 %v384_v44, 0.0  ;;  %v415_v38 = vmax.f32 %v383_v3, 0.0  ;;  %v322_v17 = vmul.f32 0.25, %v246_v5  ;;  %v652_v24 = vpop.eup %651  ;;  %v1616_v25 = vld [vmem:[#allocation18_spill] sm:$0xff] }
 0x100   :  { %v534_v60 = vmul.f32 %v646_v9, %v1611_v12  ;;  %v1397_v53 = vmul.f32 0.25, %v1613_v56  ;;  %661 = vrsqrt.f32 %v478_v16  ;;  %v321_v19 = vmul.f32 0.25, %v243_v52  ;;  %v252_v62 = vpop.xlane.xlu1 %251 }
 0x101   :  { %v533_v0 = vmul.f32 %v648_v2, %v1612_v27  ;;  %v1615_v1 = vsub.f32 %v806_v28, %v1614_v23  ;;  %663 = vrsqrt.f32 %v477_v22  ;;  %v480_v49 = vadd.f32 1e-05, %v416_v41  ;;  %v249_v63 = vpop.xlane.xlu0 %248 }
 0x102   :  { %v566_v47 = vmax.f32 %v534_v60, 0.0  ;;  %v1617_v61 = vsub.f32 %v811_v29, %v1616_v25  ;;  %v479_v35 = vadd.f32 1e-05, %v415_v38  ;;  %v386_v14 = vsub.f32 %v322_v17, %v1303_v31 }
 0x103   :  { %v565_v34 = vmax.f32 %v533_v0, 0.0  ;;  %v536_v8 = vmul.f32 %v650_v55, %v1615_v1  ;;  %v385_v54 = vsub.f32 %v321_v19, %v1326_v46  ;;  %665 = vrsqrt.f32 %v480_v49 }
 0x104   :  { %598 = vst.msk [vmem:[%s1555_s1 + $0x68] sm:$0xff] %vm40_vm0, %v566_v47  ;;  %v535_v39 = vmul.f32 %v652_v24, %v1617_v61  ;;  %v324_v4 = vmul.f32 0.25, %v252_v62  ;;  %v323_v13 = vmul.f32 0.25, %v249_v63  ;;  %667 = vrsqrt.f32 %v479_v35  ;;  %v654_v21 = vpop.eup %653  ;;  %v258_v5 = vpop.xlane.xlu1 %257 }
 0x105   :  { %597 = vst.msk [vmem:[%s1555_s1 + $0x60] sm:$0xff] %vm40_vm0, %v565_v34  ;;  %v568_v28 = vmax.f32 %v536_v8, 0.0  ;;  %v418_v29 = vmax.f32 %v386_v14, 0.0  ;;  %v417_v43 = vmax.f32 %v385_v54, 0.0  ;;  %v358_v31 = vmul.f32 %v1372_v15, %v1372_v15  ;;  %v656_v2 = vpop.eup %655  ;;  %v255_v52 = vpop.xlane.xlu0 %254  ;;  %v1623_v54 = vld [vmem:[#allocation6_spill] sm:$0xff] }
 0x106   :  { %v567_v9 = vmax.f32 %v535_v39, 0.0  ;;  %v357_v46 = vmul.f32 %v1375_v50, %v1375_v50  ;;  %v388_v44 = vsub.f32 %v324_v4, %v1349_v48  ;;  %v387_v3 = vsub.f32 %v323_v13, %v1360_v58 }
 0x107   :  { %600 = vst.msk [vmem:[%s1555_s1 + $0x78] sm:$0xff] %vm40_vm0, %v568_v28  ;;  %v360_v42 = vmul.f32 %v1384_v26, %v1384_v26  ;;  %v1618_v12 = vsub.f32 %v820_v32, %v1172_v10  ;;  %v482_v16 = vadd.f32 1e-05, %v418_v29  ;;  %v481_v22 = vadd.f32 1e-05, %v417_v43  ;;  %v658_v38 = vpop.eup %657 }
 0x108   :  { %599 = vst.msk [vmem:[%s1555_s1 + $0x70] sm:$0xff] %vm40_vm0, %v567_v9  ;;  %v1619_v48 = vsub.f32 %v825_v33, %v1192_v45  ;;  %v420_v27 = vmax.f32 %v388_v44, 0.0  ;;  %v419_v0 = vmax.f32 %v387_v3, 0.0  ;;  %v326_v41 = vmul.f32 0.25, %v258_v5  ;;  %v660_v32 = vpop.eup %659  ;;  %v1621_v33 = vld [vmem:[#allocation19_spill] sm:$0xff]  ;;  %v264_v49 = vpop.xlane.xlu1 %263 }
 0x109   :  { %v538_v60 = vmul.f32 %v654_v21, %v1618_v12  ;;  %v359_v17 = vmul.f32 %v1397_v53, %v1397_v53  ;;  %669 = vrsqrt.f32 %v482_v16  ;;  %v325_v56 = vmul.f32 0.25, %v255_v52  ;;  %v261_v25 = vpop.xlane.xlu0 %260  ;;  %v687_v5 = vld [vmem:[%s1554_s0 + $0xc8] sm:$0xff] }
 0x10a   :  { %v537_v58 = vmul.f32 %v656_v2, %v1619_v48  ;;  %v1620_v47 = vsub.f32 %v834_v36, %v1198_v51  ;;  %671 = vrsqrt.f32 %v481_v22  ;;  %v484_v24 = vadd.f32 1e-05, %v420_v27  ;;  %v686_v2 = vld [vmem:[%s1554_s0 + $0xb0] sm:$0xff]  ;;  %v688_v27 = vld [vmem:[%s1554_s0 + $0xc0] sm:$0xff] }
 0x10b   :  { %v570_v55 = vmax.f32 %v538_v60, 0.0  ;;  %v1622_v45 = vsub.f32 %v839_v37, %v1621_v33  ;;  %v483_v23 = vadd.f32 1e-05, %v419_v0  ;;  %v390_v1 = vsub.f32 %v326_v41, %v358_v31 }
 0x10c   :  { %v569_v10 = vmax.f32 %v537_v58, 0.0  ;;  %v540_v19 = vmul.f32 %v658_v38, %v1620_v47  ;;  %v389_v8 = vsub.f32 %v325_v56, %v357_v46  ;;  %673 = vrsqrt.f32 %v484_v24  ;;  %v689_v38 = vld [vmem:[%s1554_s0 + $0xd8] sm:$0xff]  ;;  %v690_v56 = vld [vmem:[%s1554_s0 + $0xd0] sm:$0xff] }
 0x10d   :  { %602 = vst.msk [vmem:[%s1555_s1 + $0x88] sm:$0xff] %vm40_vm0, %v570_v55  ;;  %v539_v34 = vmul.f32 %v660_v32, %v1622_v45  ;;  %v328_v51 = vmul.f32 0.25, %v264_v49  ;;  %v327_v61 = vmul.f32 0.25, %v261_v25  ;;  %675 = vrsqrt.f32 %v483_v23  ;;  %v662_v37 = vpop.eup %661  ;;  %v693_v25 = vld [vmem:[%s1554_s0 + $0xf8] sm:$0xff] }
 0x10e   :  { %601 = vst.msk [vmem:[%s1555_s1 + $0x80] sm:$0xff] %vm40_vm0, %v569_v10  ;;  %v572_v36 = vmax.f32 %v540_v19, 0.0  ;;  %v422_v35 = vmax.f32 %v390_v1, 0.0  ;;  %v421_v14 = vmax.f32 %v389_v8, 0.0  ;;  %v445_v62 = vsub.f32 %v1623_v54, %v1232_v7  ;;  %v664_v4 = vpop.eup %663  ;;  %v685_v7 = vld [vmem:[%s1554_s0 + $0xb8] sm:$0xff]  ;;  %v692_v1 = vld [vmem:[%s1554_s0 + $0xe0] sm:$0xff] }
 0x10f   :  { %v571_v39 = vmax.f32 %v539_v34, 0.0  ;;  %v392_v63 = vsub.f32 %v328_v51, %v360_v42  ;;  %v391_v28 = vsub.f32 %v327_v61, %v359_v17  ;;  %v1624_v13 = vsub.f32 %v848_v40, %v1212_v18  ;;  %v694_v61 = vld [vmem:[%s1554_s0 + $0xf0] sm:$0xff] }
 0x110   :  { %604 = vst.msk [vmem:[%s1555_s1 + $0x98] sm:$0xff] %vm40_vm0, %v572_v36  ;;  %v486_v29 = vadd.f32 1e-05, %v422_v35  ;;  %v485_v43 = vadd.f32 1e-05, %v421_v14  ;;  %v448_v21 = vsub.f32 %v685_v7, %v1238_v11  ;;  %v541_v31 = vmul.f32 %v664_v4, %v445_v62  ;;  %v666_v3 = vpop.eup %665 }
 0x111   :  { %603 = vst.msk [vmem:[%s1555_s1 + $0x90] sm:$0xff] %vm40_vm0, %v571_v39  ;;  %v542_v9 = vmul.f32 %v662_v37, %v1624_v13  ;;  %v424_v46 = vmax.f32 %v392_v63, 0.0  ;;  %v423_v44 = vmax.f32 %v391_v28, 0.0  ;;  %v447_v42 = vsub.f32 %v686_v2, %v1250_v59  ;;  %v668_v18 = vpop.eup %667 }
 0x112   :  { %677 = vrsqrt.f32 %v486_v29  ;;  %v573_v12 = vmax.f32 %v541_v31, 0.0  ;;  %v544_v60 = vmul.f32 %v666_v3, %v448_v21  ;;  %v450_v52 = vsub.f32 %v687_v5, %v1267_v57 }
 0x113   :  { %v574_v40 = vmax.f32 %v542_v9, 0.0  ;;  %679 = vrsqrt.f32 %v485_v43  ;;  %v488_v16 = vadd.f32 1e-05, %v424_v46  ;;  %v543_v11 = vmul.f32 %v668_v18, %v447_v42 }
 0x114   :  { %v487_v22 = vadd.f32 1e-05, %v423_v44  ;;  %605 = vst.msk [vmem:[%s1555_s1 + $0xa0] sm:$0xff] %vm40_vm0, %v573_v12  ;;  %v576_v59 = vmax.f32 %v544_v60, 0.0  ;;  %v449_v0 = vsub.f32 %v688_v27, %v1292_v6  ;;  %v452_v17 = vsub.f32 %v689_v38, %v1313_v30 }
 0x115   :  { %606 = vst.msk [vmem:[%s1555_s1 + $0xa8] sm:$0xff] %vm40_vm0, %v574_v40  ;;  %681 = vrsqrt.f32 %v488_v16  ;;  %v575_v48 = vmax.f32 %v543_v11, 0.0  ;;  %v451_v32 = vsub.f32 %v690_v56, %v1338_v20  ;;  %v691_v20 = vld [vmem:[%s1554_s0 + $0xe8] sm:$0xff]  ;;  %v453_v8 = vsub.f32 %v692_v1, %v1375_v50 }
 0x116   :  { %683 = vrsqrt.f32 %v487_v22  ;;  %v670_v58 = vpop.eup %669  ;;  %608 = vst.msk [vmem:[%s1555_s1 + $0xb8] sm:$0xff] %vm40_vm0, %v576_v59  ;;  %v454_v45 = vsub.f32 %v691_v20, %v1372_v15  ;;  %v456_v36 = vsub.f32 %v693_v25, %v1384_v26  ;;  %v455_v39 = vsub.f32 %v694_v61, %v1397_v53 }
 0x117   :  { %v672_v41 = vpop.eup %671  ;;  %607 = vst.msk [vmem:[%s1555_s1 + $0xb0] sm:$0xff] %vm40_vm0, %v575_v48  ;;  %v546_v57 = vmul.f32 %v670_v58, %v450_v52 }
 0x118   :  { %v545_v55 = vmul.f32 %v672_v41, %v449_v0 }
 0x119   :  { %v674_v6 = vpop.eup %673  ;;  %v578_v10 = vmax.f32 %v546_v57, 0.0 }
 0x11a   :  { %v676_v47 = vpop.eup %675  ;;  %v577_v19 = vmax.f32 %v545_v55, 0.0  ;;  %v548_v24 = vmul.f32 %v674_v6, %v452_v17 }
 0x11b   :  { %610 = vst.msk [vmem:[%s1555_s1 + $0xc8] sm:$0xff] %vm40_vm0, %v578_v10  ;;  %v547_v33 = vmul.f32 %v676_v47, %v451_v32 }
 0x11c   :  { %609 = vst.msk [vmem:[%s1555_s1 + $0xc0] sm:$0xff] %vm40_vm0, %v577_v19  ;;  %v580_v30 = vmax.f32 %v548_v24, 0.0 }
 0x11d   :  { %v579_v34 = vmax.f32 %v547_v33, 0.0 }
 0x11e   :  { %612 = vst.msk [vmem:[%s1555_s1 + $0xd8] sm:$0xff] %vm40_vm0, %v580_v30 }
 0x11f   :  { %v678_v23 = vpop.eup %677  ;;  %611 = vst.msk [vmem:[%s1555_s1 + $0xd0] sm:$0xff] %vm40_vm0, %v579_v34 }
 0x120   :  { %v680_v49 = vpop.eup %679  ;;  %v550_v15 = vmul.f32 %v678_v23, %v454_v45 }
 0x121   :  { %v549_v51 = vmul.f32 %v680_v49, %v453_v8 }
 0x122   :  { %v682_v50 = vpop.eup %681  ;;  %v582_v35 = vmax.f32 %v550_v15, 0.0 }
 0x123   :  { %v684_v14 = vpop.eup %683  ;;  %v581_v37 = vmax.f32 %v549_v51, 0.0  ;;  %v552_v54 = vmul.f32 %v682_v50, %v456_v36 }
 0x124   :  { %614 = vst.msk [vmem:[%s1555_s1 + $0xe8] sm:$0xff] %vm40_vm0, %v582_v35  ;;  %v551_v62 = vmul.f32 %v684_v14, %v455_v39 }
 0x125   :  { %613 = vst.msk [vmem:[%s1555_s1 + $0xe0] sm:$0xff] %vm40_vm0, %v581_v37  ;;  %v584_v26 = vmax.f32 %v552_v54, 0.0 }
 0x126   :  { %v583_v63 = vmax.f32 %v551_v62, 0.0 }
 0x127   :  { %616 = vst.msk [vmem:[%s1555_s1 + $0xf8] sm:$0xff] %vm40_vm0, %v584_v26 }
 0x128   :  { %615 = vst.msk [vmem:[%s1555_s1 + $0xf0] sm:$0xff] %vm40_vm0, %v583_v63 }

// kernel: forward.22
= control target key start
LH: loop header
LB: loop body
LE: loop exit
PB: predicated region body
PF: predicated region fallthrough
CT: control target
= control target key end

     0   :  { %v181_v0 = vmov 0.0   ;;  %vm182_vm0 = vmmov 0   ;;  %v183_v3 = vmov 0   ;;  %s261_s1 = inlined_call_operand.vmem [shape: f32[128,128], index: 1, kind: input, shape index: {}]   ;;  %s262_s2 = inlined_call_operand.vmem [shape: f32[8,1], index: 2, kind: input, shape index: {}]   ;;  %s263_s0 = inlined_call_operand.vmem [shape: f32[8,128], index: 0, kind: input, shape index: {}]   ;;  %s264_s3 = inlined_call_operand.vmem [shape: f32[8,128], index: 3, kind: output, shape index: {}]  }
   0x1   :  { %142 = vmatprep.subr.mxu0 %v181_v0  ;;  %v36_v1 = vld [vmem:[%s261_s1 + $0x78] sm:$0xff]  ;;  %v35_v2 = vld [vmem:[%s261_s1 + $0x70] sm:$0xff]  ;;  %174 = vmatprep.mubr.msk.f32.mxu0 %vm182_vm0, %v181_v0  ;;  %v34_v4 = vld [vmem:[%s261_s1 + $0x68] sm:$0xff] }
   0x2   :  { %143 = vmatpush3.msra.mxu0 %v36_v1  ;;  %180 = vset.pattern.permute.xlu0 %v183_v3  ;;  %v33_v5 = vld [vmem:[%s261_s1 + $0x60] sm:$0xff]  ;;  %v32_v7 = vld [vmem:[%s261_s1 + $0x58] sm:$0xff]  ;;  %v31_v8 = vld [vmem:[%s261_s1 + $0x50] sm:$0xff] }
   0x3   :  { %144 = vmatprep.subr.mxu0 %v181_v0  ;;  %v113_v6 = vld [vmem:[%s262_s2] sm:$0xff]  ;;  %v30_v9 = vld [vmem:[%s261_s1 + $0x48] sm:$0xff]  ;;  %v28_v11 = vld [vmem:[%s261_s1 + $0x38] sm:$0xff] }
   0x4   :  { %145 = vmatpush3.msra.mxu0 %v35_v2  ;;  %116 = vperm.xlu0 %180, %v113_v6   ;;  %v29_v10 = vld [vmem:[%s261_s1 + $0x40] sm:$0xff]  ;;  %v27_v12 = vld [vmem:[%s261_s1 + $0x30] sm:$0xff]  ;;  %v26_v13 = vld [vmem:[%s261_s1 + $0x28] sm:$0xff] }
   0x5   :  { %146 = vmatprep.subr.mxu0 %v181_v0  ;;  %v25_v14 = vld [vmem:[%s261_s1 + $0x20] sm:$0xff]  ;;  %v24_v15 = vld [vmem:[%s261_s1 + $0x18] sm:$0xff]  ;;  %v23_v16 = vld [vmem:[%s261_s1 + $0x10] sm:$0xff] }
   0x6   :  { %147 = vmatpush3.msra.mxu0 %v34_v4  ;;  %v22_v17 = vld [vmem:[%s261_s1 + $0x8] sm:$0xff]  ;;  %v21_v18 = vld [vmem:[%s261_s1] sm:$0xff] }
   0x7   :  { %148 = vmatprep.subr.mxu0 %v181_v0  ;;  %v20_v19 = vld [vmem:[%s263_s0] sm:$0xff] }
   0x8   :  { %149 = vmatpush3.msra.mxu0 %v33_v5 }
   0x9   :  { %150 = vmatprep.subr.mxu0 %v181_v0 }
   0xa   :  { %151 = vmatpush3.msra.mxu0 %v32_v7 }
   0xb   :  { %152 = vmatprep.subr.mxu0 %v181_v0 }
   0xc   :  { %153 = vmatpush3.msra.mxu0 %v31_v8 }
   0xd   :  { %154 = vmatprep.subr.mxu0 %v181_v0 }
   0xe   :  { %155 = vmatpush3.msra.mxu0 %v30_v9 }
   0xf   :  { %156 = vmatprep.subr.mxu0 %v181_v0 }
  0x10   :  { %157 = vmatpush3.msra.mxu0 %v29_v10 }
  0x11   :  { %158 = vmatprep.subr.mxu0 %v181_v0 }
  0x12   :  { %159 = vmatpush3.msra.mxu0 %v28_v11 }
  0x13   :  { %160 = vmatprep.subr.mxu0 %v181_v0 }
  0x14   :  { %161 = vmatpush3.msra.mxu0 %v27_v12 }
  0x15   :  { %162 = vmatprep.subr.mxu0 %v181_v0 }
  0x16   :  { %163 = vmatpush3.msra.mxu0 %v26_v13 }
  0x17   :  { %164 = vmatprep.subr.mxu0 %v181_v0 }
  0x18   :  { %165 = vmatpush3.msra.mxu0 %v25_v14 }
  0x19   :  { %166 = vmatprep.subr.mxu0 %v181_v0 }
  0x1a   :  { %167 = vmatpush3.msra.mxu0 %v24_v15 }
  0x1b   :  { %168 = vmatprep.subr.mxu0 %v181_v0 }
  0x1c   :  { %169 = vmatpush3.msra.mxu0 %v23_v16 }
  0x1d   :  { %170 = vmatprep.subr.mxu0 %v181_v0 }
  0x1e   :  { %171 = vmatpush3.msra.mxu0 %v22_v17 }
  0x1f   :  { %172 = vmatprep.subr.mxu0 %v181_v0 }
  0x20   :  { %173 = vmatpush3.msra.mxu0 %v21_v18 }
  0x21   :  { %175 = vmatmul.mubr.f32.vlgmr.msra.gmra.mxu0 %v20_v19 }
  0x7f   :  { %v117_v20 = vpop.permute.xlu0 %116 }
  0xe1   :  { %v103_v21 = vpop.f32.mrf.mxu0 }
  0xe2   :  { %v119_v22 = vadd.f32 %v117_v20, %v103_v21 }
  0xe3   :  { %v176_v23 = vpop.f32.mrf.mxu0 }
  0xe4   :  { %120 = vst [vmem:[%s264_s3] sm:$0xff] %v119_v22 }

</bundles_post_ra>
